<compile_context>
chip_gen: v7x
topology: tpu7x:2x2x1
jax: 0.10.0
libtpu: 0.0.40
codegen_flags: <defaults>
</compile_context>

<pallas_src>
import functools

import jax
import jax.numpy as jnp
from jax.experimental import pallas as pl
from jax.experimental.pallas import tpu as pltpu

_BN_EPS = 1e-5


def _pick_tile(total, target):
    """Largest tile that divides `total`, is <= target and (if < total) a multiple of 8."""
    if total <= target:
        return total
    for d in range(min(total, target), 0, -1):
        if total % d == 0 and d % 8 == 0:
            return d
    return total


# ----------------------------------------------------------------------------
# Pallas kernels
# ----------------------------------------------------------------------------

def _pconv_stats_kernel(x_ref, w_ref, y_ref, st_ref):
    # 1x1 Conv1d == per-row matmul; also emit per-tile sum / sum-of-squares so
    # BN statistics do not have to re-read the activation from HBM.
    y = jnp.dot(x_ref[...], w_ref[...], preferred_element_type=jnp.float32)
    y_ref[...] = y
    st_ref[0] = jnp.concatenate(
        [jnp.sum(y, axis=0, keepdims=True),
         jnp.sum(y * y, axis=0, keepdims=True)], axis=0)


def _affine_lrelu_kernel(x_ref, sc_ref, sh_ref, o_ref, *, slope):
    # folded BN (per-lane scale/shift) + LeakyReLU, lane-dense layout
    y = x_ref[...] * sc_ref[...] + sh_ref[...]
    o_ref[...] = jnp.where(y >= 0, y, slope * y)


def _graph_kernel(hr_ref, hf_ref, d_ref):
    # D[i, j] = | ||h_i||^2 + ||h_j||^2 - 2 h_i . h_j |   (row-tiled over i)
    hr = hr_ref[0]                                        # [nt, F]
    hf = hf_ref[0]                                        # [N,  F]
    sq_col = jnp.sum(hr * hr, axis=1, keepdims=True)      # [nt, 1]
    hh = hf * hf
    ones = jnp.ones((1, hf.shape[1]), dtype=hf.dtype)
    # ones @ hh^T yields the column norms directly in lane layout (no transpose)
    sq_row = jax.lax.dot_general(ones, hh, (((1,), (1,)), ((), ())),
                                 preferred_element_type=jnp.float32)    # [1, N]
    gram = jax.lax.dot_general(hr, hf, (((1,), (1,)), ((), ())),
                               preferred_element_type=jnp.float32)      # [nt, N]
    d_ref[0] = jnp.abs(sq_col + sq_row - 2.0 * gram)


def _fused_layer_kernel(x1_ref, x2_ref, h_ref,
                        w0_ref, b0_ref, wl_ref, bl_ref,
                        w1_ref, b1t_ref, e1_ref, s1_ref,
                        w2_ref, b2_ref, e2_ref, s2_ref,
                        slw_ref, slb_ref,
                        out_ref, stats_ref, agg_ref, *,
                        nt, min_nn, out_feat, n_pts):
    """Fused ConvLayer: GConv edges + node agg + self-loop conv + lnl + BN stats.

    Grid = (B, node tiles).  The node-tile axis is sequential ("arbitrary");
    per-node aggregates are stored into a per-batch VMEM scratch and the
    scrambled lnl combination + output write happen at the last node tile.
    """
    g = pl.program_id(1)

    x1 = x1_ref[0]                         # [ntk, in_feat]  gathered neighbours
    lr = x1 - x2_ref[0]                    # raw edge labels (x_nbr - x_nearest)
    d_lab = jnp.sum(lr * lr, axis=1, keepdims=True)                      # [ntk, 1]

    lab = jnp.dot(lr, w0_ref[...], preferred_element_type=jnp.float32) + b0_ref[...]
    lab = jnp.where(lab >= 0, lab, 0.02 * lab)                           # LeakyReLU(0.02)

    thetal = jnp.dot(lab, wl_ref[...], preferred_element_type=jnp.float32) + bl_ref[...]

    # theta1 contraction against x1, all on the MXU:
    #   t1w[m, i*R+r] = (lab @ roll-expanded W1)[m, i*R+r] == theta1[m, r, i]
    #   x1rep = x1 @ E1 replicates x1[m, i] into column i*R+r
    #   (t1w * x1rep) @ S1 sums over i for each r
    t1w = jnp.dot(lab, w1_ref[...], preferred_element_type=jnp.float32)   # [ntk, in*R]
    x1rep = jnp.dot(x1, e1_ref[...], preferred_element_type=jnp.float32)  # [ntk, in*R]
    y = jnp.dot(t1w * x1rep, s1_ref[...], preferred_element_type=jnp.float32)
    y = (y + jnp.dot(x1, b1t_ref[...], preferred_element_type=jnp.float32)) * thetal

    # theta2 contraction against y (same trick), giving the per-edge output
    t2w = jnp.dot(lab, w2_ref[...], preferred_element_type=jnp.float32)   # [ntk, R*out]
    yrep = jnp.dot(y, e2_ref[...], preferred_element_type=jnp.float32)    # [ntk, R*out]
    z = jnp.dot(t2w * yrep, s2_ref[...], preferred_element_type=jnp.float32)
    z = z + jnp.dot(y, b2_ref[...], preferred_element_type=jnp.float32)   # [ntk, out]

    z = z * jnp.exp(-d_lab / 10.0)
    agg_tile = jnp.sum(z.reshape(nt, min_nn, out_feat), axis=1)           # [nt, out]
    agg_ref[pl.ds(g * nt, nt), :] = agg_tile

    @pl.when(g == pl.num_programs(1) - 1)
    def _():
        agg = agg_ref[...]                                                # [N, out]
        # faithful reproduction of torch's raw reshape(-1, out_feat, N) scramble
        h_nl = jnp.transpose(jnp.reshape(agg, (out_feat, n_pts)))         # [N, out]
        h_sl = jnp.dot(h_ref[0], slw_ref[...],
                       preferred_element_type=jnp.float32)                # [N, out]
        outv = (h_sl + h_nl) / float(min_nn + 1) + slb_ref[...]
        out_ref[0] = outv
        stats_ref[0] = jnp.concatenate(
            [jnp.sum(outv, axis=0, keepdims=True),
             jnp.sum(outv * outv, axis=0, keepdims=True)], axis=0)


# ----------------------------------------------------------------------------
# Pallas wrappers
# ----------------------------------------------------------------------------

def pointwise_conv_stats(x2, w, row_tile=2048):
    # x2: [M, Cin], w: [Cin, Cout] -> y: [M, Cout], stats: [G, 2, Cout]
    M, Cin = x2.shape
    Cout = w.shape[1]
    tm = _pick_tile(M, row_tile)
    gm = M // tm
    return pl.pallas_call(
        _pconv_stats_kernel,
        out_shape=(jax.ShapeDtypeStruct((M, Cout), jnp.float32),
                   jax.ShapeDtypeStruct((gm, 2, Cout), jnp.float32)),
        grid=(gm,),
        in_specs=[pl.BlockSpec((tm, Cin), lambda g: (g, 0)),
                  pl.BlockSpec((Cin, Cout), lambda g: (0, 0))],
        out_specs=(pl.BlockSpec((tm, Cout), lambda g: (g, 0)),
                   pl.BlockSpec((1, 2, Cout), lambda g: (g, 0, 0))),
        compiler_params=pltpu.CompilerParams(dimension_semantics=("parallel",)),
    )(x2, w)


def bn_lrelu(x, scale, shift, slope, row_tile=2048):
    # x: [..., C] channels-last; scale/shift: [C]
    shp = x.shape
    C = shp[-1]
    M = x.size // C
    kern = functools.partial(_affine_lrelu_kernel, slope=slope)
    if 128 % C == 0 and (M * C) % 128 == 0:
        # lane-dense path: free reshape to [-1, 128]; channel pattern = lane % C
        rep = 128 // C
        xw = x.reshape(-1, 128)
        sc = jnp.tile(scale, rep)[None, :]
        sh = jnp.tile(shift, rep)[None, :]
        mw = xw.shape[0]
        tm = _pick_tile(mw, row_tile)
        y = pl.pallas_call(
            kern,
            out_shape=jax.ShapeDtypeStruct((mw, 128), jnp.float32),
            grid=(mw // tm,),
            in_specs=[pl.BlockSpec((tm, 128), lambda g: (g, 0)),
                      pl.BlockSpec((1, 128), lambda g: (0, 0)),
                      pl.BlockSpec((1, 128), lambda g: (0, 0))],
            out_specs=pl.BlockSpec((tm, 128), lambda g: (g, 0)),
            compiler_params=pltpu.CompilerParams(dimension_semantics=("parallel",)),
        )(xw, sc, sh)
        return y.reshape(shp)
    # lane-sparse fallback (C does not divide 128)
    x2 = x.reshape(M, C)
    tm = _pick_tile(M, row_tile)
    y = pl.pallas_call(
        kern,
        out_shape=jax.ShapeDtypeStruct((M, C), jnp.float32),
        grid=(M // tm,),
        in_specs=[pl.BlockSpec((tm, C), lambda g: (g, 0)),
                  pl.BlockSpec((1, C), lambda g: (0, 0)),
                  pl.BlockSpec((1, C), lambda g: (0, 0))],
        out_specs=pl.BlockSpec((tm, C), lambda g: (g, 0)),
        compiler_params=pltpu.CompilerParams(dimension_semantics=("parallel",)),
    )(x2, scale[None, :], shift[None, :])
    return y.reshape(shp)


def compute_graph(h, row_tile=1024):
    # h: [B, N, F] -> D: [B, N, N], tiled over rows of D
    B, N, F = h.shape
    nt = _pick_tile(N, row_tile)
    return pl.pallas_call(
        _graph_kernel,
        out_shape=jax.ShapeDtypeStruct((B, N, N), jnp.float32),
        grid=(B, N // nt),
        in_specs=[pl.BlockSpec((1, nt, F), lambda b, r: (b, r, 0)),
                  pl.BlockSpec((1, N, F), lambda b, r: (b, 0, 0))],
        out_specs=pl.BlockSpec((1, nt, N), lambda b, r: (b, r, 0)),
        compiler_params=pltpu.CompilerParams(
            dimension_semantics=("parallel", "parallel")),
    )(h, h)


def fused_conv_layer(h, x_tilde1, x_tilde2, p, cfg, node_tile=256):
    # h: [B, N, in_feat]; x_tilde1/2: [B, N*min_nn, in_feat]
    # -> (layer output pre-BN [B, N, out_feat], BN partial stats [B, 2, out_feat])
    B, N, Fin = h.shape
    F2 = cfg['out_feat']
    R = cfg['rank_theta']
    ff = cfg['fnet_feat']
    s1, s2 = cfg['stride_th1'], cfg['stride_th2']
    min_nn = cfg['min_nn']
    in_feat = cfg['in_feat']
    n1, n2 = in_feat // s1, F2 // s2
    gp = p['gconv']

    # ---- trace-time weight preprocessing (replaces in-kernel myroll/concat) ----
    shifts1 = [0] + [(ss + 1) * s1 for ss in range(1, n1)]
    shifts2 = [0] + [(ss + 1) * s2 for ss in range(1, n2)]
    w1_big = jnp.concatenate([jnp.roll(gp['W1'], -s, axis=0) for s in shifts1], axis=1)
    # reorder columns to (i, r) so the x1 expansion/selection matmuls line up
    w1t_big = w1_big.reshape(ff, R, in_feat).transpose(0, 2, 1).reshape(ff, in_feat * R)
    w2_big = jnp.concatenate([jnp.roll(gp['W2'], -s, axis=0) for s in shifts2], axis=1)
    b1t = jnp.transpose(gp['b1'])                     # [in_feat, R]
    b2 = gp['b2']                                     # [R, out_feat]
    # constant 0/1 expansion / selection matrices -> rank contractions on the MXU
    e1 = jnp.kron(jnp.eye(in_feat, dtype=jnp.float32), jnp.ones((1, R), jnp.float32))
    s1m = jnp.kron(jnp.ones((in_feat, 1), jnp.float32), jnp.eye(R, dtype=jnp.float32))
    e2 = jnp.kron(jnp.eye(R, dtype=jnp.float32), jnp.ones((1, F2), jnp.float32))
    s2m = jnp.kron(jnp.ones((R, 1), jnp.float32), jnp.eye(F2, dtype=jnp.float32))
    slw = jnp.transpose(p['sl_W'][:, :, 0])           # [in_feat, out_feat]
    slb = jnp.transpose(p['sl_b'])                    # [1, out_feat]

    nt = _pick_tile(N, node_tile)
    gn = N // nt
    ntk = nt * min_nn
    kernel = functools.partial(_fused_layer_kernel, nt=nt, min_nn=min_nn,
                               out_feat=F2, n_pts=N)

    def wspec(a):
        return pl.BlockSpec(a.shape, lambda b, g: (0, 0))   # all weights are 2-D

    weights = [gp['W0'], gp['b0'], gp['Wl'], gp['bl'],
               w1t_big, b1t, e1, s1m, w2_big, b2, e2, s2m, slw, slb]

    out, stats = pl.pallas_call(
        kernel,
        out_shape=(jax.ShapeDtypeStruct((B, N, F2), jnp.float32),
                   jax.ShapeDtypeStruct((B, 2, F2), jnp.float32)),
        grid=(B, gn),
        in_specs=[pl.BlockSpec((1, ntk, Fin), lambda b, g: (b, g, 0)),
                  pl.BlockSpec((1, ntk, Fin), lambda b, g: (b, g, 0)),
                  pl.BlockSpec((1, N, Fin), lambda b, g: (b, 0, 0))]
                 + [wspec(a) for a in weights],
        out_specs=(pl.BlockSpec((1, N, F2), lambda b, g: (b, 0, 0)),
                   pl.BlockSpec((1, 2, F2), lambda b, g: (b, 0, 0))),
        scratch_shapes=[pltpu.VMEM((N, F2), jnp.float32)],
        compiler_params=pltpu.CompilerParams(
            dimension_semantics=("parallel", "arbitrary")),
    )(x_tilde1, x_tilde2, h, *weights)
    return out, stats


# ----------------------------------------------------------------------------
# Model glue (pure JAX: gathers, residuals, BN finishing from partial stats)
# ----------------------------------------------------------------------------

def _finish_bn(stats_sum, stats_sq, count):
    mean = stats_sum / count
    var = jnp.maximum(stats_sq / count - mean * mean, 0.0)
    scale = 1.0 / jnp.sqrt(var + _BN_EPS)
    shift = -mean * scale
    return scale, shift


def pre_mlp(points, pre_params):
    B, N, _ = points.shape
    h = points                                              # [B, N, C]
    for layer in pre_params:
        w = jnp.transpose(layer['W'][:, :, 0])              # [Cin, Cout]
        y2, stats = pointwise_conv_stats(h.reshape(B * N, -1), w)
        scale, shift = _finish_bn(jnp.sum(stats[:, 0, :], axis=0),
                                  jnp.sum(stats[:, 1, :], axis=0), float(B * N))
        h = bn_lrelu(y2.reshape(B, N, -1), scale, shift, 0.2)
    return h


def conv_layer_forward(h, D, p, cfg, last=False, node_tile=256):
    B, N, _ = h.shape
    min_nn = cfg['min_nn']

    if D is None:
        D = compute_graph(h)

    # TODO(synk): data-dependent top-k + gathers stay in plain JAX.
    _, top_idx = jax.lax.top_k(-D, min_nn + 1)               # [B, N, min_nn+1]
    idx2 = jnp.repeat(top_idx[:, :, 0], min_nn, axis=1)      # [B, N*min_nn]
    idx1 = top_idx[:, :, 1:].reshape(B, N * min_nn)
    x_tilde1 = jnp.take_along_axis(h, idx1[:, :, None], axis=1)   # [B, Nk, F]
    x_tilde2 = jnp.take_along_axis(h, idx2[:, :, None], axis=1)

    agg, stats = fused_conv_layer(h, x_tilde1, x_tilde2, p, cfg, node_tile)
    if last:
        return agg, D

    scale, shift = _finish_bn(jnp.sum(stats[:, 0, :], axis=0),
                              jnp.sum(stats[:, 1, :], axis=0), float(B * N))
    x = bn_lrelu(agg, scale, shift, 0.2)
    return x, D


def gpd_local_fe(points, params, config):
    h = pre_mlp(points, params['pre'])                       # [B, N, C_pre]

    x, D = h, None
    for lp in params['block1']:
        x, D = conv_layer_forward(x, D, lp, config['conv_layer'], last=False)
    h = x + h

    x, D = h, None
    for lp in params['block2']:
        x, D = conv_layer_forward(x, D, lp, config['conv_layer'], last=False)
    h = x + h

    x3, _ = conv_layer_forward(h, None, params['last'], config['lconv_layer'], last=True)
    return x3                                                # [B, N, out_feat]


# ----------------------------------------------------------------------------
# Deterministic parameter initialization (shapes follow the torch module)
# ----------------------------------------------------------------------------

def _nrm(key, shape, std):
    return std * jax.random.normal(key, shape, dtype=jnp.float32)


def init_conv_layer_params(key, cfg):
    fi, ff, fo, R = cfg['in_feat'], cfg['fnet_feat'], cfg['out_feat'], cfg['rank_theta']
    s1, s2 = cfg['stride_th1'], cfg['stride_th2']
    ks = jax.random.split(key, 5)
    return {
        'gconv': {
            'W0': _nrm(ks[0], (fi, ff), (2.0 / (fi + ff)) ** 0.5),
            'b0': jnp.zeros((1, ff), jnp.float32),
            'W1': _nrm(ks[1], (ff, s1 * R), 1.0 / ((ff ** 0.5) * (fi ** 0.5))),
            'b1': jnp.zeros((R, fi), jnp.float32),
            'W2': _nrm(ks[2], (ff, s2 * R), 1.0 / ((ff ** 0.5) * (fi ** 0.5))),
            'b2': jnp.zeros((R, fo), jnp.float32),
            'Wl': _nrm(ks[3], (ff, R), 1.0 / (R ** 0.5)),
            'bl': jnp.zeros((1, R), jnp.float32),
        },
        'sl_W': _nrm(ks[4], (fo, fi, 1), (2.0 / (fi + fo)) ** 0.5),
        'sl_b': jnp.zeros((fo, 1), jnp.float32),
    }


def init_params(key, config):
    pre_ch = config['pre_Nfeat']
    n_pre = len(pre_ch) - 1
    n_conv = config['conv_n_layers']
    keys = jax.random.split(key, n_pre + 2 * n_conv + 1)
    pre = []
    for i in range(n_pre):
        cin, cout = pre_ch[i], pre_ch[i + 1]
        pre.append({'W': _nrm(keys[i], (cout, cin, 1), (2.0 / (cin + cout)) ** 0.5)})
    block1 = [init_conv_layer_params(keys[n_pre + j], config['conv_layer'])
              for j in range(n_conv)]
    block2 = [init_conv_layer_params(keys[n_pre + n_conv + j], config['conv_layer'])
              for j in range(n_conv)]
    last = init_conv_layer_params(keys[n_pre + 2 * n_conv], config['lconv_layer'])
    return {'pre': pre, 'block1': block1, 'block2': block2, 'last': last}


# ----------------------------------------------------------------------------

if __name__ == "__main__":
    layer_cfg = dict(in_feat=16, fnet_feat=16, out_feat=16, rank_theta=8,
                     stride_th1=2, stride_th2=2, min_nn=8)
    config = {
        'pre_Nfeat': [3, 16],
        'conv_n_layers': 2,
        'conv_layer': layer_cfg,
        'lconv_layer': dict(layer_cfg),
    }
    # torch code requires in_feat == fnet_feat; strides must divide the feature dims.
    assert config['conv_layer']['in_feat'] == config['conv_layer']['fnet_feat']
    assert config['conv_layer']['in_feat'] % config['conv_layer']['stride_th1'] == 0
    assert config['conv_layer']['out_feat'] % config['conv_layer']['stride_th2'] == 0

    key = jax.random.PRNGKey(0)
    pkey, ikey = jax.random.split(key)
    params = init_params(pkey, config)

    B, N = 2, 16
    points = jax.random.normal(ikey, (B, N, config['pre_Nfeat'][0]), dtype=jnp.float32)

    fwd = jax.jit(lambda pts, prm: gpd_local_fe(pts, prm, config))
    out = fwd(points, params)
    out = jax.block_until_ready(out)
    assert out.shape == (B, N, config['lconv_layer']['out_feat'])
    assert bool(jnp.all(jnp.isfinite(out)))
    print("KERNEL_OK")
</pallas_src>

<mosaic_0001>
module attributes {stable_mosaic.version = 11 : i64} {
  func.func @_pconv_stats_kernel(%arg0: i32, %arg1: memref<32x3xf32, #tpu.memory_space<vmem>>, %arg2: memref<3x16xf32, #tpu.memory_space<vmem>>, %arg3: memref<32x16xf32, #tpu.memory_space<vmem>>, %arg4: memref<1x2x16xf32, #tpu.memory_space<vmem>>) attributes {dimension_semantics = [#tpu.dimension_semantics<parallel>], iteration_bounds = array<i64: 1>, scalar_prefetch = 0 : i64, scratch_operands = 0 : i64, tpu.core_type = #tpu.core_type<tc>, window_params = [{transform_indices = @transform_0, window_bounds = array<i64: 32, 3>}, {pipeline_mode = #tpu.pipeline_mode<synchronous>, transform_indices = @transform_1, window_bounds = array<i64: 3, 16>}, {transform_indices = @transform_2, window_bounds = array<i64: 32, 16>}, {transform_indices = @transform_3, window_bounds = array<i64: 1, 2, 16>}]} {
    %c0 = arith.constant 0 : index
    %c0_0 = arith.constant 0 : index
    %0 = vector.load %arg1[%c0, %c0_0] : memref<32x3xf32, #tpu.memory_space<vmem>>, vector<32x3xf32>
    %c0_1 = arith.constant 0 : index
    %c0_2 = arith.constant 0 : index
    %1 = vector.load %arg2[%c0_1, %c0_2] : memref<3x16xf32, #tpu.memory_space<vmem>>, vector<3x16xf32>
    %cst = arith.constant dense<0.000000e+00> : vector<32x16xf32>
    %2 = tpu.matmul %0, %1, %cst {dimension_numbers = #tpu.dot_dimension_numbers<[1], [0], [0], [1], [0, 0, 1, 1], [], []>} : vector<32x3xf32>, vector<3x16xf32>, vector<32x16xf32> -> vector<32x16xf32>
    %c0_3 = arith.constant 0 : index
    %c0_4 = arith.constant 0 : index
    %3 = vector.load %arg3[%c0_3, %c0_4] : memref<32x16xf32, #tpu.memory_space<vmem>>, vector<32x16xf32>
    tpu.vector_store %arg3[%c0_3, %c0_4], %2 {strides = array<i32>} : memref<32x16xf32, #tpu.memory_space<vmem>>, vector<32x16xf32>,
    %cst_5 = arith.constant dense<0.000000e+00> : vector<16xf32>
    %4 = vector.multi_reduction <add>, %2, %cst_5 [0] : vector<32x16xf32> to vector<16xf32>
    %5 = vector.shape_cast %4 : vector<16xf32> to vector<1x16xf32>
    %6 = arith.mulf %2, %2 : vector<32x16xf32>
    %cst_6 = arith.constant dense<0.000000e+00> : vector<16xf32>
    %7 = vector.multi_reduction <add>, %6, %cst_6 [0] : vector<32x16xf32> to vector<16xf32>
    %8 = vector.shape_cast %7 : vector<16xf32> to vector<1x16xf32>
    %9 = tpu.concatenate %5, %8 in 0 : vector<1x16xf32>, vector<1x16xf32> -> vector<2x16xf32>
    %c0_7 = arith.constant 0 : index
    %c0_8 = arith.constant 0 : index
    %c0_9 = arith.constant 0 : index
    %10 = vector.load %arg4[%c0_7, %c0_8, %c0_9] : memref<1x2x16xf32, #tpu.memory_space<vmem>>, vector<1x2x16xf32>
    %11 = vector.shape_cast %10 : vector<1x2x16xf32> to vector<2x16xf32>
    %12 = vector.shape_cast %9 : vector<2x16xf32> to vector<1x2x16xf32>
    tpu.vector_store %arg4[%c0_7, %c0_8, %c0_9], %12 {strides = array<i32>} : memref<1x2x16xf32, #tpu.memory_space<vmem>>, vector<1x2x16xf32>,
    return
  }
  func.func @transform_0(%arg0: i32) -> (i32, i32) {
    %c0_i32 = arith.constant 0 : i32
    %c0_i32_0 = arith.constant 0 : i32
    return %arg0, %c0_i32 : i32, i32
  }
  func.func @transform_1(%arg0: i32) -> (i32, i32) {
    %c0_i32 = arith.constant 0 : i32
    %c0_i32_0 = arith.constant 0 : i32
    %c0_i32_1 = arith.constant 0 : i32
    return %c0_i32, %c0_i32_0 : i32, i32
  }
  func.func @transform_2(%arg0: i32) -> (i32, i32) {
    %c0_i32 = arith.constant 0 : i32
    %c0_i32_0 = arith.constant 0 : i32
    return %arg0, %c0_i32 : i32, i32
  }
  func.func @transform_3(%arg0: i32) -> (i32, i32, i32) {
    %c0_i32 = arith.constant 0 : i32
    %c0_i32_0 = arith.constant 0 : i32
    %c0_i32_1 = arith.constant 0 : i32
    return %arg0, %c0_i32, %c0_i32_0 : i32, i32, i32
  }
}

module attributes {stable_mosaic.version = 11 : i64} {
  func.func @_affine_lrelu_kernel(%arg0: i32, %arg1: memref<4x128xf32, #tpu.memory_space<vmem>>, %arg2: memref<1x128xf32, #tpu.memory_space<vmem>>, %arg3: memref<1x128xf32, #tpu.memory_space<vmem>>, %arg4: memref<4x128xf32, #tpu.memory_space<vmem>>) attributes {dimension_semantics = [#tpu.dimension_semantics<parallel>], iteration_bounds = array<i64: 1>, scalar_prefetch = 0 : i64, scratch_operands = 0 : i64, tpu.core_type = #tpu.core_type<tc>, window_params = [{transform_indices = @transform_0, window_bounds = array<i64: 4, 128>}, {pipeline_mode = #tpu.pipeline_mode<synchronous>, transform_indices = @transform_1, window_bounds = array<i64: 1, 128>}, {pipeline_mode = #tpu.pipeline_mode<synchronous>, transform_indices = @transform_2, window_bounds = array<i64: 1, 128>}, {transform_indices = @transform_3, window_bounds = array<i64: 4, 128>}]} {
    %c0 = arith.constant 0 : index
    %c0_0 = arith.constant 0 : index
    %0 = vector.load %arg1[%c0, %c0_0] : memref<4x128xf32, #tpu.memory_space<vmem>>, vector<4x128xf32>
    %c0_1 = arith.constant 0 : index
    %c0_2 = arith.constant 0 : index
    %1 = vector.load %arg2[%c0_1, %c0_2] : memref<1x128xf32, #tpu.memory_space<vmem>>, vector<1x128xf32>
    %2 = vector.broadcast %1 : vector<1x128xf32> to vector<4x128xf32>
    %3 = arith.mulf %0, %2 : vector<4x128xf32>
    %c0_3 = arith.constant 0 : index
    %c0_4 = arith.constant 0 : index
    %4 = vector.load %arg3[%c0_3, %c0_4] : memref<1x128xf32, #tpu.memory_space<vmem>>, vector<1x128xf32>
    %5 = vector.broadcast %4 : vector<1x128xf32> to vector<4x128xf32>
    %6 = arith.addf %3, %5 : vector<4x128xf32>
    %cst = arith.constant 0.000000e+00 : f32
    %7 = vector.broadcast %cst : f32 to vector<4x128xf32>
    %8 = arith.cmpf oge, %6, %7 : vector<4x128xf32>
    %cst_5 = arith.constant 2.000000e-01 : f32
    %9 = vector.broadcast %cst_5 : f32 to vector<4x128xf32>
    %10 = arith.mulf %9, %6 : vector<4x128xf32>
    %11 = arith.select %8, %6, %10 : vector<4x128xi1>, vector<4x128xf32>
    %c0_6 = arith.constant 0 : index
    %c0_7 = arith.constant 0 : index
    %12 = vector.load %arg4[%c0_6, %c0_7] : memref<4x128xf32, #tpu.memory_space<vmem>>, vector<4x128xf32>
    tpu.vector_store %arg4[%c0_6, %c0_7], %11 {strides = array<i32>} : memref<4x128xf32, #tpu.memory_space<vmem>>, vector<4x128xf32>,
    return
  }
  func.func @transform_0(%arg0: i32) -> (i32, i32) {
    %c0_i32 = arith.constant 0 : i32
    %c0_i32_0 = arith.constant 0 : i32
    return %arg0, %c0_i32 : i32, i32
  }
  func.func @transform_1(%arg0: i32) -> (i32, i32) {
    %c0_i32 = arith.constant 0 : i32
    %c0_i32_0 = arith.constant 0 : i32
    %c0_i32_1 = arith.constant 0 : i32
    return %c0_i32, %c0_i32_0 : i32, i32
  }
  func.func @transform_2(%arg0: i32) -> (i32, i32) {
    %c0_i32 = arith.constant 0 : i32
    %c0_i32_0 = arith.constant 0 : i32
    %c0_i32_1 = arith.constant 0 : i32
    return %c0_i32, %c0_i32_0 : i32, i32
  }
  func.func @transform_3(%arg0: i32) -> (i32, i32) {
    %c0_i32 = arith.constant 0 : i32
    %c0_i32_0 = arith.constant 0 : i32
    return %arg0, %c0_i32 : i32, i32
  }
}

module attributes {stable_mosaic.version = 11 : i64} {
  func.func @_graph_kernel(%arg0: i32, %arg1: i32, %arg2: memref<1x16x16xf32, #tpu.memory_space<vmem>>, %arg3: memref<1x16x16xf32, #tpu.memory_space<vmem>>, %arg4: memref<1x16x16xf32, #tpu.memory_space<vmem>>) attributes {dimension_semantics = [#tpu.dimension_semantics<parallel>, #tpu.dimension_semantics<parallel>], iteration_bounds = array<i64: 2, 1>, scalar_prefetch = 0 : i64, scratch_operands = 0 : i64, tpu.core_type = #tpu.core_type<tc>, window_params = [{transform_indices = @transform_0, window_bounds = array<i64: 1, 16, 16>}, {transform_indices = @transform_1, window_bounds = array<i64: 1, 16, 16>}, {transform_indices = @transform_2, window_bounds = array<i64: 1, 16, 16>}]} {
    %c0 = arith.constant 0 : index
    %c0_0 = arith.constant 0 : index
    %c0_1 = arith.constant 0 : index
    %0 = vector.load %arg2[%c0, %c0_0, %c0_1] : memref<1x16x16xf32, #tpu.memory_space<vmem>>, vector<1x16x16xf32>
    %1 = vector.shape_cast %0 : vector<1x16x16xf32> to vector<16x16xf32>
    %c0_2 = arith.constant 0 : index
    %c0_3 = arith.constant 0 : index
    %c0_4 = arith.constant 0 : index
    %2 = vector.load %arg3[%c0_2, %c0_3, %c0_4] : memref<1x16x16xf32, #tpu.memory_space<vmem>>, vector<1x16x16xf32>
    %3 = vector.shape_cast %2 : vector<1x16x16xf32> to vector<16x16xf32>
    %4 = arith.mulf %1, %1 : vector<16x16xf32>
    %cst = arith.constant dense<0.000000e+00> : vector<16xf32>
    %5 = vector.multi_reduction <add>, %4, %cst [1] : vector<16x16xf32> to vector<16xf32>
    %6 = vector.shape_cast %5 : vector<16xf32> to vector<16x1xf32>
    %7 = arith.mulf %3, %3 : vector<16x16xf32>
    %cst_5 = arith.constant 1.000000e+00 : f32
    %8 = vector.broadcast %cst_5 : f32 to vector<1x16xf32>
    %cst_6 = arith.constant dense<0.000000e+00> : vector<1x16xf32>
    %9 = tpu.matmul %8, %7, %cst_6 {dimension_numbers = #tpu.dot_dimension_numbers<[1], [1], [0], [0], [0, 0, 1, 0], [], []>} : vector<1x16xf32>, vector<16x16xf32>, vector<1x16xf32> -> vector<1x16xf32>
    %cst_7 = arith.constant dense<0.000000e+00> : vector<16x16xf32>
    %10 = tpu.matmul %1, %3, %cst_7 {dimension_numbers = #tpu.dot_dimension_numbers<[1], [1], [0], [0], [0, 0, 1, 0], [], []>} : vector<16x16xf32>, vector<16x16xf32>, vector<16x16xf32> -> vector<16x16xf32>
    %11 = vector.broadcast %6 : vector<16x1xf32> to vector<16x16xf32>
    %12 = vector.broadcast %9 : vector<1x16xf32> to vector<16x16xf32>
    %13 = arith.addf %11, %12 : vector<16x16xf32>
    %cst_8 = arith.constant 2.000000e+00 : f32
    %14 = vector.broadcast %cst_8 : f32 to vector<16x16xf32>
    %15 = arith.mulf %14, %10 : vector<16x16xf32>
    %16 = arith.subf %13, %15 : vector<16x16xf32>
    %17 = math.absf %16 : vector<16x16xf32>
    %c0_9 = arith.constant 0 : index
    %c0_10 = arith.constant 0 : index
    %c0_11 = arith.constant 0 : index
    %18 = vector.load %arg4[%c0_9, %c0_10, %c0_11] : memref<1x16x16xf32, #tpu.memory_space<vmem>>, vector<1x16x16xf32>
    %19 = vector.shape_cast %18 : vector<1x16x16xf32> to vector<16x16xf32>
    %20 = vector.shape_cast %17 : vector<16x16xf32> to vector<1x16x16xf32>
    tpu.vector_store %arg4[%c0_9, %c0_10, %c0_11], %20 {strides = array<i32>} : memref<1x16x16xf32, #tpu.memory_space<vmem>>, vector<1x16x16xf32>,
    return
  }
  func.func @transform_0(%arg0: i32, %arg1: i32) -> (i32, i32, i32) {
    %c0_i32 = arith.constant 0 : i32
    %c0_i32_0 = arith.constant 0 : i32
    return %arg0, %arg1, %c0_i32 : i32, i32, i32
  }
  func.func @transform_1(%arg0: i32, %arg1: i32) -> (i32, i32, i32) {
    %c0_i32 = arith.constant 0 : i32
    %c0_i32_0 = arith.constant 0 : i32
    %c0_i32_1 = arith.constant 0 : i32
    return %arg0, %c0_i32, %c0_i32_0 : i32, i32, i32
  }
  func.func @transform_2(%arg0: i32, %arg1: i32) -> (i32, i32, i32) {
    %c0_i32 = arith.constant 0 : i32
    %c0_i32_0 = arith.constant 0 : i32
    return %arg0, %arg1, %c0_i32 : i32, i32, i32
  }
}

module attributes {stable_mosaic.version = 11 : i64} {
  func.func @_fused_layer_kernel(%arg0: i32, %arg1: i32, %arg2: memref<1x128x16xf32, #tpu.memory_space<vmem>>, %arg3: memref<1x128x16xf32, #tpu.memory_space<vmem>>, %arg4: memref<1x16x16xf32, #tpu.memory_space<vmem>>, %arg5: memref<16x16xf32, #tpu.memory_space<vmem>>, %arg6: memref<1x16xf32, #tpu.memory_space<vmem>>, %arg7: memref<16x8xf32, #tpu.memory_space<vmem>>, %arg8: memref<1x8xf32, #tpu.memory_space<vmem>>, %arg9: memref<16x128xf32, #tpu.memory_space<vmem>>, %arg10: memref<16x8xf32, #tpu.memory_space<vmem>>, %arg11: memref<16x128xf32, #tpu.memory_space<vmem>>, %arg12: memref<128x8xf32, #tpu.memory_space<vmem>>, %arg13: memref<16x128xf32, #tpu.memory_space<vmem>>, %arg14: memref<8x16xf32, #tpu.memory_space<vmem>>, %arg15: memref<8x128xf32, #tpu.memory_space<vmem>>, %arg16: memref<128x16xf32, #tpu.memory_space<vmem>>, %arg17: memref<16x16xf32, #tpu.memory_space<vmem>>, %arg18: memref<1x16xf32, #tpu.memory_space<vmem>>, %arg19: memref<1x16x16xf32, #tpu.memory_space<vmem>>, %arg20: memref<1x2x16xf32, #tpu.memory_space<vmem>>, %arg21: memref<16x16xf32, #tpu.memory_space<vmem>>) attributes {dimension_semantics = [#tpu.dimension_semantics<parallel>, #tpu.dimension_semantics<arbitrary>], iteration_bounds = array<i64: 2, 1>, scalar_prefetch = 0 : i64, scratch_operands = 1 : i64, tpu.core_type = #tpu.core_type<tc>, window_params = [{transform_indices = @transform_0, window_bounds = array<i64: 1, 128, 16>}, {transform_indices = @transform_1, window_bounds = array<i64: 1, 128, 16>}, {transform_indices = @transform_2, window_bounds = array<i64: 1, 16, 16>}, {pipeline_mode = #tpu.pipeline_mode<synchronous>, transform_indices = @transform_3, window_bounds = array<i64: 16, 16>}, {pipeline_mode = #tpu.pipeline_mode<synchronous>, transform_indices = @transform_4, window_bounds = array<i64: 1, 16>}, {pipeline_mode = #tpu.pipeline_mode<synchronous>, transform_indices = @transform_5, window_bounds = array<i64: 16, 8>}, {pipeline_mode = #tpu.pipeline_mode<synchronous>, transform_indices = @transform_6, window_bounds = array<i64: 1, 8>}, {pipeline_mode = #tpu.pipeline_mode<synchronous>, transform_indices = @transform_7, window_bounds = array<i64: 16, 128>}, {pipeline_mode = #tpu.pipeline_mode<synchronous>, transform_indices = @transform_8, window_bounds = array<i64: 16, 8>}, {pipeline_mode = #tpu.pipeline_mode<synchronous>, transform_indices = @transform_9, window_bounds = array<i64: 16, 128>}, {pipeline_mode = #tpu.pipeline_mode<synchronous>, transform_indices = @transform_10, window_bounds = array<i64: 128, 8>}, {pipeline_mode = #tpu.pipeline_mode<synchronous>, transform_indices = @transform_11, window_bounds = array<i64: 16, 128>}, {pipeline_mode = #tpu.pipeline_mode<synchronous>, transform_indices = @transform_12, window_bounds = array<i64: 8, 16>}, {pipeline_mode = #tpu.pipeline_mode<synchronous>, transform_indices = @transform_13, window_bounds = array<i64: 8, 128>}, {pipeline_mode = #tpu.pipeline_mode<synchronous>, transform_indices = @transform_14, window_bounds = array<i64: 128, 16>}, {pipeline_mode = #tpu.pipeline_mode<synchronous>, transform_indices = @transform_15, window_bounds = array<i64: 16, 16>}, {pipeline_mode = #tpu.pipeline_mode<synchronous>, transform_indices = @transform_16, window_bounds = array<i64: 1, 16>}, {transform_indices = @transform_17, window_bounds = array<i64: 1, 16, 16>}, {transform_indices = @transform_18, window_bounds = array<i64: 1, 2, 16>}]} {
    %c0 = arith.constant 0 : index
    %c0_0 = arith.constant 0 : index
    %c0_1 = arith.constant 0 : index
    %0 = vector.load %arg2[%c0, %c0_0, %c0_1] : memref<1x128x16xf32, #tpu.memory_space<vmem>>, vector<1x128x16xf32>
    %1 = vector.shape_cast %0 : vector<1x128x16xf32> to vector<128x16xf32>
    %c0_2 = arith.constant 0 : index
    %c0_3 = arith.constant 0 : index
    %c0_4 = arith.constant 0 : index
    %2 = vector.load %arg3[%c0_2, %c0_3, %c0_4] : memref<1x128x16xf32, #tpu.memory_space<vmem>>, vector<1x128x16xf32>
    %3 = vector.shape_cast %2 : vector<1x128x16xf32> to vector<128x16xf32>
    %4 = arith.subf %1, %3 : vector<128x16xf32>
    %5 = arith.mulf %4, %4 : vector<128x16xf32>
    %cst = arith.constant dense<0.000000e+00> : vector<128xf32>
    %6 = vector.multi_reduction <add>, %5, %cst [1] : vector<128x16xf32> to vector<128xf32>
    %7 = vector.shape_cast %6 : vector<128xf32> to vector<128x1xf32>
    %c0_5 = arith.constant 0 : index
    %c0_6 = arith.constant 0 : index
    %8 = vector.load %arg5[%c0_5, %c0_6] : memref<16x16xf32, #tpu.memory_space<vmem>>, vector<16x16xf32>
    %cst_7 = arith.constant dense<0.000000e+00> : vector<128x16xf32>
    %9 = tpu.matmul %4, %8, %cst_7 {dimension_numbers = #tpu.dot_dimension_numbers<[1], [0], [0], [1], [0, 0, 1, 1], [], []>} : vector<128x16xf32>, vector<16x16xf32>, vector<128x16xf32> -> vector<128x16xf32>
    %c0_8 = arith.constant 0 : index
    %c0_9 = arith.constant 0 : index
    %10 = vector.load %arg6[%c0_8, %c0_9] : memref<1x16xf32, #tpu.memory_space<vmem>>, vector<1x16xf32>
    %11 = vector.broadcast %10 : vector<1x16xf32> to vector<128x16xf32>
    %12 = arith.addf %9, %11 : vector<128x16xf32>
    %cst_10 = arith.constant 0.000000e+00 : f32
    %13 = vector.broadcast %cst_10 : f32 to vector<128x16xf32>
    %14 = arith.cmpf oge, %12, %13 : vector<128x16xf32>
    %cst_11 = arith.constant 2.000000e-02 : f32
    %15 = vector.broadcast %cst_11 : f32 to vector<128x16xf32>
    %16 = arith.mulf %15, %12 : vector<128x16xf32>
    %17 = arith.select %14, %12, %16 : vector<128x16xi1>, vector<128x16xf32>
    %c0_12 = arith.constant 0 : index
    %c0_13 = arith.constant 0 : index
    %18 = vector.load %arg7[%c0_12, %c0_13] : memref<16x8xf32, #tpu.memory_space<vmem>>, vector<16x8xf32>
    %cst_14 = arith.constant dense<0.000000e+00> : vector<128x8xf32>
    %19 = tpu.matmul %17, %18, %cst_14 {dimension_numbers = #tpu.dot_dimension_numbers<[1], [0], [0], [1], [0, 0, 1, 1], [], []>} : vector<128x16xf32>, vector<16x8xf32>, vector<128x8xf32> -> vector<128x8xf32>
    %c0_15 = arith.constant 0 : index
    %c0_16 = arith.constant 0 : index
    %20 = vector.load %arg8[%c0_15, %c0_16] : memref<1x8xf32, #tpu.memory_space<vmem>>, vector<1x8xf32>
    %21 = vector.broadcast %20 : vector<1x8xf32> to vector<128x8xf32>
    %22 = arith.addf %19, %21 : vector<128x8xf32>
    %c0_17 = arith.constant 0 : index
    %c0_18 = arith.constant 0 : index
    %23 = vector.load %arg9[%c0_17, %c0_18] : memref<16x128xf32, #tpu.memory_space<vmem>>, vector<16x128xf32>
    %cst_19 = arith.constant dense<0.000000e+00> : vector<128x128xf32>
    %24 = tpu.matmul %17, %23, %cst_19 {dimension_numbers = #tpu.dot_dimension_numbers<[1], [0], [0], [1], [0, 0, 1, 1], [], []>} : vector<128x16xf32>, vector<16x128xf32>, vector<128x128xf32> -> vector<128x128xf32>
    %c0_20 = arith.constant 0 : index
    %c0_21 = arith.constant 0 : index
    %25 = vector.load %arg11[%c0_20, %c0_21] : memref<16x128xf32, #tpu.memory_space<vmem>>, vector<16x128xf32>
    %cst_22 = arith.constant dense<0.000000e+00> : vector<128x128xf32>
    %26 = tpu.matmul %1, %25, %cst_22 {dimension_numbers = #tpu.dot_dimension_numbers<[1], [0], [0], [1], [0, 0, 1, 1], [], []>} : vector<128x16xf32>, vector<16x128xf32>, vector<128x128xf32> -> vector<128x128xf32>
    %27 = arith.mulf %24, %26 : vector<128x128xf32>
    %c0_23 = arith.constant 0 : index
    %c0_24 = arith.constant 0 : index
    %28 = vector.load %arg12[%c0_23, %c0_24] : memref<128x8xf32, #tpu.memory_space<vmem>>, vector<128x8xf32>
    %cst_25 = arith.constant dense<0.000000e+00> : vector<128x8xf32>
    %29 = tpu.matmul %27, %28, %cst_25 {dimension_numbers = #tpu.dot_dimension_numbers<[1], [0], [0], [1], [0, 0, 1, 1], [], []>} : vector<128x128xf32>, vector<128x8xf32>, vector<128x8xf32> -> vector<128x8xf32>
    %c0_26 = arith.constant 0 : index
    %c0_27 = arith.constant 0 : index
    %30 = vector.load %arg10[%c0_26, %c0_27] : memref<16x8xf32, #tpu.memory_space<vmem>>, vector<16x8xf32>
    %cst_28 = arith.constant dense<0.000000e+00> : vector<128x8xf32>
    %31 = tpu.matmul %1, %30, %cst_28 {dimension_numbers = #tpu.dot_dimension_numbers<[1], [0], [0], [1], [0, 0, 1, 1], [], []>} : vector<128x16xf32>, vector<16x8xf32>, vector<128x8xf32> -> vector<128x8xf32>
    %32 = arith.addf %29, %31 : vector<128x8xf32>
    %33 = arith.mulf %32, %22 : vector<128x8xf32>
    %c0_29 = arith.constant 0 : index
    %c0_30 = arith.constant 0 : index
    %34 = vector.load %arg13[%c0_29, %c0_30] : memref<16x128xf32, #tpu.memory_space<vmem>>, vector<16x128xf32>
    %cst_31 = arith.constant dense<0.000000e+00> : vector<128x128xf32>
    %35 = tpu.matmul %17, %34, %cst_31 {dimension_numbers = #tpu.dot_dimension_numbers<[1], [0], [0], [1], [0, 0, 1, 1], [], []>} : vector<128x16xf32>, vector<16x128xf32>, vector<128x128xf32> -> vector<128x128xf32>
    %c0_32 = arith.constant 0 : index
    %c0_33 = arith.constant 0 : index
    %36 = vector.load %arg15[%c0_32, %c0_33] : memref<8x128xf32, #tpu.memory_space<vmem>>, vector<8x128xf32>
    %cst_34 = arith.constant dense<0.000000e+00> : vector<128x128xf32>
    %37 = tpu.matmul %33, %36, %cst_34 {dimension_numbers = #tpu.dot_dimension_numbers<[1], [0], [0], [1], [0, 0, 1, 1], [], []>} : vector<128x8xf32>, vector<8x128xf32>, vector<128x128xf32> -> vector<128x128xf32>
    %38 = arith.mulf %35, %37 : vector<128x128xf32>
    %c0_35 = arith.constant 0 : index
    %c0_36 = arith.constant 0 : index
    %39 = vector.load %arg16[%c0_35, %c0_36] : memref<128x16xf32, #tpu.memory_space<vmem>>, vector<128x16xf32>
    %cst_37 = arith.constant dense<0.000000e+00> : vector<128x16xf32>
    %40 = tpu.matmul %38, %39, %cst_37 {dimension_numbers = #tpu.dot_dimension_numbers<[1], [0], [0], [1], [0, 0, 1, 1], [], []>} : vector<128x128xf32>, vector<128x16xf32>, vector<128x16xf32> -> vector<128x16xf32>
    %c0_38 = arith.constant 0 : index
    %c0_39 = arith.constant 0 : index
    %41 = vector.load %arg14[%c0_38, %c0_39] : memref<8x16xf32, #tpu.memory_space<vmem>>, vector<8x16xf32>
    %cst_40 = arith.constant dense<0.000000e+00> : vector<128x16xf32>
    %42 = tpu.matmul %33, %41, %cst_40 {dimension_numbers = #tpu.dot_dimension_numbers<[1], [0], [0], [1], [0, 0, 1, 1], [], []>} : vector<128x8xf32>, vector<8x16xf32>, vector<128x16xf32> -> vector<128x16xf32>
    %43 = arith.addf %40, %42 : vector<128x16xf32>
    %cst_41 = arith.constant 0.000000e+00 : f32
    %44 = vector.broadcast %cst_41 : f32 to vector<128x1xf32>
    %45 = arith.subf %44, %7 : vector<128x1xf32>
    %cst_42 = arith.constant 1.000000e+01 : f32
    %46 = vector.broadcast %cst_42 : f32 to vector<128x1xf32>
    %47 = arith.divf %45, %46 : vector<128x1xf32>
    %48 = math.exp %47 : vector<128x1xf32>
    %49 = vector.broadcast %48 : vector<128x1xf32> to vector<128x16xf32>
    %50 = arith.mulf %43, %49 : vector<128x16xf32>
    %51 = vector.shape_cast %50 : vector<128x16xf32> to vector<16x8x16xf32>
    %cst_43 = arith.constant dense<0.000000e+00> : vector<16x16xf32>
    %52 = vector.multi_reduction <add>, %51, %cst_43 [1] : vector<16x8x16xf32> to vector<16x16xf32>
    %c16_i32 = arith.constant 16 : i32
    %53 = arith.muli %arg1, %c16_i32 : i32
    %54 = arith.index_cast %53 : i32 to index
    %c0_44 = arith.constant 0 : index
    %55 = vector.load %arg21[%54, %c0_44] : memref<16x16xf32, #tpu.memory_space<vmem>>, vector<16x16xf32>
    tpu.vector_store %arg21[%54, %c0_44], %52 {strides = array<i32>} : memref<16x16xf32, #tpu.memory_space<vmem>>, vector<16x16xf32>,
    %c0_i32 = arith.constant 0 : i32
    %56 = arith.cmpi eq, %arg1, %c0_i32 : i32
    %57 = arith.extui %56 : i1 to i32
    %c0_i32_45 = arith.constant 0 : i32
    %58 = arith.cmpi ne, %57, %c0_i32_45 : i32
    scf.if %58 {
      %c0_46 = arith.constant 0 : index
      %c0_47 = arith.constant 0 : index
      %59 = vector.load %arg21[%c0_46, %c0_47] : memref<16x16xf32, #tpu.memory_space<vmem>>, vector<16x16xf32>
      %60 = tpu.transpose %59, [1, 0] : vector<16x16xf32> -> vector<16x16xf32>
      %c0_48 = arith.constant 0 : index
      %c0_49 = arith.constant 0 : index
      %c0_50 = arith.constant 0 : index
      %61 = vector.load %arg4[%c0_48, %c0_49, %c0_50] : memref<1x16x16xf32, #tpu.memory_space<vmem>>, vector<1x16x16xf32>
      %62 = vector.shape_cast %61 : vector<1x16x16xf32> to vector<16x16xf32>
      %c0_51 = arith.constant 0 : index
      %c0_52 = arith.constant 0 : index
      %63 = vector.load %arg17[%c0_51, %c0_52] : memref<16x16xf32, #tpu.memory_space<vmem>>, vector<16x16xf32>
      %cst_53 = arith.constant dense<0.000000e+00> : vector<16x16xf32>
      %64 = tpu.matmul %62, %63, %cst_53 {dimension_numbers = #tpu.dot_dimension_numbers<[1], [0], [0], [1], [0, 0, 1, 1], [], []>} : vector<16x16xf32>, vector<16x16xf32>, vector<16x16xf32> -> vector<16x16xf32>
      %65 = arith.addf %64, %60 : vector<16x16xf32>
      %cst_54 = arith.constant 9.000000e+00 : f32
      %66 = vector.broadcast %cst_54 : f32 to vector<16x16xf32>
      %67 = arith.divf %65, %66 : vector<16x16xf32>
      %c0_55 = arith.constant 0 : index
      %c0_56 = arith.constant 0 : index
      %68 = vector.load %arg18[%c0_55, %c0_56] : memref<1x16xf32, #tpu.memory_space<vmem>>, vector<1x16xf32>
      %69 = vector.broadcast %68 : vector<1x16xf32> to vector<16x16xf32>
      %70 = arith.addf %67, %69 : vector<16x16xf32>
      %c0_57 = arith.constant 0 : index
      %c0_58 = arith.constant 0 : index
      %c0_59 = arith.constant 0 : index
      %71 = vector.load %arg19[%c0_57, %c0_58, %c0_59] : memref<1x16x16xf32, #tpu.memory_space<vmem>>, vector<1x16x16xf32>
      %72 = vector.shape_cast %71 : vector<1x16x16xf32> to vector<16x16xf32>
      %73 = vector.shape_cast %70 : vector<16x16xf32> to vector<1x16x16xf32>
      tpu.vector_store %arg19[%c0_57, %c0_58, %c0_59], %73 {strides = array<i32>} : memref<1x16x16xf32, #tpu.memory_space<vmem>>, vector<1x16x16xf32>,
      %cst_60 = arith.constant dense<0.000000e+00> : vector<16xf32>
      %74 = vector.multi_reduction <add>, %70, %cst_60 [0] : vector<16x16xf32> to vector<16xf32>
      %75 = vector.shape_cast %74 : vector<16xf32> to vector<1x16xf32>
      %76 = arith.mulf %70, %70 : vector<16x16xf32>
      %cst_61 = arith.constant dense<0.000000e+00> : vector<16xf32>
      %77 = vector.multi_reduction <add>, %76, %cst_61 [0] : vector<16x16xf32> to vector<16xf32>
      %78 = vector.shape_cast %77 : vector<16xf32> to vector<1x16xf32>
      %79 = tpu.concatenate %75, %78 in 0 : vector<1x16xf32>, vector<1x16xf32> -> vector<2x16xf32>
      %c0_62 = arith.constant 0 : index
      %c0_63 = arith.constant 0 : index
      %c0_64 = arith.constant 0 : index
      %80 = vector.load %arg20[%c0_62, %c0_63, %c0_64] : memref<1x2x16xf32, #tpu.memory_space<vmem>>, vector<1x2x16xf32>
      %81 = vector.shape_cast %80 : vector<1x2x16xf32> to vector<2x16xf32>
      %82 = vector.shape_cast %79 : vector<2x16xf32> to vector<1x2x16xf32>
      tpu.vector_store %arg20[%c0_62, %c0_63, %c0_64], %82 {strides = array<i32>} : memref<1x2x16xf32, #tpu.memory_space<vmem>>, vector<1x2x16xf32>,
    } else {
    }
    return
  }
  func.func @transform_0(%arg0: i32, %arg1: i32) -> (i32, i32, i32) {
    %c0_i32 = arith.constant 0 : i32
    %c0_i32_0 = arith.constant 0 : i32
    return %arg0, %arg1, %c0_i32 : i32, i32, i32
  }
  func.func @transform_1(%arg0: i32, %arg1: i32) -> (i32, i32, i32) {
    %c0_i32 = arith.constant 0 : i32
    %c0_i32_0 = arith.constant 0 : i32
    return %arg0, %arg1, %c0_i32 : i32, i32, i32
  }
  func.func @transform_2(%arg0: i32, %arg1: i32) -> (i32, i32, i32) {
    %c0_i32 = arith.constant 0 : i32
    %c0_i32_0 = arith.constant 0 : i32
    %c0_i32_1 = arith.constant 0 : i32
    return %arg0, %c0_i32, %c0_i32_0 : i32, i32, i32
  }
  func.func @transform_3(%arg0: i32, %arg1: i32) -> (i32, i32) {
    %c0_i32 = arith.constant 0 : i32
    %c0_i32_0 = arith.constant 0 : i32
    %c0_i32_1 = arith.constant 0 : i32
    return %c0_i32, %c0_i32_0 : i32, i32
  }
  func.func @transform_4(%arg0: i32, %arg1: i32) -> (i32, i32) {
    %c0_i32 = arith.constant 0 : i32
    %c0_i32_0 = arith.constant 0 : i32
    %c0_i32_1 = arith.constant 0 : i32
    return %c0_i32, %c0_i32_0 : i32, i32
  }
  func.func @transform_5(%arg0: i32, %arg1: i32) -> (i32, i32) {
    %c0_i32 = arith.constant 0 : i32
    %c0_i32_0 = arith.constant 0 : i32
    %c0_i32_1 = arith.constant 0 : i32
    return %c0_i32, %c0_i32_0 : i32, i32
  }
  func.func @transform_6(%arg0: i32, %arg1: i32) -> (i32, i32) {
    %c0_i32 = arith.constant 0 : i32
    %c0_i32_0 = arith.constant 0 : i32
    %c0_i32_1 = arith.constant 0 : i32
    return %c0_i32, %c0_i32_0 : i32, i32
  }
  func.func @transform_7(%arg0: i32, %arg1: i32) -> (i32, i32) {
    %c0_i32 = arith.constant 0 : i32
    %c0_i32_0 = arith.constant 0 : i32
    %c0_i32_1 = arith.constant 0 : i32
    return %c0_i32, %c0_i32_0 : i32, i32
  }
  func.func @transform_8(%arg0: i32, %arg1: i32) -> (i32, i32) {
    %c0_i32 = arith.constant 0 : i32
    %c0_i32_0 = arith.constant 0 : i32
    %c0_i32_1 = arith.constant 0 : i32
    return %c0_i32, %c0_i32_0 : i32, i32
  }
  func.func @transform_9(%arg0: i32, %arg1: i32) -> (i32, i32) {
    %c0_i32 = arith.constant 0 : i32
    %c0_i32_0 = arith.constant 0 : i32
    %c0_i32_1 = arith.constant 0 : i32
    return %c0_i32, %c0_i32_0 : i32, i32
  }
  func.func @transform_10(%arg0: i32, %arg1: i32) -> (i32, i32) {
    %c0_i32 = arith.constant 0 : i32
    %c0_i32_0 = arith.constant 0 : i32
    %c0_i32_1 = arith.constant 0 : i32
    return %c0_i32, %c0_i32_0 : i32, i32
  }
  func.func @transform_11(%arg0: i32, %arg1: i32) -> (i32, i32) {
    %c0_i32 = arith.constant 0 : i32
    %c0_i32_0 = arith.constant 0 : i32
    %c0_i32_1 = arith.constant 0 : i32
    return %c0_i32, %c0_i32_0 : i32, i32
  }
  func.func @transform_12(%arg0: i32, %arg1: i32) -> (i32, i32) {
    %c0_i32 = arith.constant 0 : i32
    %c0_i32_0 = arith.constant 0 : i32
    %c0_i32_1 = arith.constant 0 : i32
    return %c0_i32, %c0_i32_0 : i32, i32
  }
  func.func @transform_13(%arg0: i32, %arg1: i32) -> (i32, i32) {
    %c0_i32 = arith.constant 0 : i32
    %c0_i32_0 = arith.constant 0 : i32
    %c0_i32_1 = arith.constant 0 : i32
    return %c0_i32, %c0_i32_0 : i32, i32
  }
  func.func @transform_14(%arg0: i32, %arg1: i32) -> (i32, i32) {
    %c0_i32 = arith.constant 0 : i32
    %c0_i32_0 = arith.constant 0 : i32
    %c0_i32_1 = arith.constant 0 : i32
    return %c0_i32, %c0_i32_0 : i32, i32
  }
  func.func @transform_15(%arg0: i32, %arg1: i32) -> (i32, i32) {
    %c0_i32 = arith.constant 0 : i32
    %c0_i32_0 = arith.constant 0 : i32
    %c0_i32_1 = arith.constant 0 : i32
    return %c0_i32, %c0_i32_0 : i32, i32
  }
  func.func @transform_16(%arg0: i32, %arg1: i32) -> (i32, i32) {
    %c0_i32 = arith.constant 0 : i32
    %c0_i32_0 = arith.constant 0 : i32
    %c0_i32_1 = arith.constant 0 : i32
    return %c0_i32, %c0_i32_0 : i32, i32
  }
  func.func @transform_17(%arg0: i32, %arg1: i32) -> (i32, i32, i32) {
    %c0_i32 = arith.constant 0 : i32
    %c0_i32_0 = arith.constant 0 : i32
    %c0_i32_1 = arith.constant 0 : i32
    return %arg0, %c0_i32, %c0_i32_0 : i32, i32, i32
  }
  func.func @transform_18(%arg0: i32, %arg1: i32) -> (i32, i32, i32) {
    %c0_i32 = arith.constant 0 : i32
    %c0_i32_0 = arith.constant 0 : i32
    %c0_i32_1 = arith.constant 0 : i32
    return %arg0, %c0_i32, %c0_i32_0 : i32, i32, i32
  }
}

module attributes {stable_mosaic.version = 11 : i64} {
  func.func @_fused_layer_kernel(%arg0: i32, %arg1: i32, %arg2: memref<1x128x16xf32, #tpu.memory_space<vmem>>, %arg3: memref<1x128x16xf32, #tpu.memory_space<vmem>>, %arg4: memref<1x16x16xf32, #tpu.memory_space<vmem>>, %arg5: memref<16x16xf32, #tpu.memory_space<vmem>>, %arg6: memref<1x16xf32, #tpu.memory_space<vmem>>, %arg7: memref<16x8xf32, #tpu.memory_space<vmem>>, %arg8: memref<1x8xf32, #tpu.memory_space<vmem>>, %arg9: memref<16x128xf32, #tpu.memory_space<vmem>>, %arg10: memref<16x8xf32, #tpu.memory_space<vmem>>, %arg11: memref<16x128xf32, #tpu.memory_space<vmem>>, %arg12: memref<128x8xf32, #tpu.memory_space<vmem>>, %arg13: memref<16x128xf32, #tpu.memory_space<vmem>>, %arg14: memref<8x16xf32, #tpu.memory_space<vmem>>, %arg15: memref<8x128xf32, #tpu.memory_space<vmem>>, %arg16: memref<128x16xf32, #tpu.memory_space<vmem>>, %arg17: memref<16x16xf32, #tpu.memory_space<vmem>>, %arg18: memref<1x16xf32, #tpu.memory_space<vmem>>, %arg19: memref<1x16x16xf32, #tpu.memory_space<vmem>>, %arg20: memref<1x2x16xf32, #tpu.memory_space<vmem>>, %arg21: memref<16x16xf32, #tpu.memory_space<vmem>>) attributes {dimension_semantics = [#tpu.dimension_semantics<parallel>, #tpu.dimension_semantics<arbitrary>], iteration_bounds = array<i64: 2, 1>, scalar_prefetch = 0 : i64, scratch_operands = 1 : i64, tpu.core_type = #tpu.core_type<tc>, window_params = [{transform_indices = @transform_0, window_bounds = array<i64: 1, 128, 16>}, {transform_indices = @transform_1, window_bounds = array<i64: 1, 128, 16>}, {transform_indices = @transform_2, window_bounds = array<i64: 1, 16, 16>}, {pipeline_mode = #tpu.pipeline_mode<synchronous>, transform_indices = @transform_3, window_bounds = array<i64: 16, 16>}, {pipeline_mode = #tpu.pipeline_mode<synchronous>, transform_indices = @transform_4, window_bounds = array<i64: 1, 16>}, {pipeline_mode = #tpu.pipeline_mode<synchronous>, transform_indices = @transform_5, window_bounds = array<i64: 16, 8>}, {pipeline_mode = #tpu.pipeline_mode<synchronous>, transform_indices = @transform_6, window_bounds = array<i64: 1, 8>}, {pipeline_mode = #tpu.pipeline_mode<synchronous>, transform_indices = @transform_7, window_bounds = array<i64: 16, 128>}, {pipeline_mode = #tpu.pipeline_mode<synchronous>, transform_indices = @transform_8, window_bounds = array<i64: 16, 8>}, {pipeline_mode = #tpu.pipeline_mode<synchronous>, transform_indices = @transform_9, window_bounds = array<i64: 16, 128>}, {pipeline_mode = #tpu.pipeline_mode<synchronous>, transform_indices = @transform_10, window_bounds = array<i64: 128, 8>}, {pipeline_mode = #tpu.pipeline_mode<synchronous>, transform_indices = @transform_11, window_bounds = array<i64: 16, 128>}, {pipeline_mode = #tpu.pipeline_mode<synchronous>, transform_indices = @transform_12, window_bounds = array<i64: 8, 16>}, {pipeline_mode = #tpu.pipeline_mode<synchronous>, transform_indices = @transform_13, window_bounds = array<i64: 8, 128>}, {pipeline_mode = #tpu.pipeline_mode<synchronous>, transform_indices = @transform_14, window_bounds = array<i64: 128, 16>}, {pipeline_mode = #tpu.pipeline_mode<synchronous>, transform_indices = @transform_15, window_bounds = array<i64: 16, 16>}, {pipeline_mode = #tpu.pipeline_mode<synchronous>, transform_indices = @transform_16, window_bounds = array<i64: 1, 16>}, {transform_indices = @transform_17, window_bounds = array<i64: 1, 16, 16>}, {transform_indices = @transform_18, window_bounds = array<i64: 1, 2, 16>}]} {
    %c0 = arith.constant 0 : index
    %c0_0 = arith.constant 0 : index
    %c0_1 = arith.constant 0 : index
    %0 = vector.load %arg2[%c0, %c0_0, %c0_1] : memref<1x128x16xf32, #tpu.memory_space<vmem>>, vector<1x128x16xf32>
    %1 = vector.shape_cast %0 : vector<1x128x16xf32> to vector<128x16xf32>
    %c0_2 = arith.constant 0 : index
    %c0_3 = arith.constant 0 : index
    %c0_4 = arith.constant 0 : index
    %2 = vector.load %arg3[%c0_2, %c0_3, %c0_4] : memref<1x128x16xf32, #tpu.memory_space<vmem>>, vector<1x128x16xf32>
    %3 = vector.shape_cast %2 : vector<1x128x16xf32> to vector<128x16xf32>
    %4 = arith.subf %1, %3 : vector<128x16xf32>
    %5 = arith.mulf %4, %4 : vector<128x16xf32>
    %cst = arith.constant dense<0.000000e+00> : vector<128xf32>
    %6 = vector.multi_reduction <add>, %5, %cst [1] : vector<128x16xf32> to vector<128xf32>
    %7 = vector.shape_cast %6 : vector<128xf32> to vector<128x1xf32>
    %c0_5 = arith.constant 0 : index
    %c0_6 = arith.constant 0 : index
    %8 = vector.load %arg5[%c0_5, %c0_6] : memref<16x16xf32, #tpu.memory_space<vmem>>, vector<16x16xf32>
    %cst_7 = arith.constant dense<0.000000e+00> : vector<128x16xf32>
    %9 = tpu.matmul %4, %8, %cst_7 {dimension_numbers = #tpu.dot_dimension_numbers<[1], [0], [0], [1], [0, 0, 1, 1], [], []>} : vector<128x16xf32>, vector<16x16xf32>, vector<128x16xf32> -> vector<128x16xf32>
    %c0_8 = arith.constant 0 : index
    %c0_9 = arith.constant 0 : index
    %10 = vector.load %arg6[%c0_8, %c0_9] : memref<1x16xf32, #tpu.memory_space<vmem>>, vector<1x16xf32>
    %11 = vector.broadcast %10 : vector<1x16xf32> to vector<128x16xf32>
    %12 = arith.addf %9, %11 : vector<128x16xf32>
    %cst_10 = arith.constant 0.000000e+00 : f32
    %13 = vector.broadcast %cst_10 : f32 to vector<128x16xf32>
    %14 = arith.cmpf oge, %12, %13 : vector<128x16xf32>
    %cst_11 = arith.constant 2.000000e-02 : f32
    %15 = vector.broadcast %cst_11 : f32 to vector<128x16xf32>
    %16 = arith.mulf %15, %12 : vector<128x16xf32>
    %17 = arith.select %14, %12, %16 : vector<128x16xi1>, vector<128x16xf32>
    %c0_12 = arith.constant 0 : index
    %c0_13 = arith.constant 0 : index
    %18 = vector.load %arg7[%c0_12, %c0_13] : memref<16x8xf32, #tpu.memory_space<vmem>>, vector<16x8xf32>
    %cst_14 = arith.constant dense<0.000000e+00> : vector<128x8xf32>
    %19 = tpu.matmul %17, %18, %cst_14 {dimension_numbers = #tpu.dot_dimension_numbers<[1], [0], [0], [1], [0, 0, 1, 1], [], []>} : vector<128x16xf32>, vector<16x8xf32>, vector<128x8xf32> -> vector<128x8xf32>
    %c0_15 = arith.constant 0 : index
    %c0_16 = arith.constant 0 : index
    %20 = vector.load %arg8[%c0_15, %c0_16] : memref<1x8xf32, #tpu.memory_space<vmem>>, vector<1x8xf32>
    %21 = vector.broadcast %20 : vector<1x8xf32> to vector<128x8xf32>
    %22 = arith.addf %19, %21 : vector<128x8xf32>
    %c0_17 = arith.constant 0 : index
    %c0_18 = arith.constant 0 : index
    %23 = vector.load %arg9[%c0_17, %c0_18] : memref<16x128xf32, #tpu.memory_space<vmem>>, vector<16x128xf32>
    %cst_19 = arith.constant dense<0.000000e+00> : vector<128x128xf32>
    %24 = tpu.matmul %17, %23, %cst_19 {dimension_numbers = #tpu.dot_dimension_numbers<[1], [0], [0], [1], [0, 0, 1, 1], [], []>} : vector<128x16xf32>, vector<16x128xf32>, vector<128x128xf32> -> vector<128x128xf32>
    %c0_20 = arith.constant 0 : index
    %c0_21 = arith.constant 0 : index
    %25 = vector.load %arg11[%c0_20, %c0_21] : memref<16x128xf32, #tpu.memory_space<vmem>>, vector<16x128xf32>
    %cst_22 = arith.constant dense<0.000000e+00> : vector<128x128xf32>
    %26 = tpu.matmul %1, %25, %cst_22 {dimension_numbers = #tpu.dot_dimension_numbers<[1], [0], [0], [1], [0, 0, 1, 1], [], []>} : vector<128x16xf32>, vector<16x128xf32>, vector<128x128xf32> -> vector<128x128xf32>
    %27 = arith.mulf %24, %26 : vector<128x128xf32>
    %c0_23 = arith.constant 0 : index
    %c0_24 = arith.constant 0 : index
    %28 = vector.load %arg12[%c0_23, %c0_24] : memref<128x8xf32, #tpu.memory_space<vmem>>, vector<128x8xf32>
    %cst_25 = arith.constant dense<0.000000e+00> : vector<128x8xf32>
    %29 = tpu.matmul %27, %28, %cst_25 {dimension_numbers = #tpu.dot_dimension_numbers<[1], [0], [0], [1], [0, 0, 1, 1], [], []>} : vector<128x128xf32>, vector<128x8xf32>, vector<128x8xf32> -> vector<128x8xf32>
    %c0_26 = arith.constant 0 : index
    %c0_27 = arith.constant 0 : index
    %30 = vector.load %arg10[%c0_26, %c0_27] : memref<16x8xf32, #tpu.memory_space<vmem>>, vector<16x8xf32>
    %cst_28 = arith.constant dense<0.000000e+00> : vector<128x8xf32>
    %31 = tpu.matmul %1, %30, %cst_28 {dimension_numbers = #tpu.dot_dimension_numbers<[1], [0], [0], [1], [0, 0, 1, 1], [], []>} : vector<128x16xf32>, vector<16x8xf32>, vector<128x8xf32> -> vector<128x8xf32>
    %32 = arith.addf %29, %31 : vector<128x8xf32>
    %33 = arith.mulf %32, %22 : vector<128x8xf32>
    %c0_29 = arith.constant 0 : index
    %c0_30 = arith.constant 0 : index
    %34 = vector.load %arg13[%c0_29, %c0_30] : memref<16x128xf32, #tpu.memory_space<vmem>>, vector<16x128xf32>
    %cst_31 = arith.constant dense<0.000000e+00> : vector<128x128xf32>
    %35 = tpu.matmul %17, %34, %cst_31 {dimension_numbers = #tpu.dot_dimension_numbers<[1], [0], [0], [1], [0, 0, 1, 1], [], []>} : vector<128x16xf32>, vector<16x128xf32>, vector<128x128xf32> -> vector<128x128xf32>
    %c0_32 = arith.constant 0 : index
    %c0_33 = arith.constant 0 : index
    %36 = vector.load %arg15[%c0_32, %c0_33] : memref<8x128xf32, #tpu.memory_space<vmem>>, vector<8x128xf32>
    %cst_34 = arith.constant dense<0.000000e+00> : vector<128x128xf32>
    %37 = tpu.matmul %33, %36, %cst_34 {dimension_numbers = #tpu.dot_dimension_numbers<[1], [0], [0], [1], [0, 0, 1, 1], [], []>} : vector<128x8xf32>, vector<8x128xf32>, vector<128x128xf32> -> vector<128x128xf32>
    %38 = arith.mulf %35, %37 : vector<128x128xf32>
    %c0_35 = arith.constant 0 : index
    %c0_36 = arith.constant 0 : index
    %39 = vector.load %arg16[%c0_35, %c0_36] : memref<128x16xf32, #tpu.memory_space<vmem>>, vector<128x16xf32>
    %cst_37 = arith.constant dense<0.000000e+00> : vector<128x16xf32>
    %40 = tpu.matmul %38, %39, %cst_37 {dimension_numbers = #tpu.dot_dimension_numbers<[1], [0], [0], [1], [0, 0, 1, 1], [], []>} : vector<128x128xf32>, vector<128x16xf32>, vector<128x16xf32> -> vector<128x16xf32>
    %c0_38 = arith.constant 0 : index
    %c0_39 = arith.constant 0 : index
    %41 = vector.load %arg14[%c0_38, %c0_39] : memref<8x16xf32, #tpu.memory_space<vmem>>, vector<8x16xf32>
    %cst_40 = arith.constant dense<0.000000e+00> : vector<128x16xf32>
    %42 = tpu.matmul %33, %41, %cst_40 {dimension_numbers = #tpu.dot_dimension_numbers<[1], [0], [0], [1], [0, 0, 1, 1], [], []>} : vector<128x8xf32>, vector<8x16xf32>, vector<128x16xf32> -> vector<128x16xf32>
    %43 = arith.addf %40, %42 : vector<128x16xf32>
    %cst_41 = arith.constant 0.000000e+00 : f32
    %44 = vector.broadcast %cst_41 : f32 to vector<128x1xf32>
    %45 = arith.subf %44, %7 : vector<128x1xf32>
    %cst_42 = arith.constant 1.000000e+01 : f32
    %46 = vector.broadcast %cst_42 : f32 to vector<128x1xf32>
    %47 = arith.divf %45, %46 : vector<128x1xf32>
    %48 = math.exp %47 : vector<128x1xf32>
    %49 = vector.broadcast %48 : vector<128x1xf32> to vector<128x16xf32>
    %50 = arith.mulf %43, %49 : vector<128x16xf32>
    %51 = vector.shape_cast %50 : vector<128x16xf32> to vector<16x8x16xf32>
    %cst_43 = arith.constant dense<0.000000e+00> : vector<16x16xf32>
    %52 = vector.multi_reduction <add>, %51, %cst_43 [1] : vector<16x8x16xf32> to vector<16x16xf32>
    %c16_i32 = arith.constant 16 : i32
    %53 = arith.muli %arg1, %c16_i32 : i32
    %54 = arith.index_cast %53 : i32 to index
    %c0_44 = arith.constant 0 : index
    %55 = vector.load %arg21[%54, %c0_44] : memref<16x16xf32, #tpu.memory_space<vmem>>, vector<16x16xf32>
    tpu.vector_store %arg21[%54, %c0_44], %52 {strides = array<i32>} : memref<16x16xf32, #tpu.memory_space<vmem>>, vector<16x16xf32>,
    %c0_i32 = arith.constant 0 : i32
    %56 = arith.cmpi eq, %arg1, %c0_i32 : i32
    %57 = arith.extui %56 : i1 to i32
    %c0_i32_45 = arith.constant 0 : i32
    %58 = arith.cmpi ne, %57, %c0_i32_45 : i32
    scf.if %58 {
      %c0_46 = arith.constant 0 : index
      %c0_47 = arith.constant 0 : index
      %59 = vector.load %arg21[%c0_46, %c0_47] : memref<16x16xf32, #tpu.memory_space<vmem>>, vector<16x16xf32>
      %60 = tpu.transpose %59, [1, 0] : vector<16x16xf32> -> vector<16x16xf32>
      %c0_48 = arith.constant 0 : index
      %c0_49 = arith.constant 0 : index
      %c0_50 = arith.constant 0 : index
      %61 = vector.load %arg4[%c0_48, %c0_49, %c0_50] : memref<1x16x16xf32, #tpu.memory_space<vmem>>, vector<1x16x16xf32>
      %62 = vector.shape_cast %61 : vector<1x16x16xf32> to vector<16x16xf32>
      %c0_51 = arith.constant 0 : index
      %c0_52 = arith.constant 0 : index
      %63 = vector.load %arg17[%c0_51, %c0_52] : memref<16x16xf32, #tpu.memory_space<vmem>>, vector<16x16xf32>
      %cst_53 = arith.constant dense<0.000000e+00> : vector<16x16xf32>
      %64 = tpu.matmul %62, %63, %cst_53 {dimension_numbers = #tpu.dot_dimension_numbers<[1], [0], [0], [1], [0, 0, 1, 1], [], []>} : vector<16x16xf32>, vector<16x16xf32>, vector<16x16xf32> -> vector<16x16xf32>
      %65 = arith.addf %64, %60 : vector<16x16xf32>
      %cst_54 = arith.constant 9.000000e+00 : f32
      %66 = vector.broadcast %cst_54 : f32 to vector<16x16xf32>
      %67 = arith.divf %65, %66 : vector<16x16xf32>
      %c0_55 = arith.constant 0 : index
      %c0_56 = arith.constant 0 : index
      %68 = vector.load %arg18[%c0_55, %c0_56] : memref<1x16xf32, #tpu.memory_space<vmem>>, vector<1x16xf32>
      %69 = vector.broadcast %68 : vector<1x16xf32> to vector<16x16xf32>
      %70 = arith.addf %67, %69 : vector<16x16xf32>
      %c0_57 = arith.constant 0 : index
      %c0_58 = arith.constant 0 : index
      %c0_59 = arith.constant 0 : index
      %71 = vector.load %arg19[%c0_57, %c0_58, %c0_59] : memref<1x16x16xf32, #tpu.memory_space<vmem>>, vector<1x16x16xf32>
      %72 = vector.shape_cast %71 : vector<1x16x16xf32> to vector<16x16xf32>
      %73 = vector.shape_cast %70 : vector<16x16xf32> to vector<1x16x16xf32>
      tpu.vector_store %arg19[%c0_57, %c0_58, %c0_59], %73 {strides = array<i32>} : memref<1x16x16xf32, #tpu.memory_space<vmem>>, vector<1x16x16xf32>,
      %cst_60 = arith.constant dense<0.000000e+00> : vector<16xf32>
      %74 = vector.multi_reduction <add>, %70, %cst_60 [0] : vector<16x16xf32> to vector<16xf32>
      %75 = vector.shape_cast %74 : vector<16xf32> to vector<1x16xf32>
      %76 = arith.mulf %70, %70 : vector<16x16xf32>
      %cst_61 = arith.constant dense<0.000000e+00> : vector<16xf32>
      %77 = vector.multi_reduction <add>, %76, %cst_61 [0] : vector<16x16xf32> to vector<16xf32>
      %78 = vector.shape_cast %77 : vector<16xf32> to vector<1x16xf32>
      %79 = tpu.concatenate %75, %78 in 0 : vector<1x16xf32>, vector<1x16xf32> -> vector<2x16xf32>
      %c0_62 = arith.constant 0 : index
      %c0_63 = arith.constant 0 : index
      %c0_64 = arith.constant 0 : index
      %80 = vector.load %arg20[%c0_62, %c0_63, %c0_64] : memref<1x2x16xf32, #tpu.memory_space<vmem>>, vector<1x2x16xf32>
      %81 = vector.shape_cast %80 : vector<1x2x16xf32> to vector<2x16xf32>
      %82 = vector.shape_cast %79 : vector<2x16xf32> to vector<1x2x16xf32>
      tpu.vector_store %arg20[%c0_62, %c0_63, %c0_64], %82 {strides = array<i32>} : memref<1x2x16xf32, #tpu.memory_space<vmem>>, vector<1x2x16xf32>,
    } else {
    }
    return
  }
  func.func @transform_0(%arg0: i32, %arg1: i32) -> (i32, i32, i32) {
    %c0_i32 = arith.constant 0 : i32
    %c0_i32_0 = arith.constant 0 : i32
    return %arg0, %arg1, %c0_i32 : i32, i32, i32
  }
  func.func @transform_1(%arg0: i32, %arg1: i32) -> (i32, i32, i32) {
    %c0_i32 = arith.constant 0 : i32
    %c0_i32_0 = arith.constant 0 : i32
    return %arg0, %arg1, %c0_i32 : i32, i32, i32
  }
  func.func @transform_2(%arg0: i32, %arg1: i32) -> (i32, i32, i32) {
    %c0_i32 = arith.constant 0 : i32
    %c0_i32_0 = arith.constant 0 : i32
    %c0_i32_1 = arith.constant 0 : i32
    return %arg0, %c0_i32, %c0_i32_0 : i32, i32, i32
  }
  func.func @transform_3(%arg0: i32, %arg1: i32) -> (i32, i32) {
    %c0_i32 = arith.constant 0 : i32
    %c0_i32_0 = arith.constant 0 : i32
    %c0_i32_1 = arith.constant 0 : i32
    return %c0_i32, %c0_i32_0 : i32, i32
  }
  func.func @transform_4(%arg0: i32, %arg1: i32) -> (i32, i32) {
    %c0_i32 = arith.constant 0 : i32
    %c0_i32_0 = arith.constant 0 : i32
    %c0_i32_1 = arith.constant 0 : i32
    return %c0_i32, %c0_i32_0 : i32, i32
  }
  func.func @transform_5(%arg0: i32, %arg1: i32) -> (i32, i32) {
    %c0_i32 = arith.constant 0 : i32
    %c0_i32_0 = arith.constant 0 : i32
    %c0_i32_1 = arith.constant 0 : i32
    return %c0_i32, %c0_i32_0 : i32, i32
  }
  func.func @transform_6(%arg0: i32, %arg1: i32) -> (i32, i32) {
    %c0_i32 = arith.constant 0 : i32
    %c0_i32_0 = arith.constant 0 : i32
    %c0_i32_1 = arith.constant 0 : i32
    return %c0_i32, %c0_i32_0 : i32, i32
  }
  func.func @transform_7(%arg0: i32, %arg1: i32) -> (i32, i32) {
    %c0_i32 = arith.constant 0 : i32
    %c0_i32_0 = arith.constant 0 : i32
    %c0_i32_1 = arith.constant 0 : i32
    return %c0_i32, %c0_i32_0 : i32, i32
  }
  func.func @transform_8(%arg0: i32, %arg1: i32) -> (i32, i32) {
    %c0_i32 = arith.constant 0 : i32
    %c0_i32_0 = arith.constant 0 : i32
    %c0_i32_1 = arith.constant 0 : i32
    return %c0_i32, %c0_i32_0 : i32, i32
  }
  func.func @transform_9(%arg0: i32, %arg1: i32) -> (i32, i32) {
    %c0_i32 = arith.constant 0 : i32
    %c0_i32_0 = arith.constant 0 : i32
    %c0_i32_1 = arith.constant 0 : i32
    return %c0_i32, %c0_i32_0 : i32, i32
  }
  func.func @transform_10(%arg0: i32, %arg1: i32) -> (i32, i32) {
    %c0_i32 = arith.constant 0 : i32
    %c0_i32_0 = arith.constant 0 : i32
    %c0_i32_1 = arith.constant 0 : i32
    return %c0_i32, %c0_i32_0 : i32, i32
  }
  func.func @transform_11(%arg0: i32, %arg1: i32) -> (i32, i32) {
    %c0_i32 = arith.constant 0 : i32
    %c0_i32_0 = arith.constant 0 : i32
    %c0_i32_1 = arith.constant 0 : i32
    return %c0_i32, %c0_i32_0 : i32, i32
  }
  func.func @transform_12(%arg0: i32, %arg1: i32) -> (i32, i32) {
    %c0_i32 = arith.constant 0 : i32
    %c0_i32_0 = arith.constant 0 : i32
    %c0_i32_1 = arith.constant 0 : i32
    return %c0_i32, %c0_i32_0 : i32, i32
  }
  func.func @transform_13(%arg0: i32, %arg1: i32) -> (i32, i32) {
    %c0_i32 = arith.constant 0 : i32
    %c0_i32_0 = arith.constant 0 : i32
    %c0_i32_1 = arith.constant 0 : i32
    return %c0_i32, %c0_i32_0 : i32, i32
  }
  func.func @transform_14(%arg0: i32, %arg1: i32) -> (i32, i32) {
    %c0_i32 = arith.constant 0 : i32
    %c0_i32_0 = arith.constant 0 : i32
    %c0_i32_1 = arith.constant 0 : i32
    return %c0_i32, %c0_i32_0 : i32, i32
  }
  func.func @transform_15(%arg0: i32, %arg1: i32) -> (i32, i32) {
    %c0_i32 = arith.constant 0 : i32
    %c0_i32_0 = arith.constant 0 : i32
    %c0_i32_1 = arith.constant 0 : i32
    return %c0_i32, %c0_i32_0 : i32, i32
  }
  func.func @transform_16(%arg0: i32, %arg1: i32) -> (i32, i32) {
    %c0_i32 = arith.constant 0 : i32
    %c0_i32_0 = arith.constant 0 : i32
    %c0_i32_1 = arith.constant 0 : i32
    return %c0_i32, %c0_i32_0 : i32, i32
  }
  func.func @transform_17(%arg0: i32, %arg1: i32) -> (i32, i32, i32) {
    %c0_i32 = arith.constant 0 : i32
    %c0_i32_0 = arith.constant 0 : i32
    %c0_i32_1 = arith.constant 0 : i32
    return %arg0, %c0_i32, %c0_i32_0 : i32, i32, i32
  }
  func.func @transform_18(%arg0: i32, %arg1: i32) -> (i32, i32, i32) {
    %c0_i32 = arith.constant 0 : i32
    %c0_i32_0 = arith.constant 0 : i32
    %c0_i32_1 = arith.constant 0 : i32
    return %arg0, %c0_i32, %c0_i32_0 : i32, i32, i32
  }
}

</mosaic_0001>

<bundles_post_ra>
// kernel: tile.53
= control target key start
LH: loop header
LB: loop body
LE: loop exit
PB: predicated region body
PF: predicated region fallthrough
CT: control target
= control target key end

     0   :  { %s22_s0 = inlined_call_operand.vmem [shape: f32[16], index: 0, kind: input, shape index: {}]   ;;  %s23_s1 = inlined_call_operand.vmem [shape: f32[8,16], index: 1, kind: output, shape index: {}]  }
   0x1   :  { %v4_v0 = vld [vmem:[%s22_s0] ss:$0 sm:$0xff] }
   0x2   :  { %5 = vst [vmem:[%s23_s1] sm:$0xff] %v4_v0 }

// kernel: tile.54
= control target key start
LH: loop header
LB: loop body
LE: loop exit
PB: predicated region body
PF: predicated region fallthrough
CT: control target
= control target key end

     0   :  { %s67_s10 = smov 112   ;;  %s68_s11 = smov 80   ;;  %vm3_vm0 = vcmask 130048   ;;  %vm9_vm1 = vcmask 1048448   ;;  %vm15_vm2 = vcmask 917248   ;;  %vm21_vm3 = vcmask 786048   ;;  %s111_s0 = inlined_call_operand.vmem [shape: f32[8,16], index: 0, kind: input, shape index: {}]   ;;  %s112_s1 = inlined_call_operand.vmem [shape: f32[1,128], index: 1, kind: output, shape index: {}]  }
   0x1   :  { %v53_v0 = vld [vmem:[%s111_s0 + $0x7] sm:$0x1]   ;;  %v55_v1 = vld [vmem:[%s111_s0 + $0x5] sm:$0x1]   ;;  %v54_v2 = vld [vmem:[%s111_s0 + $0x6] sm:$0x1]  }
   0x2   :  { %7 = vrot.lane.b32.xlu0 %v53_v0, %s67_s10  ;;  %19 = vrot.lane.b32.xlu1 %v55_v1, %s68_s11  ;;  %v56_v3 = vld [vmem:[%s111_s0 + $0x4] sm:$0x1]   ;;  %v2_v4 = vld [vmem:[%s111_s0] sm:$0x1]   ;;  %s69_s18 = smov 96   ;;  %s70_s19 = smov 64  }
   0x3   :  { %4 = vst.msk [vmem:[#allocation0] sm:$0x1] %vm3_vm0, %v2_v4   ;;  %v57_v5 = vld [vmem:[%s111_s0 + $0x3] sm:$0x1]   ;;  %v58_v6 = vld [vmem:[%s111_s0 + $0x2] sm:$0x1]  }
   0x4   :  { %s71_s24 = smov 48   ;;  %s72_s25 = smov 32   ;;  %v59_v7 = vld [vmem:[%s111_s0 + $0x1] sm:$0x1]   ;;  %vm27_vm4 = vcmask 654848   ;;  %vm33_vm5 = vcmask 523648  }
   0x5   :  { %s73_s0 = smov 16   ;;  %vm39_vm6 = vcmask 392448   ;;  %vm45_vm7 = vcmask 261248  }
   0x6   :  { %13 = vrot.lane.b32.xlu0 %v54_v2, %s69_s18  ;;  %25 = vrot.lane.b32.xlu1 %v56_v3, %s70_s19 }
   0xa   :  { %31 = vrot.lane.b32.xlu0 %v57_v5, %s71_s24  ;;  %37 = vrot.lane.b32.xlu1 %v58_v6, %s72_s25 }
   0xe   :  { %43 = vrot.lane.b32.xlu0 %v59_v7, %s73_s0 }
  0x74   :  { %v8_v8 = vpop.permute.xlu0 %7   ;;  %v20_v9 = vpop.permute.xlu1 %19  }
  0x75   :  { %10 = vst.msk [vmem:[#allocation0] sm:$0x1] %vm9_vm1, %v8_v8  }
  0x78   :  { %v14_v10 = vpop.permute.xlu0 %13   ;;  %v26_v11 = vpop.permute.xlu1 %25  }
  0x79   :  { %16 = vst.msk [vmem:[#allocation0] sm:$0x1] %vm15_vm2, %v14_v10  }
  0x7a   :  { %22 = vst.msk [vmem:[#allocation0] sm:$0x1] %vm21_vm3, %v20_v9  }
  0x7b   :  { %28 = vst.msk [vmem:[#allocation0] sm:$0x1] %vm27_vm4, %v26_v11  }
  0x7c   :  { %v32_v12 = vpop.permute.xlu0 %31   ;;  %v38_v13 = vpop.permute.xlu1 %37  }
  0x7d   :  { %34 = vst.msk [vmem:[#allocation0] sm:$0x1] %vm33_vm5, %v32_v12  }
  0x7e   :  { %40 = vst.msk [vmem:[#allocation0] sm:$0x1] %vm39_vm6, %v38_v13  }
  0x80   :  { %v44_v14 = vpop.permute.xlu0 %43  }
  0x81   :  { %46 = vst.msk [vmem:[#allocation0] sm:$0x1] %vm45_vm7, %v44_v14  }
  0x88   :  { %v50_v15 = vld [vmem:[#allocation0] sm:$0x1] }
  0x89   :  { %52 = vst [vmem:[%s112_s1] sm:$0x1] %v50_v15 }

// kernel: neg.11
= control target key start
LH: loop header
LB: loop body
LE: loop exit
PB: predicated region body
PF: predicated region fallthrough
CT: control target
= control target key end

     0   :  { %s72_s0 = inlined_call_operand.vmem [shape: f32[2,16,16], index: 0, kind: input, shape index: {}]   ;;  %s73_s1 = inlined_call_operand.vmem [shape: f32[2,16,16], index: 1, kind: output, shape index: {}]  }
   0x1   :  { %v2_v0 = vld [vmem:[%s72_s0] sm:$0xff]  ;;  %v32_v1 = vld [vmem:[%s72_s0 + $0x10] sm:$0xff]  ;;  %v34_v2 = vld [vmem:[%s72_s0 + $0x8] sm:$0xff] }
   0x2   :  { %v5_v3 = vxor.u32 2147483648, %v2_v0  ;;  %v12_v4 = vxor.u32 2147483648, %v32_v1  ;;  %v20_v5 = vxor.u32 2147483648, %v34_v2  ;;  %v36_v6 = vld [vmem:[%s72_s0 + $0x18] sm:$0xff] }
   0x3   :  { %v28_v7 = vxor.u32 2147483648, %v36_v6 }
   0x4   :  { %7 = vst [vmem:[%s73_s1] sm:$0xff] %v5_v3  ;;  %33 = vst [vmem:[%s73_s1 + $0x10] sm:$0xff] %v12_v4 }
   0x5   :  { %35 = vst [vmem:[%s73_s1 + $0x8] sm:$0xff] %v20_v5  ;;  %37 = vst [vmem:[%s73_s1 + $0x18] sm:$0xff] %v28_v7 }

// kernel: _lambda_.15
= control target key start
LH: loop header
LB: loop body
LE: loop exit
PB: predicated region body
PF: predicated region fallthrough
CT: control target
= control target key end

     0   :  { %s73_s0 = inlined_call_operand.vmem [shape: f32[4,128], index: 0, kind: input, shape index: {}]   ;;  %s74_s1 = inlined_call_operand.vmem [shape: f32[1,128], index: 1, kind: input, shape index: {}]   ;;  %s75_s2 = inlined_call_operand.vmem [shape: f32[1,128], index: 2, kind: input, shape index: {}]   ;;  %s76_s3 = inlined_call_operand.vmem [shape: f32[4,128], index: 3, kind: output, shape index: {}]  }
   0x1   :  { %v14_v0 = vld [vmem:[%s73_s0] sm:$0xf] }
   0x2   :  { %v39_v1 = vld [vmem:[%s74_s1] ss:$0 sm:$0xff] }
   0x3   :  { %v40_v2 = vld [vmem:[%s75_s2] ss:$0 sm:$0xff]  ;;  %v22_v3 = vmul.f32 %v39_v1, %v14_v0 }
   0x5   :  { %v30_v4 = vadd.f32 %v40_v2, %v22_v3 }
   0x7   :  { %vm31_vm0 = vcmp.ge.f32.partialorder %v30_v4, 0.0  ;;  %v32_v5 = vmul.f32 0.2, %v30_v4 }
   0x9   :  { %v33_v6 = vsel %vm31_vm0, %v30_v4, %v32_v5 }
   0xa   :  { %34 = vst [vmem:[%s76_s3] sm:$0xf] %v33_v6 }

// kernel: _lambda_.14
= control target key start
LH: loop header
LB: loop body
LE: loop exit
PB: predicated region body
PF: predicated region fallthrough
CT: control target
= control target key end

     0   :  { %vm31_vm0 = vcmask 1042432   ;;  %vm18_vm1 = vcmask 23552   ;;  %vm120_vm2 = vcmask 130048   ;;  %vm155_vm3 = vcmask 1040384   ;;  %s249_s1 = inlined_call_operand.vmem [shape: f32[3,16], index: 1, kind: input, shape index: {}]   ;;  %s250_s0 = inlined_call_operand.vmem [shape: f32[32,3], index: 0, kind: input, shape index: {}]   ;;  %s251_s2 = inlined_call_operand.vmem [shape: f32[32,16], index: 2, kind: output, shape index: {0}]   ;;  %s252_s3 = inlined_call_operand.vmem [shape: f32[1,2,16], index: 3, kind: output, shape index: {1}]  }
   0x1   :  { %v17_v0 = vld [vmem:[%s249_s1] sm:$0x7]  ;;  %v14_v2 = vld [vmem:[%s250_s0 + $0x8] sm:$0xff]  ;;  %v15_v3 = vld [vmem:[%s250_s0 + $0x10] sm:$0xff]  ;;  %vm157_vm4 = vcmask 123904  }
   0x2   :  { %v13_v1 = vld [vmem:[%s250_s0] sm:$0xff]  ;;  %177 = vmatprep.subr.msk.mxu0 %vm31_vm0, %v17_v0  ;;  %185 = vmatprep.subr.msk.mxu1 %vm31_vm0, %v17_v0  ;;  %v16_v4 = vld [vmem:[%s250_s0 + $0x18] sm:$0xff] }
   0x3   :  { %178 = vmatpush3.msk.msra.mxu0 %vm31_vm0, %v17_v0  ;;  %179 = vmatprep.mubr.msk.f32.mxu0 %vm18_vm1, %v13_v1 }
   0x4   :  { %186 = vmatpush3.msk.msra.mxu1 %vm31_vm0, %v17_v0  ;;  %180 = vmatmul.mubr.msk.f32.vlgmr.msra.gmra.mrb[0].mxu0 %vm18_vm1, %v14_v2 }
   0x5   :  { %182 = vmatprep.mubr.msk.f32.mxu1 %vm18_vm1, %v15_v3 }
   0x6   :  { %183 = vmatmul.mubr.msk.f32.vlgmr.msra.gmra.mrb[0].mxu1 %vm18_vm1, %v16_v4 }
  0xd7   :  { %v181_v5 = vpop.f32.mrb[0].mxu0 }
  0xd8   :  { %122 = vst.msk [vmem:[%s251_s2 + $0x8] sm:$0xff] %vm120_vm2, %v181_v5  ;;  %v126_v6 = vsel %vm120_vm2, %v181_v5, 0.0  ;;  %v139_v7 = vmul.f32 %v181_v5, %v181_v5  ;;  %v101_v8 = vpop.f32.mrb[1].mxu0 }
  0xd9   :  { %121 = vst.msk [vmem:[%s251_s2] sm:$0xff] %vm120_vm2, %v101_v8  ;;  %v125_v9 = vsel %vm120_vm2, %v101_v8, 0.0  ;;  %v138_v10 = vmul.f32 %v101_v8, %v101_v8  ;;  %v184_v11 = vpop.f32.mrb[0].mxu1 }
  0xda   :  { %v143_v12 = vsel %vm120_vm2, %v139_v7, 0.0  ;;  %v127_v13 = vadd.f32 %v126_v6, %v125_v9  ;;  %124 = vst.msk [vmem:[%s251_s2 + $0x18] sm:$0xff] %vm120_vm2, %v184_v11  ;;  %v111_v14 = vpop.f32.mrb[1].mxu1  ;;  %v141_v16 = vmul.f32 %v184_v11, %v184_v11  ;;  %v130_v21 = vsel %vm120_vm2, %v184_v11, 0.0 }
  0xdb   :  { %v142_v15 = vsel %vm120_vm2, %v138_v10, 0.0  ;;  %123 = vst.msk [vmem:[%s251_s2 + $0x10] sm:$0xff] %vm120_vm2, %v111_v14  ;;  %v128_v17 = vsel %vm120_vm2, %v111_v14, 0.0  ;;  %v140_v18 = vmul.f32 %v111_v14, %v111_v14 }
  0xdc   :  { %v144_v19 = vadd.f32 %v143_v12, %v142_v15  ;;  %v129_v20 = vadd.f32 %v128_v17, %v127_v13  ;;  %v147_v25 = vsel %vm120_vm2, %v141_v16, 0.0 }
  0xdd   :  { %v145_v22 = vsel %vm120_vm2, %v140_v18, 0.0 }
  0xde   :  { %v131_v23 = vadd.f32 %v130_v21, %v129_v20  ;;  %v146_v24 = vadd.f32 %v145_v22, %v144_v19 }
  0xe0   :  { %v132_v26 = vrot.slane %v131_v23, 4  ;;  %v148_v27 = vadd.f32 %v147_v25, %v146_v24 }
  0xe2   :  { %v133_v28 = vadd.f32 %v132_v26, %v131_v23  ;;  %v149_v29 = vrot.slane %v148_v27, 4 }
  0xe4   :  { %v134_v30 = vrot.slane %v133_v28, 2  ;;  %v150_v31 = vadd.f32 %v149_v29, %v148_v27 }
  0xe6   :  { %v135_v32 = vadd.f32 %v134_v30, %v133_v28  ;;  %v151_v33 = vrot.slane %v150_v31, 2 }
  0xe8   :  { %v136_v34 = vrot.slane %v135_v32, 1  ;;  %v152_v35 = vadd.f32 %v151_v33, %v150_v31 }
  0xea   :  { %v153_v36 = vrot.slane %v152_v35, 1  ;;  %v137_v37 = vadd.f32 %v136_v34, %v135_v32 }
  0xec   :  { %v154_v38 = vadd.f32 %v153_v36, %v152_v35 }
  0xee   :  { %v156_v39 = vsel %vm155_vm3, %v137_v37, %v154_v38 }
  0xef   :  { %158 = vst.msk [vmem:[%s252_s3] sm:$0x3] %vm157_vm4, %v156_v39 }

// kernel: _lambda_.16
= control target key start
LH: loop header
LB: loop body
LE: loop exit
PB: predicated region body
PF: predicated region fallthrough
CT: control target
= control target key end

     0   :  { %s622_s9 = smov 0   ;;  %s624_s10 = smov 0   ;;  %s672_s0 = inlined_call_operand.vmem [shape: f32[2,16,16], index: 0, kind: input, shape index: {}, may-alias: {0,1}]   ;;  %s673_s1 = inlined_call_operand.vmem [shape: f32[2,16,16], index: 1, kind: input, shape index: {}, may-alias: {0,1}]   ;;  %s674_s2 = inlined_call_operand.vmem [shape: f32[2,16,16], index: 2, kind: output, shape index: {}]  }
   0x1   :  { %s626_s11 = smov 0  }
   0x2 LB: > { %s24_s12 = sadd.s32 1, %s597_s10  ;;  %p501_p0 = scmp.ge.s32.totalorder %s601_s11, 1  ;;  %s601_s11 = sphi %s626_s11, %s12_s11   ;;  %s597_s10 = sphi %s624_s10, %s676_s10   ;;  %s593_s9 = sphi %s622_s9, %s675_s9  }
   0x3   : > { %p26_p1 = scmp.ge.s32.totalorder %s24_s12, 2  ;;  %p143_p2 = scmp.lt.s32.totalorder %s601_s11, 3 }
   0x5   : > { %s678_s12 = smov (%p26_p1, %s24_s12), 0  ;;  %p144_p3 = pnand %p501_p0, %p143_p2 }
   0x6   : > { %p179_p4 = scmp.lt.s32.totalorder (!%p144_p3), %s593_s9, 1  ;;  %v603_v0 = vmov (!%p144_p3), 0.0|0.0   ;;  %vm604_vm0 = vmmov (!%p144_p3), 0   ;;  %v605_v1 = vmov (!%p144_p3), 0.0   ;;  %vm209_vm1 = vcmask (!%p144_p3), 130048  }
   0x7   : > { %147 = sbr.rel (%p144_p3) target bundleno = 250 (0xfa), region = 28  ;;  %541 = vmatprep.subr.bf16.mxu0 (!%p144_p3), %v603_v0  ;;  %531 = vmatprep.mubr.msk.f32.mxu0 (!%p144_p3), %vm604_vm0, %v605_v1  ;;  %vm543_vm2 = vmpackc.low (!%p144_p3), %vm209_vm1, %vm209_vm1  ;;  %v606_v14 = vmov (!%p144_p3), 1.0   ;;  %v384_v15 = vlaneseq (!%p144_p3) }
   0x9   : > { %v385_v17 = vshrl.u32 (!%p144_p3), %v384_v15, 7 }
   0xb   : > { %v386_v18 = vsub.s32 (!%p144_p3), 0, %v385_v17 }
   0xe   : > { %s680_s9 = smov (!%p179_p4, %s593_s9), 1 }
   0xf   : > { %s640_s13 = sshll.u32 %s680_s9, 4 }
  0x10   : > { %s192_s16 = scalar_lea.vmem %s673_s1, %s640_s13  ;;  %s186_s19 = scalar_lea.vmem %s672_s0, %s640_s13 }
  0x11   : > { %v205_v2 = vld [vmem:[%s192_s16] sm:$0xff]  ;;  %v206_v3 = vld [vmem:[%s192_s16 + $0x8] sm:$0xff]  ;;  %s201_s22 = scalar_lea.vmem %s674_s2, %s640_s13 }
  0x12   : > { %v216_v4 = vmul.f32 %v205_v2, %v205_v2  ;;  %v217_v5 = vmul.f32 %v206_v3, %v206_v3  ;;  %v545_v6 = vpack.c.bf16 %v206_v3, %v205_v2  ;;  %v203_v7 = vld [vmem:[%s186_s19] sm:$0xff]  ;;  %v204_v8 = vld [vmem:[%s186_s19 + $0x8] sm:$0xff] }
  0x13   : > { %v207_v9 = vmul.f32 %v203_v7, %v203_v7  ;;  %538 = vmatprep.mubr.msk.f32.mxu1 %vm209_vm1, %v203_v7  ;;  %v208_v10 = vmul.f32 %v204_v8, %v204_v8 }
  0x14   : > { %547 = vmatprep.subr.msk.bf16.mxu1 %vm543_vm2, %v545_v6  ;;  %v542_v11 = vpack.c.bf16 %v217_v5, %v216_v4 }
  0x15   : > { %550 = vmatpush3.bf16.xpose.msk.msra.mxu1 %vm543_vm2, %v545_v6  ;;  %v210_v12 = vsel %vm209_vm1, %v207_v9, 0.0  ;;  %v213_v13 = vsel %vm209_vm1, %v208_v10, 0.0 }
  0x16   : > { %544 = vmatpush3.bf16.xpose.msk.msra.mxu0 %vm543_vm2, %v542_v11  ;;  %211 = vadd.xlane.f32.xlu0 %v210_v12 }
  0x1a   : > { %214 = vadd.xlane.f32.xlu0 %v213_v13 }
  0x1c   : > { %539 = vmatmul.mubr.msk.f32.vlgmr.msra.gmra.mrb[0].mxu1 %vm209_vm1, %v204_v8 }
  0x1d   : > { %532 = vmatmul.mubr.msk.f32.vlgmr.msra.gmra.mrb[0].mxu0 %vm209_vm1, %v606_v14 }
  0xa3   : > { %v212_v16 = vpop.xlane.xlu0 %211 }
  0xa7   : > { %v215_v20 = vpop.xlane.xlu0 %214 }
  0xef   : > { %v540_v19 = vpop.f32.mrb[0].mxu1 }
  0xf0   : > { %v293_v21 = vpop.f32.mrb[0].mxu0  ;;  %v375_v22 = vpop.f32.mrb[1].mxu1  ;;  %v391_v24 = vmul.f32 2.0, %v540_v19 }
  0xf1   : > { %v387_v23 = vrot.slane %v293_v21, %v386_v18  ;;  %v533_v25 = vpop.f32.mrb[1].mxu0  ;;  %v390_v26 = vmul.f32 2.0, %v375_v22 }
  0xf3   : > { %v388_v27 = vadd.f32 %v387_v23, %v212_v16  ;;  %v389_v28 = vadd.f32 %v387_v23, %v215_v20 }
  0xf5   : > { %v392_v29 = vsub.f32 %v388_v27, %v390_v26  ;;  %v393_v30 = vsub.f32 %v389_v28, %v391_v24 }
  0xf7   : > { %v394_v31 = vand.u32 2147483647, %v392_v29  ;;  %v395_v32 = vand.u32 2147483647, %v393_v30 }
  0xf9   : > { %396 = vst.msk [vmem:[%s201_s22] sm:$0xff] %vm209_vm1, %v394_v31  ;;  %397 = vst.msk [vmem:[%s201_s22 + $0x8] sm:$0xff] %vm209_vm1, %v395_v32 }
  0xfa PF: > { %s12_s11 = sadd.s32 1, %s601_s11   ;;  %s675_s9 = smov %s597_s10 }
  0xfb   : > { %p9_p5 = scmp.ge.s32.totalorder %s12_s11, 4   ;;  %s676_s10 = smov %s678_s12 }
  0xfd   :  { %11 = sbr.rel (!%p9_p5) target bundleno = 2 (0x2), region = 61 }

// kernel: _lambda_.17
= control target key start
LH: loop header
LB: loop body
LE: loop exit
PB: predicated region body
PF: predicated region fallthrough
CT: control target
= control target key end

     0   :  { %s4114_s27 = smov 0   ;;  %s4116_s28 = smov 0   ;;  %s4904_s0 = inlined_call_operand.vmem [shape: f32[2,128,16], index: 0, kind: input, shape index: {}]   ;;  %s4905_s1 = inlined_call_operand.vmem [shape: f32[2,128,16], index: 1, kind: input, shape index: {}]   ;;  %s4906_s2 = inlined_call_operand.vmem [shape: f32[2,16,16], index: 2, kind: input, shape index: {}]   ;;  %s4907_s3 = inlined_call_operand.vmem [shape: f32[16,16], index: 3, kind: input, shape index: {}]   ;;  %s4908_s4 = inlined_call_operand.vmem [shape: f32[1,16], index: 4, kind: input, shape index: {}]   ;;  %s4909_s5 = inlined_call_operand.vmem [shape: f32[16,8], index: 5, kind: input, shape index: {}]   ;;  %s4910_s6 = inlined_call_operand.vmem [shape: f32[1,8], index: 6, kind: input, shape index: {}]   ;;  %s4911_s7 = inlined_call_operand.vmem [shape: f32[16,128], index: 7, kind: input, shape index: {}]   ;;  %s4912_s8 = inlined_call_operand.vmem [shape: f32[16,8], index: 8, kind: input, shape index: {}]   ;;  %s4913_s9 = inlined_call_operand.vmem [shape: f32[16,128], index: 9, kind: input, shape index: {}]   ;;  %s4914_s10 = inlined_call_operand.vmem [shape: f32[128,8], index: 10, kind: input, shape index: {}]   ;;  %s4915_s11 = inlined_call_operand.vmem [shape: f32[16,128], index: 11, kind: input, shape index: {}]   ;;  %s4916_s12 = inlined_call_operand.vmem [shape: f32[8,16], index: 12, kind: input, shape index: {}]   ;;  %s4917_s13 = inlined_call_operand.vmem [shape: f32[8,128], index: 13, kind: input, shape index: {}]   ;;  %s4918_s14 = inlined_call_operand.vmem [shape: f32[128,16], index: 14, kind: input, shape index: {}]   ;;  %s4919_s15 = inlined_call_operand.vmem [shape: f32[16,16], index: 15, kind: input, shape index: {}]   ;;  %s4920_s16 = inlined_call_operand.vmem [shape: f32[1,16], index: 16, kind: input, shape index: {}]   ;;  %s4921_s17 = inlined_call_operand.vmem [shape: f32[2,16,16], index: 17, kind: output, shape index: {0}]   ;;  %s4922_s18 = inlined_call_operand.vmem [shape: f32[2,2,16], index: 18, kind: output, shape index: {1}]  }
   0x1   :  { %4923 = sst [smem:[#allocation3_spill]] %s4904_s0  ;;  %s4118_s29 = smov 0  }
   0x2   :  { %4924 = sst [smem:[#allocation4_spill]] %s4905_s1 }
   0x3   :  { %4925 = sst [smem:[#allocation5_spill]] %s4906_s2 }
   0x4 LB: > { %s41_s30 = sadd.s32 1, %s4013_s28  ;;  %p3116_p0 = scmp.ge.s32.totalorder %s4017_s29, 1  ;;  %s4017_s29 = sphi %s4118_s29, %s29_s29   ;;  %s4013_s28 = sphi %s4116_s28, %s4930_s28   ;;  %s4009_s27 = sphi %s4114_s27, %s4929_s27  }
   0x5   : > { %p43_p1 = scmp.ge.s32.totalorder %s41_s30, 2  ;;  %p561_p2 = scmp.lt.s32.totalorder %s4017_s29, 3 }
   0x7   : > { %s4932_s30 = smov (%p43_p1, %s41_s30), 0  ;;  %p562_p3 = pnand %p3116_p0, %p561_p2 }
   0x8   : > { %v784_v0 = vld [vmem:[%s4907_s3] sm:$0xff] (!%p562_p3)  ;;  %v785_v1 = vld [vmem:[%s4907_s3 + $0x8] sm:$0xff] (!%p562_p3)  ;;  %p638_p4 = scmp.lt.s32.totalorder (!%p562_p3), %s4009_s27, 1  ;;  %s4926_s0 = sld [smem:[#allocation3_spill]] (!%p562_p3)  ;;  %vm735_vm0 = vcmask (!%p562_p3), 130048  }
   0x9   : > { %565 = sbr.rel (%p562_p3) target bundleno = 1345 (0x541), region = 88  ;;  %v1034_v2 = vld [vmem:[%s4909_s5] sm:$0xff] (!%p562_p3)  ;;  %v3814_v3 = vpack.c.bf16 (!%p562_p3), %v785_v1, %v784_v0  ;;  %v1035_v4 = vld [vmem:[%s4909_s5 + $0x8] sm:$0xff] (!%p562_p3)  ;;  %s4927_s21 = sld [smem:[#allocation4_spill]] (!%p562_p3) }
   0xa   : > { %v3818_v5 = vpack.c.bf16 (!%p562_p3), %v1035_v4, %v1034_v2  ;;  %v1236_v54 = vld [vmem:[%s4911_s7] sm:$0xff] (!%p562_p3)  ;;  %v1237_v55 = vld [vmem:[%s4911_s7 + $0x8] sm:$0xff] (!%p562_p3)  ;;  %s4928_s25 = sld [smem:[#allocation5_spill]] (!%p562_p3) }
   0xb   : > { %3815 = vmatprep.subr.bf16.mxu1 (!%p562_p3), %v3814_v3  ;;  %v3822_v56 = vpack.c.bf16 (!%p562_p3), %v1237_v55, %v1236_v54  ;;  %v1383_v57 = vld [vmem:[%s4913_s9] sm:$0xff] (!%p562_p3)  ;;  %v1384_v58 = vld [vmem:[%s4913_s9 + $0x8] sm:$0xff] (!%p562_p3) }
   0xc   : > { %3817 = vmatpush3.bf16.msra.mxu1 (!%p562_p3), %v3814_v3  ;;  %v3826_v59 = vpack.c.bf16 (!%p562_p3), %v1384_v58, %v1383_v57  ;;  %v1610_v60 = vld [vmem:[%s4912_s8] sm:$0xff] (!%p562_p3)  ;;  %v1611_v61 = vld [vmem:[%s4912_s8 + $0x8] sm:$0xff] (!%p562_p3) }
   0xd   : > { %3819 = vmatprep.subr.bf16.mxu1 (!%p562_p3), %v3818_v5  ;;  %3823 = vmatprep.subr.bf16.mxu0 (!%p562_p3), %v3822_v56  ;;  %v3830_v62 = vpack.c.bf16 (!%p562_p3), %v1611_v61, %v1610_v60  ;;  %v4322_v63 = vld [vmem:[%s4908_s4] ss:$0 sm:$0xff] (!%p562_p3) }
   0xe   : > { %3825 = vmatpush3.bf16.msra.mxu0 (!%p562_p3), %v3822_v56 }
   0xf   : > { %3831 = vmatprep.subr.bf16.mxu0 (!%p562_p3), %v3830_v62 }
  0x10   : > { %s4934_s27 = smov (!%p638_p4, %s4009_s27), 1 }
  0x11   : > { %s3261_s24 = sshll.u32 %s4934_s27, 7  ;;  %s3263_s2 = sshll.u32 %s4934_s27, 4 }
  0x12   : > { %s4150_s19 = scalar_lea.vmem %s4926_s0, %s3261_s24  ;;  %s4155_s22 = scalar_lea.vmem %s4927_s21, %s3261_s24 }
  0x13   : > { %v4158_v6 = vld [vmem:[%s4150_s19] sm:$0xff]  ;;  %v4162_v8 = vld [vmem:[%s4150_s19 + $0x8] sm:$0xff]  ;;  %v4169_v11 = vld [vmem:[%s4150_s19 + $0x10] sm:$0xff]  ;;  %s661_s26 = scalar_lea.vmem %s4928_s25, %s3263_s2  ;;  %s666_s25 = scalar_lea.vmem %s4921_s17, %s3263_s2 }
  0x14   : > { %v687_v7 = vld [vmem:[%s4155_s22] sm:$0xff]  ;;  %v688_v10 = vld [vmem:[%s4155_s22 + $0x8] sm:$0xff]  ;;  %v689_v12 = vld [vmem:[%s4155_s22 + $0x10] sm:$0xff]  ;;  %s3125_s2 = sshll.u32 %s4934_s27, 1 }
  0x15   : > { %v4165_v9 = vsub.f32 %v4158_v6, %v687_v7  ;;  %v4173_v13 = vsub.f32 %v4162_v8, %v688_v10  ;;  %v4176_v14 = vsub.f32 %v4169_v11, %v689_v12  ;;  %v4179_v15 = vld [vmem:[%s4150_s19 + $0x18] sm:$0xff]  ;;  %v4183_v17 = vld [vmem:[%s4150_s19 + $0x20] sm:$0xff]  ;;  %v4199_v21 = vld [vmem:[%s4150_s19 + $0x28] sm:$0xff] }
  0x16   : > { %v690_v16 = vld [vmem:[%s4155_s22 + $0x18] sm:$0xff]  ;;  %v691_v18 = vld [vmem:[%s4155_s22 + $0x20] sm:$0xff]  ;;  %v692_v22 = vld [vmem:[%s4155_s22 + $0x28] sm:$0xff] }
  0x17   : > { %3479 = vmatprep.mubr.msk.f32.mxu1 %vm735_vm0, %v4165_v9  ;;  %v4191_v19 = vsub.f32 %v4179_v15, %v690_v16  ;;  %v4196_v20 = vsub.f32 %v4183_v17, %v691_v18  ;;  %v4203_v23 = vld [vmem:[%s4150_s19 + $0x30] sm:$0xff]  ;;  %v4209_v25 = vsub.f32 %v4199_v21, %v692_v22  ;;  %v4217_v27 = vld [vmem:[%s4150_s19 + $0x38] sm:$0xff]  ;;  %v4221_v29 = vld [vmem:[%s4150_s19 + $0x40] sm:$0xff] }
  0x18   : > { %3480 = vmatmul.mubr.msk.f32.vlgmr.msra.gmra.mrb[0].mxu1 %vm735_vm0, %v4173_v13  ;;  %v693_v24 = vld [vmem:[%s4155_s22 + $0x30] sm:$0xff]  ;;  %v694_v28 = vld [vmem:[%s4155_s22 + $0x38] sm:$0xff]  ;;  %v695_v30 = vld [vmem:[%s4155_s22 + $0x40] sm:$0xff] }
  0x19   : > { %3482 = vmatprep.mubr.msk.f32.mxu1 %vm735_vm0, %v4176_v14  ;;  %3821 = vmatpush3.bf16.msra.mxu1 %v3818_v5  ;;  %v4214_v26 = vsub.f32 %v4203_v23, %v693_v24  ;;  %v4227_v31 = vsub.f32 %v4217_v27, %v694_v28  ;;  %v4232_v32 = vsub.f32 %v4221_v29, %v695_v30  ;;  %v4235_v33 = vld [vmem:[%s4150_s19 + $0x48] sm:$0xff]  ;;  %v4239_v35 = vld [vmem:[%s4150_s19 + $0x50] sm:$0xff]  ;;  %v4253_v39 = vld [vmem:[%s4150_s19 + $0x58] sm:$0xff] }
  0x1a   : > { %v696_v34 = vld [vmem:[%s4155_s22 + $0x48] sm:$0xff]  ;;  %v697_v36 = vld [vmem:[%s4155_s22 + $0x50] sm:$0xff]  ;;  %v698_v40 = vld [vmem:[%s4155_s22 + $0x58] sm:$0xff]  ;;  %3827 = vmatprep.subr.bf16.mxu1 %v3826_v59 }
  0x1b   : > { %v4245_v37 = vsub.f32 %v4235_v33, %v696_v34  ;;  %v4250_v38 = vsub.f32 %v4239_v35, %v697_v36  ;;  %v4257_v41 = vld [vmem:[%s4150_s19 + $0x60] sm:$0xff]  ;;  %v4263_v43 = vsub.f32 %v4253_v39, %v698_v40  ;;  %v4271_v45 = vld [vmem:[%s4150_s19 + $0x68] sm:$0xff]  ;;  %v4275_v47 = vld [vmem:[%s4150_s19 + $0x70] sm:$0xff] }
  0x1c   : > { %3483 = vmatmul.mubr.msk.f32.gmra.mrb[2].mxu1 %vm735_vm0, %v4191_v19  ;;  %v699_v42 = vld [vmem:[%s4155_s22 + $0x60] sm:$0xff]  ;;  %v700_v46 = vld [vmem:[%s4155_s22 + $0x68] sm:$0xff]  ;;  %v701_v48 = vld [vmem:[%s4155_s22 + $0x70] sm:$0xff] }
  0x1d   : > { %3485 = vmatprep.mubr.msk.f32.mxu1 %vm735_vm0, %v4196_v20  ;;  %v4268_v44 = vsub.f32 %v4257_v41, %v699_v42  ;;  %v4281_v49 = vsub.f32 %v4271_v45, %v700_v46  ;;  %v4286_v50 = vsub.f32 %v4275_v47, %v701_v48  ;;  %v4289_v51 = vld [vmem:[%s4150_s19 + $0x78] sm:$0xff]  ;;  %v1918_v5 = vld [vmem:[%s4915_s11] sm:$0xff]  ;;  %v1919_v7 = vld [vmem:[%s4915_s11 + $0x8] sm:$0xff]  ;;  %s670_s19 = scalar_lea.vmem %s4922_s18, %s3125_s2 }
  0x1e   : > { %v702_v52 = vld [vmem:[%s4155_s22 + $0x78] sm:$0xff]  ;;  %v4336_v28 = vpack.c.bf16 %v1919_v7, %v1918_v5 }
  0x1f   : > { %v4295_v53 = vsub.f32 %v4289_v51, %v702_v52 }
  0x20   : > { %3486 = vmatmul.mubr.msk.f32.gmra.mrb[4].mxu1 %vm735_vm0, %v4209_v25 }
  0x21   : > { %3488 = vmatprep.mubr.msk.f32.mxu1 %vm735_vm0, %v4214_v26 }
  0x24   : > { %3489 = vmatmul.mubr.msk.f32.gmra.mrb[6].mxu1 %vm735_vm0, %v4227_v31 }
  0x25   : > { %3491 = vmatprep.mubr.msk.f32.mxu1 %vm735_vm0, %v4232_v32 }
  0x28   : > { %3492 = vmatmul.mubr.msk.f32.gmra.mrb[8].mxu1 %vm735_vm0, %v4245_v37 }
  0x29   : > { %3494 = vmatprep.mubr.msk.f32.mxu1 %vm735_vm0, %v4250_v38 }
  0x2c   : > { %3495 = vmatmul.mubr.msk.f32.gmra.mrb[10].mxu1 %vm735_vm0, %v4263_v43 }
  0x2d   : > { %3497 = vmatprep.mubr.msk.f32.mxu1 %vm735_vm0, %v4268_v44 }
  0x30   : > { %3498 = vmatmul.mubr.msk.f32.gmra.mrb[12].mxu1 %vm735_vm0, %v4281_v49 }
  0x31   : > { %3500 = vmatprep.mubr.msk.f32.mxu1 %vm735_vm0, %v4286_v50 }
  0x34   : > { %3501 = vmatmul.mubr.msk.f32.gmra.mrb[14].mxu1 %vm735_vm0, %v4295_v53 }
  0xeb   : > { %v3481_v0 = vpop.f32.mrb[0].mxu1 }
  0xec   : > { %v913_v1 = vadd.f32 %v3481_v0, %v4322_v63  ;;  %v907_v2 = vpop.f32.mrb[1].mxu1 }
  0xed   : > { %v908_v3 = vadd.f32 %v4322_v63, %v907_v2 }
  0xee   : > { %v1003_v4 = vmul.f32 0.02, %v913_v1  ;;  %vm987_vm1 = vcmp.ge.f32.partialorder %v913_v1, 0.0 }
  0xef   : > { %vm986_vm2 = vcmp.ge.f32.partialorder %v908_v3, 0.0  ;;  %v1002_v10 = vmul.f32 0.02, %v908_v3  ;;  %v3484_v12 = vpop.f32.mrb[2].mxu1 }
  0xf0   : > { %v923_v16 = vadd.f32 %v3484_v12, %v4322_v63  ;;  %v917_v18 = vpop.f32.mrb[3].mxu1  ;;  %v4338_v30 = vsel %vm987_vm1, %v913_v1, %v1003_v4 }
  0xf1   : > { %v918_v22 = vadd.f32 %v4322_v63, %v917_v18  ;;  %v4334_v24 = vsel %vm986_vm2, %v908_v3, %v1002_v10  ;;  %vm2066_vm2 = vcmask 64512  }
  0xf2   : > { %v1005_v34 = vmul.f32 0.02, %v923_v16  ;;  %3507 = vmatprep.mubr.msk.f32.mxu1 %vm735_vm0, %v4334_v24  ;;  %3535 = vmatprep.mubr.msk.f32.mxu0 %vm735_vm0, %v4334_v24  ;;  %vm989_vm3 = vcmp.ge.f32.partialorder %v923_v16, 0.0 }
  0xf3   : > { %vm988_vm4 = vcmp.ge.f32.partialorder %v918_v22, 0.0  ;;  %v1004_v36 = vmul.f32 0.02, %v918_v22  ;;  %v3487_v40 = vpop.f32.mrb[4].mxu1  ;;  %3508 = vmatmul.mubr.msk.f32.vlgmr.msra.gmra.mrb[16].mxu1 %vm735_vm0, %v4338_v30  ;;  %3536 = vmatmul.mubr.msk.f32.vlgmr.msra.gmra.mrb[0].mxu0 %vm735_vm0, %v4338_v30 }
  0xf4   : > { %v933_v42 = vadd.f32 %v3487_v40, %v4322_v63  ;;  %3829 = vmatpush3.bf16.msra.mxu1 %v3826_v59  ;;  %v927_v46 = vpop.f32.mrb[5].mxu1  ;;  %3833 = vmatpush3.bf16.msra.mxu0 %v3830_v62  ;;  %v4358_v55 = vsel %vm989_vm3, %v923_v16, %v1005_v34  ;;  %vm2793_vm3 = vcmask 1041409  }
  0xf5   : > { %v928_v48 = vadd.f32 %v4322_v63, %v927_v46  ;;  %v4350_v52 = vsel %vm988_vm4, %v918_v22, %v1004_v36  ;;  %3867 = vmatprep.subr.bf16.mxu1 %v4336_v28  ;;  %vm2795_vm4 = vcmask 1042434  }
  0xf6   : > { %v1007_v54 = vmul.f32 0.02, %v933_v42  ;;  %3510 = vmatprep.mubr.msk.f32.mxu1 %vm735_vm0, %v4350_v52  ;;  %3538 = vmatprep.mubr.msk.f32.mxu0 %vm735_vm0, %v4350_v52  ;;  %vm991_vm5 = vcmp.ge.f32.partialorder %v933_v42, 0.0 }
  0xf7   : > { %vm990_vm6 = vcmp.ge.f32.partialorder %v928_v48, 0.0  ;;  %v1006_v56 = vmul.f32 0.02, %v928_v48  ;;  %v3490_v57 = vpop.f32.mrb[6].mxu1  ;;  %3511 = vmatmul.mubr.msk.f32.gmra.mrb[18].mxu1 %vm735_vm0, %v4358_v55  ;;  %3539 = vmatmul.mubr.msk.f32.gmra.mrb[2].mxu0 %vm735_vm0, %v4358_v55 }
  0xf8   : > { %v943_v58 = vadd.f32 %v3490_v57, %v4322_v63  ;;  %v937_v59 = vpop.f32.mrb[7].mxu1  ;;  %v4372_v0 = vsel %vm991_vm5, %v933_v42, %v1007_v54  ;;  %vm2797_vm5 = vcmask 1043459  }
  0xf9   : > { %v938_v60 = vadd.f32 %v4322_v63, %v937_v59  ;;  %v4366_v61 = vsel %vm990_vm6, %v928_v48, %v1006_v56  ;;  %vm2799_vm6 = vcmask 1044484  }
  0xfa   : > { %v1009_v62 = vmul.f32 0.02, %v943_v58  ;;  %3513 = vmatprep.mubr.msk.f32.mxu1 %vm735_vm0, %v4366_v61  ;;  %3541 = vmatprep.mubr.msk.f32.mxu0 %vm735_vm0, %v4366_v61  ;;  %vm993_vm7 = vcmp.ge.f32.partialorder %v943_v58, 0.0 }
  0xfb   : > { %vm992_vm8 = vcmp.ge.f32.partialorder %v938_v60, 0.0  ;;  %v1008_v1 = vmul.f32 0.02, %v938_v60  ;;  %v3493_v2 = vpop.f32.mrb[8].mxu1  ;;  %3514 = vmatmul.mubr.msk.f32.gmra.mrb[20].mxu1 %vm735_vm0, %v4372_v0  ;;  %3542 = vmatmul.mubr.msk.f32.gmra.mrb[4].mxu0 %vm735_vm0, %v4372_v0 }
  0xfc   : > { %v953_v3 = vadd.f32 %v3493_v2, %v4322_v63  ;;  %v947_v4 = vpop.f32.mrb[9].mxu1  ;;  %v4386_v12 = vsel %vm993_vm7, %v943_v58, %v1009_v62  ;;  %vm2801_vm7 = vcmask 1045509  }
  0xfd   : > { %v948_v5 = vadd.f32 %v4322_v63, %v947_v4  ;;  %v4380_v7 = vsel %vm992_vm8, %v938_v60, %v1008_v1  ;;  %vm2803_vm8 = vcmask 1046534  }
  0xfe   : > { %v1011_v10 = vmul.f32 0.02, %v953_v3  ;;  %3516 = vmatprep.mubr.msk.f32.mxu1 %vm735_vm0, %v4380_v7  ;;  %3544 = vmatprep.mubr.msk.f32.mxu0 %vm735_vm0, %v4380_v7  ;;  %vm995_vm9 = vcmp.ge.f32.partialorder %v953_v3, 0.0 }
  0xff   : > { %vm994_vm10 = vcmp.ge.f32.partialorder %v948_v5, 0.0  ;;  %v1010_v16 = vmul.f32 0.02, %v948_v5  ;;  %v3496_v18 = vpop.f32.mrb[10].mxu1  ;;  %3517 = vmatmul.mubr.msk.f32.gmra.mrb[22].mxu1 %vm735_vm0, %v4386_v12  ;;  %3545 = vmatmul.mubr.msk.f32.gmra.mrb[6].mxu0 %vm735_vm0, %v4386_v12 }
 0x100   : > { %v963_v22 = vadd.f32 %v3496_v18, %v4322_v63  ;;  %v957_v34 = vpop.f32.mrb[11].mxu1  ;;  %v4400_v46 = vsel %vm995_vm9, %v953_v3, %v1011_v10  ;;  %vm2805_vm9 = vcmask 1047559  }
 0x101   : > { %v958_v36 = vadd.f32 %v4322_v63, %v957_v34  ;;  %v4394_v40 = vsel %vm994_vm10, %v948_v5, %v1010_v16  ;;  %vm2976_vm10 = vcmask 1040384  }
 0x102   : > { %v1013_v42 = vmul.f32 0.02, %v963_v22  ;;  %3519 = vmatprep.mubr.msk.f32.mxu1 %vm735_vm0, %v4394_v40  ;;  %3547 = vmatprep.mubr.msk.f32.mxu0 %vm735_vm0, %v4394_v40  ;;  %vm997_vm11 = vcmp.ge.f32.partialorder %v963_v22, 0.0 }
 0x103   : > { %vm996_vm12 = vcmp.ge.f32.partialorder %v958_v36, 0.0  ;;  %v1012_v48 = vmul.f32 0.02, %v958_v36  ;;  %v3499_v54 = vpop.f32.mrb[12].mxu1  ;;  %3520 = vmatmul.mubr.msk.f32.gmra.mrb[24].mxu1 %vm735_vm0, %v4400_v46  ;;  %3548 = vmatmul.mubr.msk.f32.gmra.mrb[8].mxu0 %vm735_vm0, %v4400_v46 }
 0x104   : > { %v973_v56 = vadd.f32 %v3499_v54, %v4322_v63  ;;  %v967_v57 = vpop.f32.mrb[13].mxu1  ;;  %v4414_v62 = vsel %vm997_vm11, %v963_v22, %v1013_v42  ;;  %vm2978_vm11 = vcmask 123904  }
 0x105   : > { %v968_v58 = vadd.f32 %v4322_v63, %v967_v57  ;;  %v4408_v59 = vsel %vm996_vm12, %v958_v36, %v1012_v48 }
 0x106   : > { %v1015_v60 = vmul.f32 0.02, %v973_v56  ;;  %3522 = vmatprep.mubr.msk.f32.mxu1 %vm735_vm0, %v4408_v59  ;;  %3550 = vmatprep.mubr.msk.f32.mxu0 %vm735_vm0, %v4408_v59  ;;  %vm999_vm13 = vcmp.ge.f32.partialorder %v973_v56, 0.0 }
 0x107   : > { %vm998_vm14 = vcmp.ge.f32.partialorder %v968_v58, 0.0  ;;  %v1014_v1 = vmul.f32 0.02, %v968_v58  ;;  %v3502_v2 = vpop.f32.mrb[14].mxu1  ;;  %3523 = vmatmul.mubr.msk.f32.gmra.mrb[26].mxu1 %vm735_vm0, %v4414_v62  ;;  %3551 = vmatmul.mubr.msk.f32.gmra.mrb[10].mxu0 %vm735_vm0, %v4414_v62 }
 0x108   : > { %v983_v3 = vadd.f32 %v3502_v2, %v4322_v63  ;;  %v977_v4 = vpop.f32.mrb[15].mxu1  ;;  %v1031_v18 = vsel %vm999_vm13, %v973_v56, %v1015_v60 }
 0x109   : > { %v978_v5 = vadd.f32 %v4322_v63, %v977_v4  ;;  %v1030_v10 = vsel %vm998_vm14, %v968_v58, %v1014_v1 }
 0x10a   : > { %v1017_v16 = vmul.f32 0.02, %v983_v3  ;;  %3525 = vmatprep.mubr.msk.f32.mxu1 %vm735_vm0, %v1030_v10  ;;  %3553 = vmatprep.mubr.msk.f32.mxu0 %vm735_vm0, %v1030_v10  ;;  %vm1001_vm15 = vcmp.ge.f32.partialorder %v983_v3, 0.0 }
 0x10b   : > { %vm1000_vm1 = vcmp.ge.f32.partialorder %v978_v5, 0.0  ;;  %v1016_v22 = vmul.f32 0.02, %v978_v5  ;;  %3526 = vmatmul.mubr.msk.f32.gmra.mrb[28].mxu1 %vm735_vm0, %v1031_v18  ;;  %3554 = vmatmul.mubr.msk.f32.gmra.mrb[12].mxu0 %vm735_vm0, %v1031_v18 }
 0x10c   : > { %v1033_v63 = vsel %vm1001_vm15, %v983_v3, %v1017_v16 }
 0x10d   : > { %v1032_v34 = vsel %vm1000_vm1, %v978_v5, %v1016_v22 }
 0x10e   : > { %3528 = vmatprep.mubr.msk.f32.mxu1 %vm735_vm0, %v1032_v34  ;;  %3556 = vmatprep.mubr.msk.f32.mxu0 %vm735_vm0, %v1032_v34 }
 0x10f   : > { %3529 = vmatmul.mubr.msk.f32.gmra.mrb[30].mxu1 %vm735_vm0, %v1033_v63  ;;  %3557 = vmatmul.mubr.msk.f32.gmra.mrb[14].mxu0 %vm735_vm0, %v1033_v63 }
 0x110   : > { %3563 = vmatprep.mubr.msk.f32.mxu1 %vm735_vm0, %v4158_v6  ;;  %3591 = vmatprep.mubr.msk.f32.mxu0 %vm735_vm0, %v4158_v6  ;;  %v1594_v6 = vld [vmem:[%s4914_s10] sm:$0xff] }
 0x113   : > { %3564 = vmatmul.mubr.msk.f32.vlgmr.msra.gmra.mrb[32].mxu1 %vm735_vm0, %v4162_v8  ;;  %3592 = vmatmul.mubr.msk.f32.vlgmr.msra.gmra.mrb[16].mxu0 %vm735_vm0, %v4162_v8  ;;  %v1595_v8 = vld [vmem:[%s4914_s10 + $0x8] sm:$0xff] }
 0x114   : > { %3566 = vmatprep.mubr.msk.f32.mxu1 %vm735_vm0, %v4169_v11  ;;  %3869 = vmatpush3.bf16.msra.mxu1 %v4336_v28 }
 0x115   : > { %3594 = vmatprep.mubr.msk.f32.mxu0 %vm735_vm0, %v4169_v11  ;;  %v3834_v11 = vpack.c.bf16 %v1595_v8, %v1594_v6 }
 0x117   : > { %3567 = vmatmul.mubr.msk.f32.gmra.mrb[34].mxu1 %vm735_vm0, %v4179_v15  ;;  %3595 = vmatmul.mubr.msk.f32.gmra.mrb[18].mxu0 %vm735_vm0, %v4179_v15  ;;  %v1596_v15 = vld [vmem:[%s4914_s10 + $0x10] sm:$0xff] }
 0x118   : > { %3569 = vmatprep.mubr.msk.f32.mxu1 %vm735_vm0, %v4183_v17  ;;  %3597 = vmatprep.mubr.msk.f32.mxu0 %vm735_vm0, %v4183_v17  ;;  %v1597_v17 = vld [vmem:[%s4914_s10 + $0x18] sm:$0xff] }
 0x119   : > { %3835 = vmatprep.subr.bf16.mxu0 %v3834_v11 }
 0x11a   : > { %3837 = vmatpush3.bf16.msra.mxu0 %v3834_v11 }
 0x11b   : > { %3570 = vmatmul.mubr.msk.f32.gmra.mrb[36].mxu1 %vm735_vm0, %v4199_v21  ;;  %3598 = vmatmul.mubr.msk.f32.gmra.mrb[20].mxu0 %vm735_vm0, %v4199_v21  ;;  %v3838_v21 = vpack.c.bf16 %v1597_v17, %v1596_v15 }
 0x11c   : > { %3572 = vmatprep.mubr.msk.f32.mxu1 %vm735_vm0, %v4203_v23  ;;  %3600 = vmatprep.mubr.msk.f32.mxu0 %vm735_vm0, %v4203_v23  ;;  %v1598_v23 = vld [vmem:[%s4914_s10 + $0x20] sm:$0xff] }
 0x11d   : > { %3839 = vmatprep.subr.bf16.mxu0 %v3838_v21 }
 0x11e   : > { %3841 = vmatpush3.bf16.msra.mxu0 %v3838_v21 }
 0x11f   : > { %3573 = vmatmul.mubr.msk.f32.gmra.mrb[38].mxu1 %vm735_vm0, %v4217_v27  ;;  %3601 = vmatmul.mubr.msk.f32.gmra.mrb[22].mxu0 %vm735_vm0, %v4217_v27  ;;  %v1599_v27 = vld [vmem:[%s4914_s10 + $0x28] sm:$0xff] }
 0x120   : > { %3575 = vmatprep.mubr.msk.f32.mxu1 %vm735_vm0, %v4221_v29  ;;  %3603 = vmatprep.mubr.msk.f32.mxu0 %vm735_vm0, %v4221_v29  ;;  %v3842_v29 = vpack.c.bf16 %v1599_v27, %v1598_v23 }
 0x122   : > { %3843 = vmatprep.subr.bf16.mxu0 %v3842_v29 }
 0x123   : > { %3576 = vmatmul.mubr.msk.f32.gmra.mrb[40].mxu1 %vm735_vm0, %v4235_v33  ;;  %3604 = vmatmul.mubr.msk.f32.gmra.mrb[24].mxu0 %vm735_vm0, %v4235_v33  ;;  %v1600_v33 = vld [vmem:[%s4914_s10 + $0x30] sm:$0xff] }
 0x124   : > { %3578 = vmatprep.mubr.msk.f32.mxu1 %vm735_vm0, %v4239_v35  ;;  %3606 = vmatprep.mubr.msk.f32.mxu0 %vm735_vm0, %v4239_v35  ;;  %v1601_v35 = vld [vmem:[%s4914_s10 + $0x38] sm:$0xff] }
 0x125   : > { %3845 = vmatpush3.bf16.msra.mxu0 %v3842_v29 }
 0x127   : > { %3579 = vmatmul.mubr.msk.f32.gmra.mrb[42].mxu1 %vm735_vm0, %v4253_v39  ;;  %3607 = vmatmul.mubr.msk.f32.gmra.mrb[26].mxu0 %vm735_vm0, %v4253_v39  ;;  %v3846_v39 = vpack.c.bf16 %v1601_v35, %v1600_v33 }
 0x128   : > { %3581 = vmatprep.mubr.msk.f32.mxu1 %vm735_vm0, %v4257_v41  ;;  %3609 = vmatprep.mubr.msk.f32.mxu0 %vm735_vm0, %v4257_v41  ;;  %v1602_v41 = vld [vmem:[%s4914_s10 + $0x40] sm:$0xff] }
 0x129   : > { %3847 = vmatprep.subr.bf16.mxu0 %v3846_v39 }
 0x12a   : > { %3849 = vmatpush3.bf16.msra.mxu0 %v3846_v39 }
 0x12b   : > { %3582 = vmatmul.mubr.msk.f32.gmra.mrb[44].mxu1 %vm735_vm0, %v4271_v45  ;;  %3610 = vmatmul.mubr.msk.f32.gmra.mrb[28].mxu0 %vm735_vm0, %v4271_v45  ;;  %v1603_v45 = vld [vmem:[%s4914_s10 + $0x48] sm:$0xff] }
 0x12c   : > { %3584 = vmatprep.mubr.msk.f32.mxu1 %vm735_vm0, %v4275_v47  ;;  %3612 = vmatprep.mubr.msk.f32.mxu0 %vm735_vm0, %v4275_v47  ;;  %v3850_v47 = vpack.c.bf16 %v1603_v45, %v1602_v41 }
 0x12e   : > { %3851 = vmatprep.subr.bf16.mxu0 %v3850_v47 }
 0x12f   : > { %3585 = vmatmul.mubr.msk.f32.gmra.mrb[46].mxu1 %vm735_vm0, %v4289_v51  ;;  %3613 = vmatmul.mubr.msk.f32.gmra.mrb[30].mxu0 %vm735_vm0, %v4289_v51  ;;  %v1604_v51 = vld [vmem:[%s4914_s10 + $0x50] sm:$0xff] }
 0x130   : > { %3675 = vmatprep.mubr.msk.f32.mxu1 %vm735_vm0, %v4334_v24  ;;  %3853 = vmatpush3.bf16.msra.mxu0 %v3850_v47  ;;  %v1605_v24 = vld [vmem:[%s4914_s10 + $0x58] sm:$0xff] }
 0x131   : > { %v3854_v28 = vpack.c.bf16 %v1605_v24, %v1604_v51 }
 0x133   : > { %3676 = vmatmul.mubr.msk.f32.vlgmr.msra.gmra.mrb[48].mxu1 %vm735_vm0, %v4338_v30  ;;  %3855 = vmatprep.subr.bf16.mxu0 %v3854_v28  ;;  %v1606_v30 = vld [vmem:[%s4914_s10 + $0x60] sm:$0xff] }
 0x134   : > { %3678 = vmatprep.mubr.msk.f32.mxu1 %vm735_vm0, %v4350_v52  ;;  %3857 = vmatpush3.bf16.msra.mxu0 %v3854_v28  ;;  %v1607_v52 = vld [vmem:[%s4914_s10 + $0x68] sm:$0xff] }
 0x137   : > { %3679 = vmatmul.mubr.msk.f32.gmra.mrb[50].mxu1 %vm735_vm0, %v4358_v55  ;;  %v3858_v55 = vpack.c.bf16 %v1607_v52, %v1606_v30 }
 0x138   : > { %3681 = vmatprep.mubr.msk.f32.mxu1 %vm735_vm0, %v4366_v61  ;;  %v1608_v61 = vld [vmem:[%s4914_s10 + $0x70] sm:$0xff] }
 0x139   : > { %3859 = vmatprep.subr.bf16.mxu0 %v3858_v55 }
 0x13a   : > { %3861 = vmatpush3.bf16.msra.mxu0 %v3858_v55 }
 0x13b   : > { %3682 = vmatmul.mubr.msk.f32.gmra.mrb[52].mxu1 %vm735_vm0, %v4372_v0  ;;  %v1609_v0 = vld [vmem:[%s4914_s10 + $0x78] sm:$0xff] }
 0x13c   : > { %3684 = vmatprep.mubr.msk.f32.mxu1 %vm735_vm0, %v4380_v7  ;;  %v3862_v7 = vpack.c.bf16 %v1609_v0, %v1608_v61 }
 0x13e   : > { %3863 = vmatprep.subr.bf16.mxu0 %v3862_v7 }
 0x13f   : > { %3685 = vmatmul.mubr.msk.f32.gmra.mrb[54].mxu1 %vm735_vm0, %v4386_v12  ;;  %3865 = vmatpush3.bf16.msra.mxu0 %v3862_v7  ;;  %v2065_v12 = vld [vmem:[%s4917_s13] sm:$0xff] }
 0x140   : > { %3687 = vmatprep.mubr.msk.f32.mxu1 %vm735_vm0, %v4394_v40  ;;  %3699 = vmatprep.subr.mxu1 %v2065_v12 }
 0x141   : > { %3700 = vmatpush3.msra.mxu1 %v2065_v12 }
 0x143   : > { %3688 = vmatmul.mubr.msk.f32.gmra.mrb[56].mxu1 %vm735_vm0, %v4400_v46 }
 0x144   : > { %3690 = vmatprep.mubr.msk.f32.mxu1 %vm735_vm0, %v4408_v59 }
 0x147   : > { %3691 = vmatmul.mubr.msk.f32.gmra.mrb[58].mxu1 %vm735_vm0, %v4414_v62 }
 0x148   : > { %3693 = vmatprep.mubr.msk.f32.mxu1 %vm735_vm0, %v1030_v10 }
 0x14b   : > { %3694 = vmatmul.mubr.msk.f32.gmra.mrb[60].mxu1 %vm735_vm0, %v1031_v18 }
 0x14c   : > { %3696 = vmatprep.mubr.msk.f32.mxu1 %vm735_vm0, %v1032_v34 }
 0x14f   : > { %3697 = vmatmul.mubr.msk.f32.gmra.mrb[62].mxu1 %vm735_vm0, %v1033_v63 }
 0x1c6   : > { %v4574_v36 = vpop.f32.mrb[16].mxu1  ;;  %v3537_v40 = vpop.f32.mrb[0].mxu0 }
 0x1c7   : > { %v4576_v42 = vpop.f32.mrb[17].mxu1  ;;  %v1304_v46 = vpop.f32.mrb[1].mxu0 }
 0x1ca   : > { %v4578_v48 = vpop.f32.mrb[18].mxu1  ;;  %v3540_v54 = vpop.f32.mrb[2].mxu0 }
 0x1cb   : > { %v4580_v56 = vpop.f32.mrb[19].mxu1  ;;  %v1314_v57 = vpop.f32.mrb[3].mxu0 }
 0x1ce   : > { %v4582_v58 = vpop.f32.mrb[20].mxu1  ;;  %v3543_v59 = vpop.f32.mrb[4].mxu0 }
 0x1cf   : > { %v4584_v60 = vpop.f32.mrb[21].mxu1  ;;  %v1324_v62 = vpop.f32.mrb[5].mxu0 }
 0x1d2   : > { %v4586_v1 = vpop.f32.mrb[22].mxu1  ;;  %v3546_v2 = vpop.f32.mrb[6].mxu0 }
 0x1d3   : > { %v4588_v3 = vpop.f32.mrb[23].mxu1  ;;  %v1334_v4 = vpop.f32.mrb[7].mxu0 }
 0x1d6   : > { %v4590_v5 = vpop.f32.mrb[24].mxu1  ;;  %v3549_v10 = vpop.f32.mrb[8].mxu0 }
 0x1d7   : > { %v4592_v16 = vpop.f32.mrb[25].mxu1  ;;  %v1344_v18 = vpop.f32.mrb[9].mxu0 }
 0x1da   : > { %v4594_v22 = vpop.f32.mrb[26].mxu1  ;;  %v3552_v34 = vpop.f32.mrb[10].mxu0 }
 0x1db   : > { %v4596_v63 = vpop.f32.mrb[27].mxu1  ;;  %v1354_v6 = vpop.f32.mrb[11].mxu0 }
 0x1de   : > { %v4598_v8 = vpop.f32.mrb[28].mxu1  ;;  %v3555_v11 = vpop.f32.mrb[12].mxu0 }
 0x1df   : > { %v4600_v15 = vpop.f32.mrb[29].mxu1  ;;  %v1364_v17 = vpop.f32.mrb[13].mxu0 }
 0x1e2   : > { %v4602_v21 = vpop.f32.mrb[30].mxu1  ;;  %v3558_v23 = vpop.f32.mrb[14].mxu0 }
 0x1e3   : > { %v4604_v27 = vpop.f32.mrb[31].mxu1  ;;  %v1374_v29 = vpop.f32.mrb[15].mxu0 }
 0x1e6   : > { %v3565_v33 = vpop.f32.mrb[32].mxu1 }
 0x1e7   : > { %v1579_v35 = vmul.f32 %v3565_v33, %v3537_v40  ;;  %v1499_v39 = vpop.f32.mrb[33].mxu1 }
 0x1e8   : > { %v1578_v41 = vmul.f32 %v1499_v39, %v1304_v46 }
 0x1ea   : > { %v3568_v45 = vpop.f32.mrb[34].mxu1  ;;  %3647 = vmatprep.mubr.f32.mxu0 %v1578_v41 }
 0x1eb   : > { %v1581_v47 = vmul.f32 %v3568_v45, %v3540_v54  ;;  %v1509_v51 = vpop.f32.mrb[35].mxu1  ;;  %3648 = vmatmul.mubr.f32.vlgmr.msra.gmra.mrb[16].mxu0 %v1579_v35 }
 0x1ec   : > { %v1580_v24 = vmul.f32 %v1509_v51, %v1314_v57 }
 0x1ee   : > { %v3571_v28 = vpop.f32.mrb[36].mxu1  ;;  %3650 = vmatprep.mubr.f32.mxu0 %v1580_v24 }
 0x1ef   : > { %v1583_v30 = vmul.f32 %v3571_v28, %v3543_v59  ;;  %v1519_v52 = vpop.f32.mrb[37].mxu1  ;;  %3651 = vmatmul.mubr.f32.gmra.mrb[18].mxu0 %v1581_v47 }
 0x1f0   : > { %v1582_v55 = vmul.f32 %v1519_v52, %v1324_v62 }
 0x1f2   : > { %v3574_v61 = vpop.f32.mrb[38].mxu1  ;;  %3653 = vmatprep.mubr.f32.mxu0 %v1582_v55 }
 0x1f3   : > { %v1585_v0 = vmul.f32 %v3574_v61, %v3546_v2  ;;  %v1529_v7 = vpop.f32.mrb[39].mxu1  ;;  %3654 = vmatmul.mubr.f32.gmra.mrb[20].mxu0 %v1583_v30 }
 0x1f4   : > { %v1584_v12 = vmul.f32 %v1529_v7, %v1334_v4 }
 0x1f6   : > { %v3577_v40 = vpop.f32.mrb[40].mxu1  ;;  %3656 = vmatprep.mubr.f32.mxu0 %v1584_v12 }
 0x1f7   : > { %v1587_v46 = vmul.f32 %v3577_v40, %v3549_v10  ;;  %v1539_v33 = vpop.f32.mrb[41].mxu1  ;;  %3657 = vmatmul.mubr.f32.gmra.mrb[22].mxu0 %v1585_v0  ;;  %v2292_v40 = vld [vmem:[%s4916_s12] sm:$0xff] }
 0x1f8   : > { %v1586_v54 = vmul.f32 %v1539_v33, %v1344_v18  ;;  %3725 = vmatprep.subr.mxu0 %v2292_v40  ;;  %v2277_v33 = vld [vmem:[%s4918_s14 + $0x8] sm:$0xff] }
 0x1f9   : > { %3726 = vmatpush3.msra.mxu0 %v2292_v40  ;;  %v2281_v40 = vld [vmem:[%s4918_s14 + $0x28] sm:$0xff] }
 0x1fa   : > { %v3580_v35 = vpop.f32.mrb[42].mxu1  ;;  %3659 = vmatprep.mubr.f32.mxu0 %v1586_v54 }
 0x1fb   : > { %v1589_v57 = vmul.f32 %v3580_v35, %v3552_v34  ;;  %v1549_v39 = vpop.f32.mrb[43].mxu1  ;;  %3660 = vmatmul.mubr.f32.gmra.mrb[24].mxu0 %v1587_v46  ;;  %v2276_v46 = vld [vmem:[%s4918_s14] sm:$0xff] }
 0x1fc   : > { %v1588_v59 = vmul.f32 %v1549_v39, %v1354_v6  ;;  %v3870_v54 = vpack.c.bf16 %v2277_v33, %v2276_v46  ;;  %v4650_v35 = vld [vmem:[%s4910_s6] ss:$0 sm:$0xff] }
 0x1fd   : > { %v1158_v39 = vadd.f32 %v4650_v35, %v4576_v42  ;;  %v1168_v42 = vadd.f32 %v4650_v35, %v4580_v56  ;;  %v1183_v56 = vadd.f32 %v4582_v58, %v4650_v35 }
 0x1fe   : > { %v3583_v41 = vpop.f32.mrb[44].mxu1  ;;  %3662 = vmatprep.mubr.f32.mxu0 %v1588_v59  ;;  %3871 = vmatprep.subr.bf16.mxu0 %v3870_v54 }
 0x1ff   : > { %v1591_v62 = vmul.f32 %v3583_v41, %v3555_v11  ;;  %v1559_v45 = vpop.f32.mrb[45].mxu1  ;;  %3663 = vmatmul.mubr.f32.gmra.mrb[26].mxu0 %v1589_v57  ;;  %v1163_v57 = vadd.f32 %v4574_v36, %v4650_v35  ;;  %v2278_v41 = vld [vmem:[%s4918_s14 + $0x10] sm:$0xff] }
 0x200   : > { %v1590_v2 = vmul.f32 %v1559_v45, %v1364_v17 }
 0x202   : > { %v3586_v47 = vpop.f32.mrb[46].mxu1  ;;  %3665 = vmatprep.mubr.f32.mxu0 %v1590_v2 }
 0x203   : > { %v1593_v4 = vmul.f32 %v3586_v47, %v3558_v23  ;;  %v1569_v51 = vpop.f32.mrb[47].mxu1  ;;  %3666 = vmatmul.mubr.f32.gmra.mrb[28].mxu0 %v1591_v62  ;;  %v2279_v62 = vld [vmem:[%s4918_s14 + $0x18] sm:$0xff] }
 0x204   : > { %v1592_v10 = vmul.f32 %v1569_v51, %v1374_v29  ;;  %v3874_v36 = vpack.c.bf16 %v2279_v62, %v2278_v41  ;;  %v2282_v41 = vld [vmem:[%s4918_s14 + $0x30] sm:$0xff] }
 0x206   : > { %3668 = vmatprep.mubr.f32.mxu0 %v1592_v10  ;;  %v4606_v18 = vpop.f32.mrb[48].mxu1  ;;  %v2280_v10 = vld [vmem:[%s4918_s14 + $0x20] sm:$0xff] }
 0x207   : > { %3669 = vmatmul.mubr.f32.gmra.mrb[30].mxu0 %v1593_v4  ;;  %v4608_v34 = vpop.f32.mrb[49].mxu1  ;;  %v1173_v4 = vadd.f32 %v4578_v48, %v4650_v35 }
 0x20a   : > { %v4610_v24 = vpop.f32.mrb[50].mxu1 }
 0x20b   : > { %v4612_v6 = vpop.f32.mrb[51].mxu1 }
 0x20e   : > { %v4614_v11 = vpop.f32.mrb[52].mxu1 }
 0x20f   : > { %v4616_v28 = vpop.f32.mrb[53].mxu1 }
 0x212   : > { %v4618_v17 = vpop.f32.mrb[54].mxu1 }
 0x213   : > { %v4620_v23 = vpop.f32.mrb[55].mxu1 }
 0x216   : > { %v4622_v30 = vpop.f32.mrb[56].mxu1 }
 0x217   : > { %v4624_v29 = vpop.f32.mrb[57].mxu1 }
 0x21a   : > { %v4626_v52 = vpop.f32.mrb[58].mxu1 }
 0x21b   : > { %v4628_v55 = vpop.f32.mrb[59].mxu1 }
 0x21e   : > { %v4630_v61 = vpop.f32.mrb[60].mxu1 }
 0x21f   : > { %v4632_v0 = vpop.f32.mrb[61].mxu1 }
 0x222   : > { %v4634_v7 = vpop.f32.mrb[62].mxu1 }
 0x223   : > { %v4636_v12 = vpop.f32.mrb[63].mxu1 }
 0x2be   : > { %v3649_v59 = vpop.f32.mrb[16].mxu0 }
 0x2bf   : > { %v1903_v45 = vmul.f32 %v3649_v59, %v1163_v57  ;;  %v1823_v2 = vpop.f32.mrb[17].mxu0  ;;  %v3878_v57 = vpack.c.bf16 %v2281_v40, %v2280_v10  ;;  %v1203_v10 = vadd.f32 %v4590_v5, %v4650_v35 }
 0x2c0   : > { %v1902_v47 = vmul.f32 %v1823_v2, %v1158_v39  ;;  %v1178_v39 = vadd.f32 %v4650_v35, %v4584_v60 }
 0x2c2   : > { %v3652_v51 = vpop.f32.mrb[18].mxu0  ;;  %3701 = vmatprep.mubr.msk.f32.mxu1 %vm2066_vm2, %v1902_v47  ;;  %3727 = vmatprep.mubr.msk.f32.mxu0 %vm2066_vm2, %v1902_v47  ;;  %v1188_v47 = vadd.f32 %v4650_v35, %v4588_v3 }
 0x2c3   : > { %v1905_v46 = vmul.f32 %v3652_v51, %v1173_v4  ;;  %v1833_v33 = vpop.f32.mrb[19].mxu0  ;;  %3702 = vmatmul.mubr.msk.f32.vlgmr.msra.gmra.mrb[64].mxu1 %vm2066_vm2, %v1903_v45  ;;  %3728 = vmatmul.mubr.msk.f32.vlgmr.msra.gmra.mrb[32].mxu0 %vm2066_vm2, %v1903_v45  ;;  %v1193_v45 = vadd.f32 %v4586_v1, %v4650_v35 }
 0x2c4   : > { %v1904_v48 = vmul.f32 %v1833_v33, %v1168_v42  ;;  %3873 = vmatpush3.bf16.msra.mxu0 %v3870_v54  ;;  %v2283_v54 = vld [vmem:[%s4918_s14 + $0x38] sm:$0xff]  ;;  %v2284_v42 = vld [vmem:[%s4918_s14 + $0x40] sm:$0xff] }
 0x2c5   : > { %3875 = vmatprep.subr.bf16.mxu0 %v3874_v36  ;;  %v3882_v2 = vpack.c.bf16 %v2283_v54, %v2282_v41  ;;  %v1208_v41 = vadd.f32 %v4650_v35, %v4596_v63 }
 0x2c6   : > { %v3655_v59 = vpop.f32.mrb[20].mxu0  ;;  %3704 = vmatprep.mubr.msk.f32.mxu1 %vm2066_vm2, %v1904_v48  ;;  %3730 = vmatprep.mubr.msk.f32.mxu0 %vm2066_vm2, %v1904_v48  ;;  %v2286_v48 = vld [vmem:[%s4918_s14 + $0x50] sm:$0xff] }
 0x2c7   : > { %v1907_v62 = vmul.f32 %v3655_v59, %v1183_v56  ;;  %v1843_v58 = vpop.f32.mrb[21].mxu0  ;;  %3705 = vmatmul.mubr.msk.f32.gmra.mrb[66].mxu1 %vm2066_vm2, %v1905_v46  ;;  %3731 = vmatmul.mubr.msk.f32.gmra.mrb[34].mxu0 %vm2066_vm2, %v1905_v46  ;;  %v1198_v46 = vadd.f32 %v4650_v35, %v4592_v16  ;;  %v2287_v56 = vld [vmem:[%s4918_s14 + $0x58] sm:$0xff] }
 0x2c8   : > { %v1906_v60 = vmul.f32 %v1843_v58, %v1178_v39  ;;  %3877 = vmatpush3.bf16.msra.mxu0 %v3874_v36  ;;  %v2285_v36 = vld [vmem:[%s4918_s14 + $0x48] sm:$0xff]  ;;  %v1213_v39 = vadd.f32 %v4594_v22, %v4650_v35  ;;  %v3890_v59 = vpack.c.bf16 %v2287_v56, %v2286_v48  ;;  %v721_v48 = vmul.f32 %v4176_v14, %v4176_v14 }
 0x2c9   : > { %3879 = vmatprep.subr.bf16.mxu0 %v3878_v57  ;;  %v3886_v40 = vpack.c.bf16 %v2285_v36, %v2284_v42  ;;  %v2289_v58 = vld [vmem:[%s4918_s14 + $0x68] sm:$0xff]  ;;  %v722_v56 = vmul.f32 %v4191_v19, %v4191_v19  ;;  %v727_v14 = vmul.f32 %v4232_v32, %v4232_v32  ;;  %v728_v19 = vmul.f32 %v4245_v37, %v4245_v37 }
 0x2ca   : > { %v3658_v4 = vpop.f32.mrb[22].mxu0  ;;  %3707 = vmatprep.mubr.msk.f32.mxu1 %vm2066_vm2, %v1906_v60  ;;  %3733 = vmatprep.mubr.msk.f32.mxu0 %vm2066_vm2, %v1906_v60  ;;  %v729_v37 = vmul.f32 %v4250_v38, %v4250_v38 }
 0x2cb   : > { %v1909_v51 = vmul.f32 %v3658_v4, %v1193_v45  ;;  %v1853_v1 = vpop.f32.mrb[23].mxu0  ;;  %3708 = vmatmul.mubr.msk.f32.gmra.mrb[68].mxu1 %vm2066_vm2, %v1907_v62  ;;  %3734 = vmatmul.mubr.msk.f32.gmra.mrb[36].mxu0 %vm2066_vm2, %v1907_v62  ;;  %v2288_v62 = vld [vmem:[%s4918_s14 + $0x60] sm:$0xff]  ;;  %v1223_v45 = vadd.f32 %v4598_v8, %v4650_v35  ;;  %v1233_v8 = vadd.f32 %v4602_v21, %v4650_v35  ;;  %v2290_v21 = vld [vmem:[%s4918_s14 + $0x70] sm:$0xff]  ;;  %v760_v32 = vsel %vm735_vm0, %v727_v14, 0.0 }
 0x2cc   : > { %v1908_v3 = vmul.f32 %v1853_v1, %v1188_v47  ;;  %3881 = vmatpush3.bf16.msra.mxu0 %v3878_v57  ;;  %v1218_v47 = vadd.f32 %v4650_v35, %v4600_v15  ;;  %v1228_v15 = vadd.f32 %v4650_v35, %v4604_v27  ;;  %v2291_v27 = vld [vmem:[%s4918_s14 + $0x78] sm:$0xff] }
 0x2cd   : > { %3883 = vmatprep.subr.bf16.mxu0 %v3882_v2  ;;  %v3898_v35 = vpack.c.bf16 %v2291_v27, %v2290_v21 }
 0x2ce   : > { %v3661_v33 = vpop.f32.mrb[24].mxu0  ;;  %3710 = vmatprep.mubr.msk.f32.mxu1 %vm2066_vm2, %v1908_v3  ;;  %3736 = vmatprep.mubr.msk.f32.mxu0 %vm2066_vm2, %v1908_v3 }
 0x2cf   : > { %v1911_v57 = vmul.f32 %v3661_v33, %v1203_v10  ;;  %v1863_v5 = vpop.f32.mrb[25].mxu0  ;;  %3711 = vmatmul.mubr.msk.f32.gmra.mrb[70].mxu1 %vm2066_vm2, %v1909_v51  ;;  %3737 = vmatmul.mubr.msk.f32.gmra.mrb[38].mxu0 %vm2066_vm2, %v1909_v51  ;;  %v720_v33 = vmul.f32 %v4173_v13, %v4173_v13 }
 0x2d0   : > { %v1910_v16 = vmul.f32 %v1863_v5, %v1198_v46  ;;  %3885 = vmatpush3.bf16.msra.mxu0 %v3882_v2  ;;  %v3894_v2 = vpack.c.bf16 %v2289_v58, %v2288_v62  ;;  %v719_v46 = vmul.f32 %v4165_v9, %v4165_v9  ;;  %v742_v5 = vsel %vm735_vm0, %v721_v48, 0.0  ;;  %v2857_v9 = vld [vmem:[%s661_s26] sm:$0xff] }
 0x2d1   : > { %3887 = vmatprep.subr.bf16.mxu0 %v3886_v40  ;;  %743 = vadd.xlane.f32.xlu1 %v742_v5  ;;  %v739_v13 = vsel %vm735_vm0, %v720_v33, 0.0 }
 0x2d2   : > { %v3664_v54 = vpop.f32.mrb[26].mxu0  ;;  %3713 = vmatprep.mubr.msk.f32.mxu1 %vm2066_vm2, %v1910_v16  ;;  %3739 = vmatprep.mubr.msk.f32.mxu0 %vm2066_vm2, %v1910_v16  ;;  %v745_v16 = vsel %vm735_vm0, %v722_v56, 0.0 }
 0x2d3   : > { %v1913_v60 = vmul.f32 %v3664_v54, %v1213_v39  ;;  %v1873_v22 = vpop.f32.mrb[27].mxu0  ;;  %3714 = vmatmul.mubr.msk.f32.gmra.mrb[72].mxu1 %vm2066_vm2, %v1911_v57  ;;  %3740 = vmatmul.mubr.msk.f32.gmra.mrb[40].mxu0 %vm2066_vm2, %v1911_v57  ;;  %v736_v57 = vsel %vm735_vm0, %v719_v46, 0.0  ;;  %v2859_v39 = vld [vmem:[%s4919_s15] sm:$0xff]  ;;  %v763_v54 = vsel %vm735_vm0, %v728_v19, 0.0 }
 0x2d4   : > { %v1912_v63 = vmul.f32 %v1873_v22, %v1208_v41  ;;  %3889 = vmatpush3.bf16.msra.mxu0 %v3886_v40  ;;  %737 = vadd.xlane.f32.xlu0 %v736_v57  ;;  %v723_v41 = vmul.f32 %v4196_v20, %v4196_v20  ;;  %v766_v22 = vsel %vm735_vm0, %v729_v37, 0.0  ;;  %v730_v20 = vmul.f32 %v4263_v43, %v4263_v43 }
 0x2d5   : > { %3891 = vmatprep.subr.bf16.mxu0 %v3890_v59  ;;  %746 = vadd.xlane.f32.xlu1 %v745_v16  ;;  %v726_v43 = vmul.f32 %v4227_v31, %v4227_v31 }
 0x2d6   : > { %v3667_v4 = vpop.f32.mrb[28].mxu0  ;;  %3716 = vmatprep.mubr.msk.f32.mxu1 %vm2066_vm2, %v1912_v63  ;;  %3742 = vmatprep.mubr.msk.f32.mxu0 %vm2066_vm2, %v1912_v63  ;;  %v748_v58 = vsel %vm735_vm0, %v723_v41, 0.0  ;;  %v2858_v63 = vld [vmem:[%s661_s26 + $0x8] sm:$0xff] }
 0x2d7   : > { %v1915_v42 = vmul.f32 %v3667_v4, %v1223_v45  ;;  %v1883_v36 = vpop.f32.mrb[29].mxu0  ;;  %3717 = vmatmul.mubr.msk.f32.gmra.mrb[74].mxu1 %vm2066_vm2, %v1913_v60  ;;  %3743 = vmatmul.mubr.msk.f32.gmra.mrb[42].mxu0 %vm2066_vm2, %v1913_v60  ;;  %v724_v60 = vmul.f32 %v4209_v25, %v4209_v25  ;;  %v725_v45 = vmul.f32 %v4214_v26, %v4214_v26  ;;  %v757_v26 = vsel %vm735_vm0, %v726_v43, 0.0 }
 0x2d8   : > { %v1914_v51 = vmul.f32 %v1883_v36, %v1218_v47  ;;  %3893 = vmatpush3.bf16.msra.mxu0 %v3890_v59  ;;  %v2860_v59 = vld [vmem:[%s4919_s15 + $0x8] sm:$0xff]  ;;  %740 = vadd.xlane.f32.xlu0 %v739_v13  ;;  %v731_v47 = vmul.f32 %v4268_v44, %v4268_v44  ;;  %v734_v36 = vmul.f32 %v4295_v53, %v4295_v53 }
 0x2d9   : > { %3895 = vmatprep.subr.bf16.mxu0 %v3894_v2  ;;  %v3902_v62 = vpack.c.bf16 %v2860_v59, %v2859_v39  ;;  %764 = vadd.xlane.f32.xlu1 %v763_v54  ;;  %v751_v38 = vsel %vm735_vm0, %v724_v60, 0.0  ;;  %v754_v25 = vsel %vm735_vm0, %v725_v45, 0.0 }
 0x2da   : > { %v3670_v1 = vpop.f32.mrb[30].mxu0  ;;  %3719 = vmatprep.mubr.msk.f32.mxu1 %vm2066_vm2, %v1914_v51  ;;  %3745 = vmatprep.mubr.msk.f32.mxu0 %vm2066_vm2, %v1914_v51  ;;  %v772_v4 = vsel %vm735_vm0, %v731_v47, 0.0  ;;  %v733_v51 = vmul.f32 %v4286_v50, %v4286_v50  ;;  %v781_v31 = vsel %vm735_vm0, %v734_v36, 0.0 }
 0x2db   : > { %v1917_v3 = vmul.f32 %v3670_v1, %v1233_v8  ;;  %v1893_v10 = vpop.f32.mrb[31].mxu0  ;;  %3720 = vmatmul.mubr.msk.f32.gmra.mrb[76].mxu1 %vm2066_vm2, %v1915_v42  ;;  %3746 = vmatmul.mubr.msk.f32.gmra.mrb[44].mxu0 %vm2066_vm2, %v1915_v42  ;;  %v732_v42 = vmul.f32 %v4281_v49, %v4281_v49 }
 0x2dc   : > { %v1916_v40 = vmul.f32 %v1893_v10, %v1228_v15  ;;  %3897 = vmatpush3.bf16.msra.mxu0 %v3894_v2  ;;  %3903 = vmatprep.subr.bf16.mxu1 %v3902_v62  ;;  %v769_v2 = vsel %vm735_vm0, %v730_v20, 0.0  ;;  %v778_v8 = vsel %vm735_vm0, %v733_v51, 0.0 }
 0x2dd   : > { %3899 = vmatprep.subr.bf16.mxu0 %v3898_v35  ;;  %761 = vadd.xlane.f32.xlu0 %v760_v32  ;;  %v775_v44 = vsel %vm735_vm0, %v732_v42, 0.0 }
 0x2de   : > { %3722 = vmatprep.mubr.msk.f32.mxu1 %vm2066_vm2, %v1916_v40  ;;  %3748 = vmatprep.mubr.msk.f32.mxu0 %vm2066_vm2, %v1916_v40 }
 0x2df   : > { %3723 = vmatmul.mubr.msk.f32.gmra.mrb[78].mxu1 %vm2066_vm2, %v1917_v3  ;;  %3749 = vmatmul.mubr.msk.f32.gmra.mrb[46].mxu0 %vm2066_vm2, %v1917_v3 }
 0x2e0   : > { %3901 = vmatpush3.bf16.msra.mxu0 %v3898_v35  ;;  %3811 = vmatprep.mubr.msk.f32.mxu1 %vm735_vm0, %v2857_v9 }
 0x2e1   : > { %3905 = vmatpush3.bf16.msra.mxu1 %v3902_v62  ;;  %749 = vadd.xlane.f32.xlu0 %v748_v58 }
 0x2e2   : > { %767 = vadd.xlane.f32.xlu1 %v766_v22 }
 0x2e4   : > { %3812 = vmatmul.mubr.msk.f32.vlgmr.msra.gmra.mrb[80].mxu1 %vm735_vm0, %v2858_v63 }
 0x2e5   : > { %752 = vadd.xlane.f32.xlu0 %v751_v38 }
 0x2e6   : > { %770 = vadd.xlane.f32.xlu1 %v769_v2 }
 0x2e9   : > { %755 = vadd.xlane.f32.xlu0 %v754_v25 }
 0x2ea   : > { %773 = vadd.xlane.f32.xlu1 %v772_v4 }
 0x2ed   : > { %758 = vadd.xlane.f32.xlu0 %v757_v26 }
 0x2ee   : > { %776 = vadd.xlane.f32.xlu1 %v775_v44 }
 0x2f1   : > { %779 = vadd.xlane.f32.xlu0 %v778_v8 }
 0x2f2   : > { %782 = vadd.xlane.f32.xlu1 %v781_v31 }
 0x361   : > { %v738_v39 = vpop.xlane.xlu0 %737 }
 0x362   : > { %v2583_v60 = vsub.f32 0.0, %v738_v39 }
 0x364   : > { %v2600_v63 = vmul.f32 0.1, %v2583_v60 }
 0x365   : > { %v741_v59 = vpop.xlane.xlu0 %740 }
 0x366   : > { %v2616_v43 = vmul.f32 1.442695, %v2600_v63 }
 0x36a   : > { %v762_v32 = vpop.xlane.xlu0 %761 }
 0x36e   : > { %v750_v54 = vpop.xlane.xlu0 %749 }
 0x36f   : > { %v2587_v4 = vsub.f32 0.0, %v750_v54 }
 0x371   : > { %v2604_v8 = vmul.f32 0.1, %v2587_v4 }
 0x372   : > { %v753_v62 = vpop.xlane.xlu0 %752 }
 0x373   : > { %v2588_v25 = vsub.f32 0.0, %v753_v62 }
 0x375   : > { %v2605_v36 = vmul.f32 0.1, %v2588_v25 }
 0x376   : > { %v756_v22 = vpop.xlane.xlu0 %755 }
 0x37a   : > { %v759_v42 = vpop.xlane.xlu0 %758 }
 0x37b   : > { %v2590_v51 = vsub.f32 0.0, %v759_v42 }
 0x396   : > { %v3703_v49 = vpop.f32.mrb[64].mxu1 }
 0x397   : > { %v2261_v15 = vmul.f32 %v3703_v49, %v4606_v18  ;;  %v2181_v1 = vpop.f32.mrb[65].mxu1  ;;  %v2589_v49 = vsub.f32 0.0, %v756_v22 }
 0x398   : > { %v2260_v3 = vmul.f32 %v2181_v1, %v4608_v34 }
 0x39a   : > { %v3706_v10 = vpop.f32.mrb[66].mxu1  ;;  %3783 = vmatprep.mubr.f32.mxu0 %v2260_v3 }
 0x39b   : > { %v2263_v53 = vmul.f32 %v3706_v10, %v4610_v24  ;;  %v2191_v40 = vpop.f32.mrb[67].mxu1  ;;  %3784 = vmatmul.mubr.f32.vlgmr.msra.gmra.mrb[32].mxu0 %v2261_v15  ;;  %v2591_v15 = vsub.f32 0.0, %v762_v32  ;;  %v2626_v10 = vmul.f32 1.442695, %v2605_v36 }
 0x39c   : > { %v2262_v50 = vmul.f32 %v2191_v40, %v4612_v6  ;;  %v2607_v40 = vmul.f32 0.1, %v2590_v51 }
 0x39e   : > { %v3709_v21 = vpop.f32.mrb[68].mxu1  ;;  %3786 = vmatprep.mubr.f32.mxu0 %v2262_v50  ;;  %v2624_v50 = vmul.f32 1.442695, %v2604_v8 }
 0x39f   : > { %v2265_v27 = vmul.f32 %v3709_v21, %v4614_v11  ;;  %v2201_v35 = vpop.f32.mrb[69].mxu1  ;;  %3787 = vmatmul.mubr.f32.gmra.mrb[34].mxu0 %v2263_v53  ;;  %v2606_v21 = vmul.f32 0.1, %v2589_v49 }
 0x3a0   : > { %v2264_v46 = vmul.f32 %v2201_v35, %v4616_v28  ;;  %v2608_v35 = vmul.f32 0.1, %v2591_v15 }
 0x3a2   : > { %v3712_v18 = vpop.f32.mrb[70].mxu1  ;;  %3789 = vmatprep.mubr.f32.mxu0 %v2264_v46 }
 0x3a3   : > { %v2267_v34 = vmul.f32 %v3712_v18, %v4618_v17  ;;  %v2211_v33 = vpop.f32.mrb[71].mxu1  ;;  %3790 = vmatmul.mubr.f32.gmra.mrb[36].mxu0 %v2265_v27 }
 0x3a4   : > { %v2266_v24 = vmul.f32 %v2211_v33, %v4620_v23 }
 0x3a6   : > { %v3715_v48 = vpop.f32.mrb[72].mxu1  ;;  %3792 = vmatprep.mubr.f32.mxu0 %v2266_v24  ;;  %v780_v24 = vpop.xlane.xlu0 %779 }
 0x3a7   : > { %v2269_v6 = vmul.f32 %v3715_v48, %v4622_v30  ;;  %v2221_v56 = vpop.f32.mrb[73].mxu1  ;;  %3793 = vmatmul.mubr.f32.gmra.mrb[38].mxu0 %v2267_v34 }
 0x3a8   : > { %v2268_v11 = vmul.f32 %v2221_v56, %v4624_v29  ;;  %v2628_v56 = vmul.f32 1.442695, %v2606_v21 }
 0x3aa   : > { %v3718_v57 = vpop.f32.mrb[74].mxu1  ;;  %3795 = vmatprep.mubr.f32.mxu0 %v2268_v11 }
 0x3ab   : > { %v2271_v28 = vmul.f32 %v3718_v57, %v4626_v52  ;;  %v2231_v5 = vpop.f32.mrb[75].mxu1  ;;  %3796 = vmatmul.mubr.f32.gmra.mrb[40].mxu0 %v2269_v6  ;;  %v2630_v6 = vmul.f32 1.442695, %v2607_v40 }
 0x3ac   : > { %v2270_v17 = vmul.f32 %v2231_v5, %v4628_v55  ;;  %v2632_v5 = vmul.f32 1.442695, %v2608_v35 }
 0x3ae   : > { %v3721_v9 = vpop.f32.mrb[76].mxu1  ;;  %3798 = vmatprep.mubr.f32.mxu0 %v2270_v17 }
 0x3af   : > { %v2273_v23 = vmul.f32 %v3721_v9, %v4630_v61  ;;  %v2241_v13 = vpop.f32.mrb[77].mxu1  ;;  %3799 = vmatmul.mubr.f32.gmra.mrb[42].mxu0 %v2271_v28  ;;  %v744_v61 = vpop.xlane.xlu1 %743  ;;  %v2597_v9 = vsub.f32 0.0, %v780_v24 }
 0x3b0   : > { %v2272_v30 = vmul.f32 %v2241_v13, %v4632_v0  ;;  %v2585_v45 = vsub.f32 0.0, %v744_v61 }
 0x3b2   : > { %v3724_v14 = vpop.f32.mrb[78].mxu1  ;;  %3801 = vmatprep.mubr.f32.mxu0 %v2272_v30  ;;  %v2602_v26 = vmul.f32 0.1, %v2585_v45 }
 0x3b3   : > { %v2275_v29 = vmul.f32 %v3724_v14, %v4634_v7  ;;  %v2251_v16 = vpop.f32.mrb[79].mxu1  ;;  %3802 = vmatmul.mubr.f32.gmra.mrb[44].mxu0 %v2273_v23  ;;  %v747_v41 = vpop.xlane.xlu1 %746  ;;  %v2584_v7 = vsub.f32 0.0, %v741_v59 }
 0x3b4   : > { %v2274_v52 = vmul.f32 %v2251_v16, %v4636_v12  ;;  %v2586_v20 = vsub.f32 0.0, %v747_v41  ;;  %v2620_v1 = vmul.f32 1.442695, %v2602_v26 }
 0x3b5   : > { %v2601_v12 = vmul.f32 0.1, %v2584_v7 }
 0x3b6   : > { %3804 = vmatprep.mubr.f32.mxu0 %v2274_v52  ;;  %v2603_v47 = vmul.f32 0.1, %v2586_v20 }
 0x3b7   : > { %3805 = vmatmul.mubr.f32.gmra.mrb[46].mxu0 %v2275_v29  ;;  %v4836_v19 = vpop.f32.mrb[80].mxu1  ;;  %v765_v0 = vpop.xlane.xlu1 %764  ;;  %v2618_v2 = vmul.f32 1.442695, %v2601_v12 }
 0x3b8   : > { %v4838_v55 = vpop.f32.mrb[81].mxu1  ;;  %v2622_v44 = vmul.f32 1.442695, %v2603_v47  ;;  %v2592_v3 = vsub.f32 0.0, %v765_v0  ;;  %v2614_v0 = vmul.f32 0.1, %v2597_v9 }
 0x3b9   : > { %3963 = vpow2.f32 %v2618_v2 }
 0x3ba   : > { %3965 = vpow2.f32 %v2616_v43  ;;  %v2609_v34 = vmul.f32 0.1, %v2592_v3  ;;  %v2644_v47 = vmul.f32 1.442695, %v2614_v0 }
 0x3bb   : > { %v768_v37 = vpop.xlane.xlu1 %767  ;;  %3967 = vpow2.f32 %v2622_v44 }
 0x3bc   : > { %v2593_v53 = vsub.f32 0.0, %v768_v37  ;;  %3969 = vpow2.f32 %v2620_v1  ;;  %v2634_v13 = vmul.f32 1.442695, %v2609_v34 }
 0x3bd   : > { %3971 = vpow2.f32 %v2626_v10 }
 0x3be   : > { %v2610_v48 = vmul.f32 0.1, %v2593_v53  ;;  %3973 = vpow2.f32 %v2624_v50 }
 0x3bf   : > { %v771_v58 = vpop.xlane.xlu1 %770  ;;  %3975 = vpow2.f32 %v2630_v6 }
 0x3c0   : > { %v2594_v27 = vsub.f32 0.0, %v771_v58  ;;  %v2636_v14 = vmul.f32 1.442695, %v2610_v48  ;;  %3977 = vpow2.f32 %v2628_v56 }
 0x3c1   : > { %3979 = vpow2.f32 %v2632_v5 }
 0x3c2   : > { %v2611_v11 = vmul.f32 0.1, %v2594_v27  ;;  %3981 = vpow2.f32 %v2634_v13 }
 0x3c3   : > { %v774_v38 = vpop.xlane.xlu1 %773  ;;  %v3964_v28 = vpop.eup %3963  ;;  %3983 = vpow2.f32 %v2636_v14 }
 0x3c4   : > { %v2595_v46 = vsub.f32 0.0, %v774_v38  ;;  %v3966_v23 = vpop.eup %3965  ;;  %v2638_v16 = vmul.f32 1.442695, %v2611_v11 }
 0x3c5   : > { %v3968_v59 = vpop.eup %3967 }
 0x3c6   : > { %v2612_v17 = vmul.f32 0.1, %v2595_v46  ;;  %v3970_v60 = vpop.eup %3969  ;;  %3985 = vpow2.f32 %v2638_v16 }
 0x3c7   : > { %v777_v31 = vpop.xlane.xlu1 %776  ;;  %v3972_v38 = vpop.eup %3971 }
 0x3c8   : > { %v2596_v33 = vsub.f32 0.0, %v777_v31  ;;  %v2640_v32 = vmul.f32 1.442695, %v2612_v17  ;;  %v3974_v25 = vpop.eup %3973 }
 0x3c9   : > { %v3976_v15 = vpop.eup %3975 }
 0x3ca   : > { %v2613_v30 = vmul.f32 0.1, %v2596_v33  ;;  %3987 = vpow2.f32 %v2640_v32  ;;  %v3978_v53 = vpop.eup %3977 }
 0x3cb   : > { %v783_v18 = vpop.xlane.xlu1 %782  ;;  %v3980_v27 = vpop.eup %3979 }
 0x3cc   : > { %v2598_v57 = vsub.f32 0.0, %v783_v18  ;;  %v2642_v37 = vmul.f32 1.442695, %v2613_v30  ;;  %v3982_v24 = vpop.eup %3981 }
 0x3ce   : > { %v2615_v61 = vmul.f32 0.1, %v2598_v57  ;;  %3989 = vpow2.f32 %v2642_v37 }
 0x3d0   : > { %v2646_v63 = vmul.f32 1.442695, %v2615_v61 }
 0x3d2   : > { %3991 = vpow2.f32 %v2646_v63 }
 0x3d3   : > { %3993 = vpow2.f32 %v2644_v47 }
 0x46e   : > { %v3785_v29 = vpop.f32.mrb[32].mxu0 }
 0x46f   : > { %v2649_v52 = vmul.f32 %v3964_v28, %v3785_v29  ;;  %v2504_v39 = vpop.f32.mrb[33].mxu0  ;;  %v3984_v28 = vpop.eup %3983 }
 0x470   : > { %v2648_v41 = vmul.f32 %v3966_v23, %v2504_v39  ;;  %v3986_v13 = vpop.eup %3985 }
 0x471   : > { %v2671_v54 = vsel %vm735_vm0, %v2649_v52, 0.0  ;;  %v3988_v52 = vpop.eup %3987 }
 0x472   : > { %v2672_v62 = vrot.slane %v2671_v54, 4  ;;  %v2664_v7 = vsel %vm735_vm0, %v2648_v41, 0.0  ;;  %v3788_v58 = vpop.f32.mrb[34].mxu0  ;;  %v3990_v0 = vpop.eup %3989 }
 0x473   : > { %v2665_v22 = vrot.slane %v2664_v7, 4  ;;  %v2651_v12 = vmul.f32 %v3968_v59, %v3788_v58  ;;  %v2514_v20 = vpop.f32.mrb[35].mxu0 }
 0x474   : > { %v2673_v45 = vadd.f32 %v2672_v62, %v2671_v54  ;;  %v2650_v2 = vmul.f32 %v3970_v60, %v2514_v20  ;;  %v4849_v20 = vpop.eup %3991 }
 0x475   : > { %v2666_v43 = vadd.f32 %v2665_v22, %v2664_v7  ;;  %v2685_v4 = vsel %vm735_vm0, %v2651_v12, 0.0  ;;  %v3994_v47 = vpop.eup %3993 }
 0x476   : > { %v2674_v42 = vrot.slane %v2673_v45, 2  ;;  %v2686_v26 = vrot.slane %v2685_v4, 4  ;;  %v2678_v44 = vsel %vm735_vm0, %v2650_v2, 0.0  ;;  %v3791_v36 = vpop.f32.mrb[36].mxu0 }
 0x477   : > { %v2667_v51 = vrot.slane %v2666_v43, 2  ;;  %v2679_v31 = vrot.slane %v2678_v44, 4  ;;  %v2653_v8 = vmul.f32 %v3972_v38, %v3791_v36  ;;  %v2524_v49 = vpop.f32.mrb[37].mxu0 }
 0x478   : > { %v2675_v1 = vadd.f32 %v2674_v42, %v2673_v45  ;;  %v2687_v3 = vadd.f32 %v2686_v26, %v2685_v4  ;;  %v2652_v10 = vmul.f32 %v3974_v25, %v2524_v49 }
 0x479   : > { %v2668_v40 = vadd.f32 %v2667_v51, %v2666_v43  ;;  %v2680_v50 = vadd.f32 %v2679_v31, %v2678_v44  ;;  %v2699_v21 = vsel %vm735_vm0, %v2653_v8, 0.0 }
 0x47a   : > { %v2676_v35 = vrot.slane %v2675_v1, 1  ;;  %v2688_v46 = vrot.slane %v2687_v3, 2  ;;  %v2700_v18 = vrot.slane %v2699_v21, 4  ;;  %v2692_v34 = vsel %vm735_vm0, %v2652_v10, 0.0  ;;  %v3794_v33 = vpop.f32.mrb[38].mxu0 }
 0x47b   : > { %v2669_v48 = vrot.slane %v2668_v40, 1  ;;  %v2681_v6 = vrot.slane %v2680_v50, 2  ;;  %v2693_v56 = vrot.slane %v2692_v34, 4  ;;  %v2655_v11 = vmul.f32 %v3976_v15, %v3794_v33  ;;  %v2534_v57 = vpop.f32.mrb[39].mxu0 }
 0x47c   : > { %v2677_v5 = vadd.f32 %v2676_v35, %v2675_v1  ;;  %v2689_v17 = vadd.f32 %v2688_v46, %v2687_v3  ;;  %v2701_v9 = vadd.f32 %v2700_v18, %v2699_v21  ;;  %v2654_v23 = vmul.f32 %v3978_v53, %v2534_v57 }
 0x47d   : > { %v2670_v30 = vadd.f32 %v2669_v48, %v2668_v40  ;;  %v2682_v14 = vadd.f32 %v2681_v6, %v2680_v50  ;;  %v2694_v29 = vadd.f32 %v2693_v56, %v2692_v34  ;;  %v2713_v16 = vsel %vm735_vm0, %v2655_v11, 0.0 }
 0x47e   : > { %v2690_v39 = vrot.slane %v2689_v17, 1  ;;  %v2702_v61 = vrot.slane %v2701_v9, 2  ;;  %v2714_v59 = vrot.slane %v2713_v16, 4  ;;  %v2706_v41 = vsel %vm735_vm0, %v2654_v23, 0.0  ;;  %v3797_v32 = vpop.f32.mrb[40].mxu0 }
 0x47f   : > { %v2794_v54 = vsel %vm2793_vm3, %v2677_v5, %v2670_v30  ;;  %v2683_v37 = vrot.slane %v2682_v14, 1  ;;  %v2695_v62 = vrot.slane %v2694_v29, 2  ;;  %v2707_v7 = vrot.slane %v2706_v41, 4  ;;  %v2544_v58 = vpop.f32.mrb[41].mxu0 }
 0x480   : > { %v2703_v60 = vadd.f32 %v2702_v61, %v2701_v9  ;;  %v2715_v22 = vadd.f32 %v2714_v59, %v2713_v16  ;;  %v2657_v12 = vmul.f32 %v3982_v24, %v3797_v32  ;;  %v2656_v2 = vmul.f32 %v3980_v27, %v2544_v58 }
 0x481   : > { %v2684_v63 = vadd.f32 %v2683_v37, %v2682_v14  ;;  %v2696_v38 = vadd.f32 %v2695_v62, %v2694_v29  ;;  %v2708_v45 = vadd.f32 %v2707_v7, %v2706_v41  ;;  %v2691_v25 = vadd.f32 %v2690_v39, %v2689_v17 }
 0x482   : > { %v2704_v43 = vrot.slane %v2703_v60, 1  ;;  %v2716_v4 = vrot.slane %v2715_v22, 2  ;;  %v2727_v42 = vsel %vm735_vm0, %v2657_v12, 0.0  ;;  %v3800_v26 = vpop.f32.mrb[42].mxu0  ;;  %v2720_v1 = vsel %vm735_vm0, %v2656_v2, 0.0 }
 0x483   : > { %v2796_v44 = vsel %vm2795_vm4, %v2684_v63, %v2794_v54  ;;  %v2697_v36 = vrot.slane %v2696_v38, 1  ;;  %v2709_v51 = vrot.slane %v2708_v45, 2  ;;  %v2728_v31 = vrot.slane %v2727_v42, 4  ;;  %v2554_v8 = vpop.f32.mrb[43].mxu0 }
 0x484   : > { %v2798_v49 = vsel %vm2797_vm5, %v2691_v25, %v2796_v44  ;;  %v2717_v15 = vadd.f32 %v2716_v4, %v2715_v22  ;;  %v2721_v40 = vrot.slane %v2720_v1, 4  ;;  %v2705_v50 = vadd.f32 %v2704_v43, %v2703_v60 }
 0x485   : > { %v2698_v3 = vadd.f32 %v2697_v36, %v2696_v38  ;;  %v2710_v10 = vadd.f32 %v2709_v51, %v2708_v45  ;;  %v2729_v53 = vadd.f32 %v2728_v31, %v2727_v42  ;;  %v2659_v27 = vmul.f32 %v3986_v13, %v3800_v26 }
 0x486   : > { %v2718_v21 = vrot.slane %v2717_v15, 1  ;;  %v2658_v35 = vmul.f32 %v3984_v28, %v2554_v8  ;;  %v3803_v46 = vpop.f32.mrb[44].mxu0  ;;  %v2722_v24 = vadd.f32 %v2721_v40, %v2720_v1 }
 0x487   : > { %v2800_v18 = vsel %vm2799_vm6, %v2698_v3, %v2798_v49  ;;  %v2711_v34 = vrot.slane %v2710_v10, 1  ;;  %v2730_v33 = vrot.slane %v2729_v53, 2  ;;  %v2564_v48 = vpop.f32.mrb[45].mxu0  ;;  %v2741_v56 = vsel %vm735_vm0, %v2659_v27, 0.0 }
 0x488   : > { %v2802_v6 = vsel %vm2801_vm7, %v2705_v50, %v2800_v18  ;;  %v2734_v11 = vsel %vm735_vm0, %v2658_v35, 0.0  ;;  %v2723_v17 = vrot.slane %v2722_v24, 2  ;;  %v2742_v9 = vrot.slane %v2741_v56, 4 }
 0x489   : > { %v2712_v57 = vadd.f32 %v2711_v34, %v2710_v10  ;;  %v2731_v5 = vadd.f32 %v2730_v33, %v2729_v53  ;;  %v2719_v23 = vadd.f32 %v2718_v21, %v2717_v15  ;;  %v2735_v28 = vrot.slane %v2734_v11, 4 }
 0x48a   : > { %v2661_v13 = vmul.f32 %v3990_v0, %v3803_v46  ;;  %v2660_v30 = vmul.f32 %v3988_v52, %v2564_v48  ;;  %v3806_v14 = vpop.f32.mrb[46].mxu0  ;;  %v2724_v39 = vadd.f32 %v2723_v17, %v2722_v24  ;;  %v2743_v61 = vadd.f32 %v2742_v9, %v2741_v56 }
 0x48b   : > { %v2804_v29 = vsel %vm2803_vm8, %v2712_v57, %v2802_v6  ;;  %v2732_v16 = vrot.slane %v2731_v5, 1  ;;  %v2574_v59 = vpop.f32.mrb[47].mxu0  ;;  %v2736_v32 = vadd.f32 %v2735_v28, %v2734_v11  ;;  %v2663_v22 = vmul.f32 %v4849_v20, %v3806_v14 }
 0x48c   : > { %v2806_v41 = vsel %vm2805_vm9, %v2719_v23, %v2804_v29  ;;  %v2755_v54 = vsel %vm735_vm0, %v2661_v13, 0.0  ;;  %v2748_v37 = vsel %vm735_vm0, %v2660_v30, 0.0  ;;  %v2725_v7 = vrot.slane %v2724_v39, 1  ;;  %v3258_v13 = vld [vmem:[%s4920_s16] ss:$0 sm:$0xff] }
 0x48d   : > { %2817 = vst.msk [vmem:[#allocation2] sm:$0xff] %vm735_vm0, %v2806_v41  ;;  %v2733_v62 = vadd.f32 %v2732_v16, %v2731_v5  ;;  %v2744_v0 = vrot.slane %v2743_v61, 2  ;;  %v2756_v52 = vrot.slane %v2755_v54, 4  ;;  %v2737_v58 = vrot.slane %v2736_v32, 2 }
 0x48e   : > { %v2749_v60 = vrot.slane %v2748_v37, 4  ;;  %v2662_v12 = vmul.f32 %v3994_v47, %v2574_v59  ;;  %v2726_v63 = vadd.f32 %v2725_v7, %v2724_v39  ;;  %v2769_v43 = vsel %vm735_vm0, %v2663_v22, 0.0 }
 0x48f   : > { %v2745_v38 = vadd.f32 %v2744_v0, %v2743_v61  ;;  %v2757_v45 = vadd.f32 %v2756_v52, %v2755_v54  ;;  %v2738_v2 = vadd.f32 %v2737_v58, %v2736_v32  ;;  %v2770_v36 = vrot.slane %v2769_v43, 4 }
 0x490   : > { %v2750_v25 = vadd.f32 %v2749_v60, %v2748_v37  ;;  %v2762_v4 = vsel %vm735_vm0, %v2662_v12, 0.0  ;;  %v2807_v42 = vsel %vm2793_vm3, %v2733_v62, %v2726_v63 }
 0x491   : > { %v2746_v26 = vrot.slane %v2745_v38, 1  ;;  %v2758_v44 = vrot.slane %v2757_v45, 2  ;;  %v2739_v51 = vrot.slane %v2738_v2, 1  ;;  %v2763_v8 = vrot.slane %v2762_v4, 4 }
 0x492   : > { %v2751_v31 = vrot.slane %v2750_v25, 2  ;;  %v2771_v20 = vadd.f32 %v2770_v36, %v2769_v43 }
 0x493   : > { %v2759_v49 = vadd.f32 %v2758_v44, %v2757_v45  ;;  %v2740_v47 = vadd.f32 %v2739_v51, %v2738_v2  ;;  %v2764_v1 = vadd.f32 %v2763_v8, %v2762_v4  ;;  %v2747_v10 = vadd.f32 %v2746_v26, %v2745_v38 }
 0x494   : > { %v2752_v15 = vadd.f32 %v2751_v31, %v2750_v25  ;;  %v2823_v3 = vld [vmem:[#allocation2] sm:$0xff]  ;;  %v2772_v40 = vrot.slane %v2771_v20, 2 }
 0x495   : > { %v2760_v53 = vrot.slane %v2759_v49, 1  ;;  %2825 = vxpose.xlu0.b32.start [1/2] (short) (narrow) %v2823_v3, 16  ;;  %v2808_v50 = vsel %vm2795_vm4, %v2740_v47, %v2807_v42  ;;  %v2765_v27 = vrot.slane %v2764_v1, 2 }
 0x496   : > { %v2753_v21 = vrot.slane %v2752_v15, 1  ;;  %v2809_v35 = vsel %vm2797_vm5, %v2747_v10, %v2808_v50  ;;  %v2773_v46 = vadd.f32 %v2772_v40, %v2771_v20 }
 0x497   : > { %v2766_v34 = vadd.f32 %v2765_v27, %v2764_v1  ;;  %v2761_v33 = vadd.f32 %v2760_v53, %v2759_v49 }
 0x498   : > { %v2754_v18 = vadd.f32 %v2753_v21, %v2752_v15  ;;  %v2774_v24 = vrot.slane %v2773_v46, 1 }
 0x499   : > { %v2767_v6 = vrot.slane %v2766_v34, 1 }
 0x49a   : > { %v2810_v48 = vsel %vm2799_vm6, %v2754_v18, %v2809_v35  ;;  %v2775_v57 = vadd.f32 %v2774_v24, %v2773_v46 }
 0x49b   : > { %v2811_v56 = vsel %vm2801_vm7, %v2761_v33, %v2810_v48  ;;  %v2768_v11 = vadd.f32 %v2767_v6, %v2766_v34 }
 0x49d   : > { %v2812_v5 = vsel %vm2803_vm8, %v2768_v11, %v2811_v56 }
 0x49e   : > { %v2813_v17 = vsel %vm2805_vm9, %v2775_v57, %v2812_v5 }
 0x49f   : > { %2818 = vst.msk [vmem:[#allocation2 + $0x8] sm:$0xff] %vm735_vm0, %v2813_v17 }
 0x4a6   : > { %v2824_v9 = vld [vmem:[#allocation2 + $0x8] sm:$0xff] }
 0x4a7   : > { %2826 = vxpose.xlu0.b32.end [2/2] (short) (narrow) %v2824_v9, 16 }
 0x523   : > { %v2841_v23 = vpop.trf.xlu0 }
 0x524   : > { %v2934_v28 = vadd.f32 %v4838_v55, %v2841_v23 }
 0x526   : > { %v2943_v30 = vmul.f32 0.11111111, %v2934_v28 }
 0x527   : > { %v2842_v14 = vpop.trf.xlu0 }
 0x528   : > { %v2952_v29 = vadd.f32 %v3258_v13, %v2943_v30  ;;  %v2939_v16 = vadd.f32 %v4836_v19, %v2842_v14 }
 0x52a   : > { %2954 = vst.msk [vmem:[%s666_s25] sm:$0xff] %vm735_vm0, %v2952_v29  ;;  %v2944_v39 = vmul.f32 0.11111111, %v2939_v16  ;;  %v2965_v61 = vmul.f32 %v2952_v29, %v2952_v29  ;;  %v2956_v55 = vsel %vm735_vm0, %v2952_v29, 0.0 }
 0x52c   : > { %v2953_v59 = vadd.f32 %v3258_v13, %v2944_v39  ;;  %v2967_v37 = vsel %vm735_vm0, %v2965_v61, 0.0 }
 0x52e   : > { %2955 = vst.msk [vmem:[%s666_s25 + $0x8] sm:$0xff] %vm735_vm0, %v2953_v59  ;;  %v2957_v41 = vsel %vm735_vm0, %v2953_v59, 0.0  ;;  %v2966_v32 = vmul.f32 %v2953_v59, %v2953_v59 }
 0x52f   : > { %v2958_v54 = vadd.f32 %v2957_v41, %v2956_v55 }
 0x530   : > { %v2968_v62 = vsel %vm735_vm0, %v2966_v32, 0.0 }
 0x531   : > { %v2959_v7 = vrot.slane %v2958_v54, 4  ;;  %v2969_v19 = vadd.f32 %v2968_v62, %v2967_v37 }
 0x533   : > { %v2960_v0 = vadd.f32 %v2959_v7, %v2958_v54  ;;  %v2970_v52 = vrot.slane %v2969_v19, 4 }
 0x535   : > { %v2961_v58 = vrot.slane %v2960_v0, 2  ;;  %v2971_v60 = vadd.f32 %v2970_v52, %v2969_v19 }
 0x537   : > { %v2962_v22 = vadd.f32 %v2961_v58, %v2960_v0  ;;  %v2972_v12 = vrot.slane %v2971_v60, 2 }
 0x539   : > { %v2963_v63 = vrot.slane %v2962_v22, 1  ;;  %v2973_v38 = vadd.f32 %v2972_v12, %v2971_v60 }
 0x53b   : > { %v2974_v45 = vrot.slane %v2973_v38, 1  ;;  %v2964_v2 = vadd.f32 %v2963_v63, %v2962_v22 }
 0x53d   : > { %v2975_v25 = vadd.f32 %v2974_v45, %v2973_v38 }
 0x53f   : > { %v2977_v43 = vsel %vm2976_vm10, %v2964_v2, %v2975_v25 }
 0x540   : > { %2979 = vst.msk [vmem:[%s670_s19] sm:$0x3] %vm2978_vm11, %v2977_v43 }
 0x541 PF: > { %s29_s29 = sadd.s32 1, %s4017_s29   ;;  %s4929_s27 = smov %s4013_s28 }
 0x542   : > { %p26_p5 = scmp.ge.s32.totalorder %s29_s29, 4   ;;  %s4930_s28 = smov %s4932_s30 }
 0x544   :  { %28 = sbr.rel (!%p26_p5) target bundleno = 4 (0x4), region = 141 }

// kernel: _lambda_.27
= control target key start
LH: loop header
LB: loop body
LE: loop exit
PB: predicated region body
PF: predicated region fallthrough
CT: control target
= control target key end

     0   :  { %s5184_s0 = inlined_call_operand.vmem [shape: f32[2,128,16], index: 0, kind: input, shape index: {}]   ;;  %s5185_s1 = inlined_call_operand.vmem [shape: f32[2,128,16], index: 1, kind: input, shape index: {}]   ;;  %s5186_s2 = inlined_call_operand.vmem [shape: f32[2,16,16], index: 2, kind: input, shape index: {}]   ;;  %s5187_s3 = inlined_call_operand.vmem [shape: f32[16,16], index: 3, kind: input, shape index: {}]   ;;  %s5188_s4 = inlined_call_operand.vmem [shape: f32[1,16], index: 4, kind: input, shape index: {}]   ;;  %s5189_s5 = inlined_call_operand.vmem [shape: f32[16,8], index: 5, kind: input, shape index: {}]   ;;  %s5190_s6 = inlined_call_operand.vmem [shape: f32[1,8], index: 6, kind: input, shape index: {}]   ;;  %s5191_s7 = inlined_call_operand.vmem [shape: f32[16,128], index: 7, kind: input, shape index: {}]   ;;  %s5192_s8 = inlined_call_operand.vmem [shape: f32[16,8], index: 8, kind: input, shape index: {}]   ;;  %s5193_s9 = inlined_call_operand.vmem [shape: f32[16,128], index: 9, kind: input, shape index: {}]   ;;  %s5194_s10 = inlined_call_operand.vmem [shape: f32[128,8], index: 10, kind: input, shape index: {}]   ;;  %s5195_s11 = inlined_call_operand.vmem [shape: f32[16,128], index: 11, kind: input, shape index: {}]   ;;  %s5196_s12 = inlined_call_operand.vmem [shape: f32[8,16], index: 12, kind: input, shape index: {}]   ;;  %s5197_s13 = inlined_call_operand.vmem [shape: f32[8,128], index: 13, kind: input, shape index: {}]   ;;  %s5198_s14 = inlined_call_operand.vmem [shape: f32[128,16], index: 14, kind: input, shape index: {}]   ;;  %s5199_s15 = inlined_call_operand.vmem [shape: f32[16,16], index: 15, kind: input, shape index: {}]   ;;  %s5200_s16 = inlined_call_operand.vmem [shape: f32[1,16], index: 16, kind: input, shape index: {}]   ;;  %s5201_s17 = inlined_call_operand.hbm [shape: f32[2,16,16], index: 17, kind: output, shape index: {0}]   ;;  %s5202_s18 = inlined_call_operand.hbm [shape: f32[2,2,16], index: 18, kind: output, shape index: {1}]  }
   0x1   :  { %5207 = sst [smem:[#allocation14_spill]] %s5184_s0 }
   0x2   :  { %5208 = sst [smem:[#allocation15_spill]] %s5185_s1 }
   0x3   :  { %5209 = sst [smem:[#allocation16_spill]] %s5186_s2 }
   0x4   :  { %5210 = sst [smem:[#allocation17_spill]] %s5187_s3 }
   0x5   :  { %24 = vsyncpa [#allocation4], 0 }
   0x6   :  { %26 = vsyncpa [#allocation4 + $0x1], 0 }
   0x7   :  { %27 = vsyncpa [#allocation6], 0 }
   0x8   :  { %29 = vsyncpa [#allocation6 + $0x1], 0  ;;  %s4286_s27 = smov 0   ;;  %s4288_s28 = smov 0  }
   0x9   :  { %s4290_s29 = smov 0   ;;  %s4292_s30 = smov 0  }
   0xa   :  { %s4294_s0 = smov 0   ;;  %s4296_s19 = smov 0  }
   0xb LB: > { %5211 = sst [smem:[#allocation9_spill]] %s4165_s27  ;;  %s3150_s1 = sadd.s32 4294967295, %s4185_s19   ;;  %s4185_s19 = sphi %s4296_s19, %s35_s19   ;;  %s4181_s0 = sphi %s4294_s0, %s5227_s0   ;;  %s4177_s30 = sphi %s4292_s30, %s5226_s30   ;;  %s4173_s29 = sphi %s4290_s29, %s5225_s29   ;;  %s4169_s28 = sphi %s4288_s28, %s5229_s28   ;;  %s4165_s27 = sphi %s4286_s27, %s5228_s27  }
   0xc   : > { %5212 = sst [smem:[#allocation10_spill]] %s4173_s29  ;;  %s3151_s20 = sadd.s32 4294967294, %s4185_s19  }
   0xd   : > { %5213 = sst [smem:[#allocation11_spill]] %s4181_s0  ;;  %s47_s21 = sadd.s32 1, %s4181_s0 }
   0xe   : > { %s430_s22 = sadd.s32 1, %s4173_s29  ;;  %p49_p0 = scmp.ge.s32.totalorder %s47_s21, 2 }
   0xf   : > { %p440_p1 = scmp.ne.s32.totalorder %s4173_s29, %s4169_s28  ;;  %p441_p2 = scmp.eq.s32.totalorder %s3150_s1, 1 }
  0x10   : > { %p446_p3 = scmp.ne.s32.totalorder %s4169_s28, %s4165_s27  ;;  %s5231_s21 = smov (%p49_p0, %s47_s21), 0 }
  0x11   : > { %5214 = sst [smem:[#allocation12_spill]] %s5231_s21  ;;  %p4326_p4 = por %p441_p2, %p440_p1 }
  0x12   : > { %p447_p5 = scmp.eq.s32.totalorder %s3151_s20, 1  ;;  %s427_s23 = ssub.s32 %s4181_s0, %s5231_s21 }
  0x13   : > { %p3154_p6 = scmp.ge.s32.totalorder %s4185_s19, 1  ;;  %p428_p7 = scmp.eq.s32.totalorder %s427_s23, 0 }
  0x14   : > { %p4333_p8 = por %p447_p5, %p446_p3  ;;  %p567_p9 = scmp.lt.s32.totalorder %s4185_s19, 3 }
  0x15   : > { %s4339_s25 = scalar_select %p428_p7, %s4173_s29, %s430_s22  }
  0x16   : > { %p568_p10 = pnand %p3154_p6, %p567_p9 }
  0x17   : > { %5217 = sst [smem:[#allocation13_spill]] %s4339_s25  ;;  %s5218_s3 = sld [smem:[#allocation17_spill]] (!%p568_p10)  ;;  %v1032_v2 = vld [vmem:[%s5189_s5] sm:$0xff] (!%p568_p10)  ;;  %v1033_v4 = vld [vmem:[%s5189_s5 + $0x8] sm:$0xff] (!%p568_p10)  ;;  %vm733_vm0 = vcmask (!%p568_p10), 130048  }
  0x18   : > { %571 = sbr.rel (%p568_p10) target bundleno = 1386 (0x56a), region = 88  ;;  %p645_p11 = scmp.lt.s32.totalorder (!%p568_p10), %s4177_s30, 1  ;;  %v3860_v5 = vpack.c.bf16 (!%p568_p10), %v1033_v4, %v1032_v2  ;;  %v1234_v54 = vld [vmem:[%s5191_s7] sm:$0xff] (!%p568_p10)  ;;  %v1235_v55 = vld [vmem:[%s5191_s7 + $0x8] sm:$0xff] (!%p568_p10) }
  0x19   : > { %s5219_s20 = sld [smem:[#allocation14_spill]] (!%p568_p10)  ;;  %s5220_s23 = sld [smem:[#allocation15_spill]] (!%p568_p10)  ;;  %v3864_v56 = vpack.c.bf16 (!%p568_p10), %v1235_v55, %v1234_v54  ;;  %v1381_v57 = vld [vmem:[%s5193_s9] sm:$0xff] (!%p568_p10)  ;;  %v1382_v58 = vld [vmem:[%s5193_s9 + $0x8] sm:$0xff] (!%p568_p10) }
  0x1a   : > { %v3868_v59 = vpack.c.bf16 (!%p568_p10), %v1382_v58, %v1381_v57  ;;  %v1608_v60 = vld [vmem:[%s5192_s8] sm:$0xff] (!%p568_p10)  ;;  %v1609_v61 = vld [vmem:[%s5192_s8 + $0x8] sm:$0xff] (!%p568_p10)  ;;  %s5221_s22 = sld [smem:[#allocation16_spill]] (!%p568_p10)  ;;  %s3306_s29 = sshll.u32 (!%p568_p10), %s4177_s30, 8 }
  0x1b   : > { %3865 = vmatprep.subr.bf16.mxu0 (!%p568_p10), %v3864_v56  ;;  %v3872_v62 = vpack.c.bf16 (!%p568_p10), %v1609_v61, %v1608_v60  ;;  %v4533_v63 = vld [vmem:[%s5188_s4] ss:$0 sm:$0xff] (!%p568_p10)  ;;  %s5098_s1 = scalar_lea.hbm (!%p568_p10), %s5201_s17, %s3306_s29 }
  0x1c   : > { %3867 = vmatpush3.bf16.msra.mxu0 (!%p568_p10), %v3864_v56 }
  0x1d   : > { %v782_v0 = vld [vmem:[%s5218_s3] sm:$0xff] (!%p568_p10)  ;;  %v783_v1 = vld [vmem:[%s5218_s3 + $0x8] sm:$0xff] (!%p568_p10)  ;;  %3873 = vmatprep.subr.bf16.mxu0 (!%p568_p10), %v3872_v62 }
  0x1e   : > { %v3856_v3 = vpack.c.bf16 (!%p568_p10), %v783_v1, %v782_v0 }
  0x1f   : > { %s4355_s25 = scalar_select %p645_p11, %s4177_s30, 1 }
  0x20   : > { %3857 = vmatprep.subr.bf16.mxu1 %v3856_v3 }
  0x21   : > { %3859 = vmatpush3.bf16.msra.mxu1 %v3856_v3  ;;  %s3303_s26 = sshll.u32 %s4355_s25, 7 }
  0x22   : > { %s4361_s3 = scalar_lea.vmem %s5219_s20, %s3303_s26  ;;  %s4366_s0 = scalar_lea.vmem %s5220_s23, %s3303_s26  ;;  %3861 = vmatprep.subr.bf16.mxu1 %v3860_v5 }
  0x23   : > { %v4369_v6 = vld [vmem:[%s4361_s3] sm:$0xff]  ;;  %v4373_v8 = vld [vmem:[%s4361_s3 + $0x8] sm:$0xff]  ;;  %v4380_v11 = vld [vmem:[%s4361_s3 + $0x10] sm:$0xff]  ;;  %s3305_s23 = sshll.u32 %s4355_s25, 4  ;;  %s5085_s20 = sand.u32 1, %s4169_s28  }
  0x24   : > { %v685_v7 = vld [vmem:[%s4366_s0] sm:$0xff]  ;;  %v686_v10 = vld [vmem:[%s4366_s0 + $0x8] sm:$0xff]  ;;  %v687_v12 = vld [vmem:[%s4366_s0 + $0x10] sm:$0xff]  ;;  %s668_s26 = scalar_lea.vmem %s5221_s22, %s3305_s23  ;;  %s3155_s21 = sshll.u32 %s5085_s20, 4 }
  0x25   : > { %v4376_v9 = vsub.f32 %v4369_v6, %v685_v7  ;;  %v4384_v13 = vsub.f32 %v4373_v8, %v686_v10  ;;  %v4387_v14 = vsub.f32 %v4380_v11, %v687_v12  ;;  %v4390_v15 = vld [vmem:[%s4361_s3 + $0x18] sm:$0xff]  ;;  %v4394_v17 = vld [vmem:[%s4361_s3 + $0x20] sm:$0xff]  ;;  %v4410_v21 = vld [vmem:[%s4361_s3 + $0x28] sm:$0xff]  ;;  %s636_s22 = scalar_lea.vmem [#allocation3], %s3155_s21  ;;  %s4187_s23 = smov [#allocation3]  }
  0x26   : > { %v688_v16 = vld [vmem:[%s4366_s0 + $0x18] sm:$0xff]  ;;  %v689_v18 = vld [vmem:[%s4366_s0 + $0x20] sm:$0xff]  ;;  %v690_v22 = vld [vmem:[%s4366_s0 + $0x28] sm:$0xff] }
  0x27   : > { %3521 = vmatprep.mubr.msk.f32.mxu1 %vm733_vm0, %v4376_v9  ;;  %v4402_v19 = vsub.f32 %v4390_v15, %v688_v16  ;;  %v4407_v20 = vsub.f32 %v4394_v17, %v689_v18  ;;  %v4414_v23 = vld [vmem:[%s4361_s3 + $0x30] sm:$0xff]  ;;  %v4420_v25 = vsub.f32 %v4410_v21, %v690_v22  ;;  %v4428_v27 = vld [vmem:[%s4361_s3 + $0x38] sm:$0xff]  ;;  %v4432_v29 = vld [vmem:[%s4361_s3 + $0x40] sm:$0xff] }
  0x28   : > { %3522 = vmatmul.mubr.msk.f32.vlgmr.msra.gmra.mrb[0].mxu1 %vm733_vm0, %v4384_v13  ;;  %v691_v24 = vld [vmem:[%s4366_s0 + $0x30] sm:$0xff]  ;;  %v692_v28 = vld [vmem:[%s4366_s0 + $0x38] sm:$0xff]  ;;  %v693_v30 = vld [vmem:[%s4366_s0 + $0x40] sm:$0xff] }
  0x29   : > { %3524 = vmatprep.mubr.msk.f32.mxu1 %vm733_vm0, %v4387_v14  ;;  %3863 = vmatpush3.bf16.msra.mxu1 %v3860_v5  ;;  %v4425_v26 = vsub.f32 %v4414_v23, %v691_v24  ;;  %v4438_v31 = vsub.f32 %v4428_v27, %v692_v28  ;;  %v4443_v32 = vsub.f32 %v4432_v29, %v693_v30  ;;  %v4446_v33 = vld [vmem:[%s4361_s3 + $0x48] sm:$0xff]  ;;  %v4450_v35 = vld [vmem:[%s4361_s3 + $0x50] sm:$0xff]  ;;  %v4464_v39 = vld [vmem:[%s4361_s3 + $0x58] sm:$0xff] }
  0x2a   : > { %v694_v34 = vld [vmem:[%s4366_s0 + $0x48] sm:$0xff]  ;;  %v695_v36 = vld [vmem:[%s4366_s0 + $0x50] sm:$0xff]  ;;  %v696_v40 = vld [vmem:[%s4366_s0 + $0x58] sm:$0xff]  ;;  %3869 = vmatprep.subr.bf16.mxu1 %v3868_v59 }
  0x2b   : > { %v4456_v37 = vsub.f32 %v4446_v33, %v694_v34  ;;  %v4461_v38 = vsub.f32 %v4450_v35, %v695_v36  ;;  %v4468_v41 = vld [vmem:[%s4361_s3 + $0x60] sm:$0xff]  ;;  %v4474_v43 = vsub.f32 %v4464_v39, %v696_v40  ;;  %v4482_v45 = vld [vmem:[%s4361_s3 + $0x68] sm:$0xff]  ;;  %v4486_v47 = vld [vmem:[%s4361_s3 + $0x70] sm:$0xff] }
  0x2c   : > { %3525 = vmatmul.mubr.msk.f32.gmra.mrb[2].mxu1 %vm733_vm0, %v4402_v19  ;;  %v697_v42 = vld [vmem:[%s4366_s0 + $0x60] sm:$0xff]  ;;  %v698_v46 = vld [vmem:[%s4366_s0 + $0x68] sm:$0xff]  ;;  %v699_v48 = vld [vmem:[%s4366_s0 + $0x70] sm:$0xff] }
  0x2d   : > { %3527 = vmatprep.mubr.msk.f32.mxu1 %vm733_vm0, %v4407_v20  ;;  %v4479_v44 = vsub.f32 %v4468_v41, %v697_v42  ;;  %v4492_v49 = vsub.f32 %v4482_v45, %v698_v46  ;;  %v4497_v50 = vsub.f32 %v4486_v47, %v699_v48  ;;  %v4500_v51 = vld [vmem:[%s4361_s3 + $0x78] sm:$0xff]  ;;  %v1916_v5 = vld [vmem:[%s5195_s11] sm:$0xff]  ;;  %v1917_v7 = vld [vmem:[%s5195_s11 + $0x8] sm:$0xff] }
  0x2e   : > { %v700_v52 = vld [vmem:[%s4366_s0 + $0x78] sm:$0xff]  ;;  %v4547_v28 = vpack.c.bf16 %v1917_v7, %v1916_v5  ;;  %s4079_s0 = sshll.u32 %s4187_s23, 4  ;;  %s4080_s0 = int_to_ptr.vmem [resolvable:$false] %s4079_s0 }
  0x2f   : > { %v4506_v53 = vsub.f32 %v4500_v51, %v700_v52  ;;  %s4081_s29 = scalar_lea.vmem %s4080_s0, 512 }
  0x30   : > { %3528 = vmatmul.mubr.msk.f32.gmra.mrb[4].mxu1 %vm733_vm0, %v4420_v25 }
  0x31   : > { %3530 = vmatprep.mubr.msk.f32.mxu1 %vm733_vm0, %v4425_v26 }
  0x34   : > { %3531 = vmatmul.mubr.msk.f32.gmra.mrb[6].mxu1 %vm733_vm0, %v4438_v31 }
  0x35   : > { %3533 = vmatprep.mubr.msk.f32.mxu1 %vm733_vm0, %v4443_v32 }
  0x38   : > { %3534 = vmatmul.mubr.msk.f32.gmra.mrb[8].mxu1 %vm733_vm0, %v4456_v37 }
  0x39   : > { %3536 = vmatprep.mubr.msk.f32.mxu1 %vm733_vm0, %v4461_v38 }
  0x3c   : > { %3537 = vmatmul.mubr.msk.f32.gmra.mrb[10].mxu1 %vm733_vm0, %v4474_v43 }
  0x3d   : > { %3539 = vmatprep.mubr.msk.f32.mxu1 %vm733_vm0, %v4479_v44 }
  0x40   : > { %3540 = vmatmul.mubr.msk.f32.gmra.mrb[12].mxu1 %vm733_vm0, %v4492_v49 }
  0x41   : > { %3542 = vmatprep.mubr.msk.f32.mxu1 %vm733_vm0, %v4497_v50 }
  0x44   : > { %3543 = vmatmul.mubr.msk.f32.gmra.mrb[14].mxu1 %vm733_vm0, %v4506_v53 }
  0xfb   : > { %v3523_v0 = vpop.f32.mrb[0].mxu1 }
  0xfc   : > { %v911_v1 = vadd.f32 %v3523_v0, %v4533_v63  ;;  %v905_v2 = vpop.f32.mrb[1].mxu1 }
  0xfd   : > { %v906_v3 = vadd.f32 %v4533_v63, %v905_v2 }
  0xfe   : > { %v1001_v4 = vmul.f32 0.02, %v911_v1  ;;  %vm985_vm1 = vcmp.ge.f32.partialorder %v911_v1, 0.0 }
  0xff   : > { %vm984_vm2 = vcmp.ge.f32.partialorder %v906_v3, 0.0  ;;  %v1000_v10 = vmul.f32 0.02, %v906_v3  ;;  %v3526_v12 = vpop.f32.mrb[2].mxu1 }
 0x100   : > { %v921_v16 = vadd.f32 %v3526_v12, %v4533_v63  ;;  %v915_v18 = vpop.f32.mrb[3].mxu1  ;;  %v4549_v30 = vsel %vm985_vm1, %v911_v1, %v1001_v4 }
 0x101   : > { %v916_v22 = vadd.f32 %v4533_v63, %v915_v18  ;;  %v4545_v24 = vsel %vm984_vm2, %v906_v3, %v1000_v10  ;;  %vm2064_vm2 = vcmask 64512  }
 0x102   : > { %v1003_v34 = vmul.f32 0.02, %v921_v16  ;;  %3549 = vmatprep.mubr.msk.f32.mxu1 %vm733_vm0, %v4545_v24  ;;  %3577 = vmatprep.mubr.msk.f32.mxu0 %vm733_vm0, %v4545_v24  ;;  %vm987_vm3 = vcmp.ge.f32.partialorder %v921_v16, 0.0 }
 0x103   : > { %vm986_vm4 = vcmp.ge.f32.partialorder %v916_v22, 0.0  ;;  %v1002_v36 = vmul.f32 0.02, %v916_v22  ;;  %v3529_v40 = vpop.f32.mrb[4].mxu1  ;;  %3550 = vmatmul.mubr.msk.f32.vlgmr.msra.gmra.mrb[16].mxu1 %vm733_vm0, %v4549_v30  ;;  %3578 = vmatmul.mubr.msk.f32.vlgmr.msra.gmra.mrb[0].mxu0 %vm733_vm0, %v4549_v30 }
 0x104   : > { %v931_v42 = vadd.f32 %v3529_v40, %v4533_v63  ;;  %3871 = vmatpush3.bf16.msra.mxu1 %v3868_v59  ;;  %v925_v46 = vpop.f32.mrb[5].mxu1  ;;  %3875 = vmatpush3.bf16.msra.mxu0 %v3872_v62  ;;  %v4569_v55 = vsel %vm987_vm3, %v921_v16, %v1003_v34  ;;  %vm2791_vm3 = vcmask 1041409  }
 0x105   : > { %v926_v48 = vadd.f32 %v4533_v63, %v925_v46  ;;  %v4561_v52 = vsel %vm986_vm4, %v916_v22, %v1002_v36  ;;  %3909 = vmatprep.subr.bf16.mxu1 %v4547_v28  ;;  %vm2793_vm4 = vcmask 1042434  }
 0x106   : > { %v1005_v54 = vmul.f32 0.02, %v931_v42  ;;  %3552 = vmatprep.mubr.msk.f32.mxu1 %vm733_vm0, %v4561_v52  ;;  %3580 = vmatprep.mubr.msk.f32.mxu0 %vm733_vm0, %v4561_v52  ;;  %vm989_vm5 = vcmp.ge.f32.partialorder %v931_v42, 0.0 }
 0x107   : > { %vm988_vm6 = vcmp.ge.f32.partialorder %v926_v48, 0.0  ;;  %v1004_v56 = vmul.f32 0.02, %v926_v48  ;;  %v3532_v57 = vpop.f32.mrb[6].mxu1  ;;  %3553 = vmatmul.mubr.msk.f32.gmra.mrb[18].mxu1 %vm733_vm0, %v4569_v55  ;;  %3581 = vmatmul.mubr.msk.f32.gmra.mrb[2].mxu0 %vm733_vm0, %v4569_v55 }
 0x108   : > { %v941_v58 = vadd.f32 %v3532_v57, %v4533_v63  ;;  %v935_v59 = vpop.f32.mrb[7].mxu1  ;;  %v4583_v0 = vsel %vm989_vm5, %v931_v42, %v1005_v54  ;;  %vm2795_vm5 = vcmask 1043459  }
 0x109   : > { %v936_v60 = vadd.f32 %v4533_v63, %v935_v59  ;;  %v4577_v61 = vsel %vm988_vm6, %v926_v48, %v1004_v56  ;;  %vm2797_vm6 = vcmask 1044484  }
 0x10a   : > { %v1007_v62 = vmul.f32 0.02, %v941_v58  ;;  %3555 = vmatprep.mubr.msk.f32.mxu1 %vm733_vm0, %v4577_v61  ;;  %3583 = vmatprep.mubr.msk.f32.mxu0 %vm733_vm0, %v4577_v61  ;;  %vm991_vm7 = vcmp.ge.f32.partialorder %v941_v58, 0.0 }
 0x10b   : > { %vm990_vm8 = vcmp.ge.f32.partialorder %v936_v60, 0.0  ;;  %v1006_v1 = vmul.f32 0.02, %v936_v60  ;;  %v3535_v2 = vpop.f32.mrb[8].mxu1  ;;  %3556 = vmatmul.mubr.msk.f32.gmra.mrb[20].mxu1 %vm733_vm0, %v4583_v0  ;;  %3584 = vmatmul.mubr.msk.f32.gmra.mrb[4].mxu0 %vm733_vm0, %v4583_v0 }
 0x10c   : > { %v951_v3 = vadd.f32 %v3535_v2, %v4533_v63  ;;  %v945_v4 = vpop.f32.mrb[9].mxu1  ;;  %v4597_v12 = vsel %vm991_vm7, %v941_v58, %v1007_v62  ;;  %vm2799_vm7 = vcmask 1045509  }
 0x10d   : > { %v946_v5 = vadd.f32 %v4533_v63, %v945_v4  ;;  %v4591_v7 = vsel %vm990_vm8, %v936_v60, %v1006_v1  ;;  %vm2801_vm8 = vcmask 1046534  }
 0x10e   : > { %v1009_v10 = vmul.f32 0.02, %v951_v3  ;;  %3558 = vmatprep.mubr.msk.f32.mxu1 %vm733_vm0, %v4591_v7  ;;  %3586 = vmatprep.mubr.msk.f32.mxu0 %vm733_vm0, %v4591_v7  ;;  %vm993_vm9 = vcmp.ge.f32.partialorder %v951_v3, 0.0 }
 0x10f   : > { %vm992_vm10 = vcmp.ge.f32.partialorder %v946_v5, 0.0  ;;  %v1008_v16 = vmul.f32 0.02, %v946_v5  ;;  %v3538_v18 = vpop.f32.mrb[10].mxu1  ;;  %3559 = vmatmul.mubr.msk.f32.gmra.mrb[22].mxu1 %vm733_vm0, %v4597_v12  ;;  %3587 = vmatmul.mubr.msk.f32.gmra.mrb[6].mxu0 %vm733_vm0, %v4597_v12 }
 0x110   : > { %v961_v22 = vadd.f32 %v3538_v18, %v4533_v63  ;;  %v955_v34 = vpop.f32.mrb[11].mxu1  ;;  %v4611_v46 = vsel %vm993_vm9, %v951_v3, %v1009_v10  ;;  %vm2803_vm9 = vcmask 1047559  }
 0x111   : > { %v956_v36 = vadd.f32 %v4533_v63, %v955_v34  ;;  %v4605_v40 = vsel %vm992_vm10, %v946_v5, %v1008_v16 }
 0x112   : > { %v1011_v42 = vmul.f32 0.02, %v961_v22  ;;  %3561 = vmatprep.mubr.msk.f32.mxu1 %vm733_vm0, %v4605_v40  ;;  %3589 = vmatprep.mubr.msk.f32.mxu0 %vm733_vm0, %v4605_v40  ;;  %vm995_vm11 = vcmp.ge.f32.partialorder %v961_v22, 0.0 }
 0x113   : > { %vm994_vm12 = vcmp.ge.f32.partialorder %v956_v36, 0.0  ;;  %v1010_v48 = vmul.f32 0.02, %v956_v36  ;;  %v3541_v54 = vpop.f32.mrb[12].mxu1  ;;  %3562 = vmatmul.mubr.msk.f32.gmra.mrb[24].mxu1 %vm733_vm0, %v4611_v46  ;;  %3590 = vmatmul.mubr.msk.f32.gmra.mrb[8].mxu0 %vm733_vm0, %v4611_v46 }
 0x114   : > { %v971_v56 = vadd.f32 %v3541_v54, %v4533_v63  ;;  %v965_v57 = vpop.f32.mrb[13].mxu1  ;;  %v4625_v62 = vsel %vm995_vm11, %v961_v22, %v1011_v42 }
 0x115   : > { %v966_v58 = vadd.f32 %v4533_v63, %v965_v57  ;;  %v4619_v59 = vsel %vm994_vm12, %v956_v36, %v1010_v48 }
 0x116   : > { %v1013_v60 = vmul.f32 0.02, %v971_v56  ;;  %3564 = vmatprep.mubr.msk.f32.mxu1 %vm733_vm0, %v4619_v59  ;;  %3592 = vmatprep.mubr.msk.f32.mxu0 %vm733_vm0, %v4619_v59  ;;  %vm997_vm13 = vcmp.ge.f32.partialorder %v971_v56, 0.0 }
 0x117   : > { %vm996_vm14 = vcmp.ge.f32.partialorder %v966_v58, 0.0  ;;  %v1012_v1 = vmul.f32 0.02, %v966_v58  ;;  %v3544_v2 = vpop.f32.mrb[14].mxu1  ;;  %3565 = vmatmul.mubr.msk.f32.gmra.mrb[26].mxu1 %vm733_vm0, %v4625_v62  ;;  %3593 = vmatmul.mubr.msk.f32.gmra.mrb[10].mxu0 %vm733_vm0, %v4625_v62 }
 0x118   : > { %v981_v3 = vadd.f32 %v3544_v2, %v4533_v63  ;;  %v975_v4 = vpop.f32.mrb[15].mxu1  ;;  %v1029_v18 = vsel %vm997_vm13, %v971_v56, %v1013_v60 }
 0x119   : > { %v976_v5 = vadd.f32 %v4533_v63, %v975_v4  ;;  %v1028_v10 = vsel %vm996_vm14, %v966_v58, %v1012_v1 }
 0x11a   : > { %v1015_v16 = vmul.f32 0.02, %v981_v3  ;;  %3567 = vmatprep.mubr.msk.f32.mxu1 %vm733_vm0, %v1028_v10  ;;  %3595 = vmatprep.mubr.msk.f32.mxu0 %vm733_vm0, %v1028_v10  ;;  %vm999_vm15 = vcmp.ge.f32.partialorder %v981_v3, 0.0 }
 0x11b   : > { %vm998_vm1 = vcmp.ge.f32.partialorder %v976_v5, 0.0  ;;  %v1014_v22 = vmul.f32 0.02, %v976_v5  ;;  %3568 = vmatmul.mubr.msk.f32.gmra.mrb[28].mxu1 %vm733_vm0, %v1029_v18  ;;  %3596 = vmatmul.mubr.msk.f32.gmra.mrb[12].mxu0 %vm733_vm0, %v1029_v18 }
 0x11c   : > { %v1031_v63 = vsel %vm999_vm15, %v981_v3, %v1015_v16 }
 0x11d   : > { %v1030_v34 = vsel %vm998_vm1, %v976_v5, %v1014_v22 }
 0x11e   : > { %3570 = vmatprep.mubr.msk.f32.mxu1 %vm733_vm0, %v1030_v34  ;;  %3598 = vmatprep.mubr.msk.f32.mxu0 %vm733_vm0, %v1030_v34 }
 0x11f   : > { %3571 = vmatmul.mubr.msk.f32.gmra.mrb[30].mxu1 %vm733_vm0, %v1031_v63  ;;  %3599 = vmatmul.mubr.msk.f32.gmra.mrb[14].mxu0 %vm733_vm0, %v1031_v63 }
 0x120   : > { %3605 = vmatprep.mubr.msk.f32.mxu1 %vm733_vm0, %v4369_v6  ;;  %3633 = vmatprep.mubr.msk.f32.mxu0 %vm733_vm0, %v4369_v6  ;;  %v1592_v6 = vld [vmem:[%s5194_s10] sm:$0xff] }
 0x123   : > { %3606 = vmatmul.mubr.msk.f32.vlgmr.msra.gmra.mrb[32].mxu1 %vm733_vm0, %v4373_v8  ;;  %3634 = vmatmul.mubr.msk.f32.vlgmr.msra.gmra.mrb[16].mxu0 %vm733_vm0, %v4373_v8  ;;  %v1593_v8 = vld [vmem:[%s5194_s10 + $0x8] sm:$0xff] }
 0x124   : > { %3608 = vmatprep.mubr.msk.f32.mxu1 %vm733_vm0, %v4380_v11  ;;  %3911 = vmatpush3.bf16.msra.mxu1 %v4547_v28 }
 0x125   : > { %3636 = vmatprep.mubr.msk.f32.mxu0 %vm733_vm0, %v4380_v11  ;;  %v3876_v11 = vpack.c.bf16 %v1593_v8, %v1592_v6 }
 0x127   : > { %3609 = vmatmul.mubr.msk.f32.gmra.mrb[34].mxu1 %vm733_vm0, %v4390_v15  ;;  %3637 = vmatmul.mubr.msk.f32.gmra.mrb[18].mxu0 %vm733_vm0, %v4390_v15  ;;  %v1594_v15 = vld [vmem:[%s5194_s10 + $0x10] sm:$0xff] }
 0x128   : > { %3611 = vmatprep.mubr.msk.f32.mxu1 %vm733_vm0, %v4394_v17  ;;  %3639 = vmatprep.mubr.msk.f32.mxu0 %vm733_vm0, %v4394_v17  ;;  %v1595_v17 = vld [vmem:[%s5194_s10 + $0x18] sm:$0xff] }
 0x129   : > { %3877 = vmatprep.subr.bf16.mxu0 %v3876_v11 }
 0x12a   : > { %3879 = vmatpush3.bf16.msra.mxu0 %v3876_v11 }
 0x12b   : > { %3612 = vmatmul.mubr.msk.f32.gmra.mrb[36].mxu1 %vm733_vm0, %v4410_v21  ;;  %3640 = vmatmul.mubr.msk.f32.gmra.mrb[20].mxu0 %vm733_vm0, %v4410_v21  ;;  %v3880_v21 = vpack.c.bf16 %v1595_v17, %v1594_v15 }
 0x12c   : > { %3614 = vmatprep.mubr.msk.f32.mxu1 %vm733_vm0, %v4414_v23  ;;  %3642 = vmatprep.mubr.msk.f32.mxu0 %vm733_vm0, %v4414_v23  ;;  %v1596_v23 = vld [vmem:[%s5194_s10 + $0x20] sm:$0xff] }
 0x12d   : > { %3881 = vmatprep.subr.bf16.mxu0 %v3880_v21 }
 0x12e   : > { %3883 = vmatpush3.bf16.msra.mxu0 %v3880_v21 }
 0x12f   : > { %3615 = vmatmul.mubr.msk.f32.gmra.mrb[38].mxu1 %vm733_vm0, %v4428_v27  ;;  %3643 = vmatmul.mubr.msk.f32.gmra.mrb[22].mxu0 %vm733_vm0, %v4428_v27  ;;  %v1597_v27 = vld [vmem:[%s5194_s10 + $0x28] sm:$0xff] }
 0x130   : > { %3617 = vmatprep.mubr.msk.f32.mxu1 %vm733_vm0, %v4432_v29  ;;  %3645 = vmatprep.mubr.msk.f32.mxu0 %vm733_vm0, %v4432_v29  ;;  %v3884_v29 = vpack.c.bf16 %v1597_v27, %v1596_v23 }
 0x132   : > { %3885 = vmatprep.subr.bf16.mxu0 %v3884_v29 }
 0x133   : > { %3618 = vmatmul.mubr.msk.f32.gmra.mrb[40].mxu1 %vm733_vm0, %v4446_v33  ;;  %3646 = vmatmul.mubr.msk.f32.gmra.mrb[24].mxu0 %vm733_vm0, %v4446_v33  ;;  %v1598_v33 = vld [vmem:[%s5194_s10 + $0x30] sm:$0xff] }
 0x134   : > { %3620 = vmatprep.mubr.msk.f32.mxu1 %vm733_vm0, %v4450_v35  ;;  %3648 = vmatprep.mubr.msk.f32.mxu0 %vm733_vm0, %v4450_v35  ;;  %v1599_v35 = vld [vmem:[%s5194_s10 + $0x38] sm:$0xff] }
 0x135   : > { %3887 = vmatpush3.bf16.msra.mxu0 %v3884_v29 }
 0x137   : > { %3621 = vmatmul.mubr.msk.f32.gmra.mrb[42].mxu1 %vm733_vm0, %v4464_v39  ;;  %3649 = vmatmul.mubr.msk.f32.gmra.mrb[26].mxu0 %vm733_vm0, %v4464_v39  ;;  %v3888_v39 = vpack.c.bf16 %v1599_v35, %v1598_v33 }
 0x138   : > { %3623 = vmatprep.mubr.msk.f32.mxu1 %vm733_vm0, %v4468_v41  ;;  %3651 = vmatprep.mubr.msk.f32.mxu0 %vm733_vm0, %v4468_v41  ;;  %v1600_v41 = vld [vmem:[%s5194_s10 + $0x40] sm:$0xff] }
 0x139   : > { %3889 = vmatprep.subr.bf16.mxu0 %v3888_v39 }
 0x13a   : > { %3891 = vmatpush3.bf16.msra.mxu0 %v3888_v39 }
 0x13b   : > { %3624 = vmatmul.mubr.msk.f32.gmra.mrb[44].mxu1 %vm733_vm0, %v4482_v45  ;;  %3652 = vmatmul.mubr.msk.f32.gmra.mrb[28].mxu0 %vm733_vm0, %v4482_v45  ;;  %v1601_v45 = vld [vmem:[%s5194_s10 + $0x48] sm:$0xff] }
 0x13c   : > { %3626 = vmatprep.mubr.msk.f32.mxu1 %vm733_vm0, %v4486_v47  ;;  %3654 = vmatprep.mubr.msk.f32.mxu0 %vm733_vm0, %v4486_v47  ;;  %v3892_v47 = vpack.c.bf16 %v1601_v45, %v1600_v41 }
 0x13e   : > { %3893 = vmatprep.subr.bf16.mxu0 %v3892_v47 }
 0x13f   : > { %3627 = vmatmul.mubr.msk.f32.gmra.mrb[46].mxu1 %vm733_vm0, %v4500_v51  ;;  %3655 = vmatmul.mubr.msk.f32.gmra.mrb[30].mxu0 %vm733_vm0, %v4500_v51  ;;  %v1602_v51 = vld [vmem:[%s5194_s10 + $0x50] sm:$0xff] }
 0x140   : > { %3717 = vmatprep.mubr.msk.f32.mxu1 %vm733_vm0, %v4545_v24  ;;  %3895 = vmatpush3.bf16.msra.mxu0 %v3892_v47  ;;  %v1603_v24 = vld [vmem:[%s5194_s10 + $0x58] sm:$0xff] }
 0x141   : > { %v3896_v28 = vpack.c.bf16 %v1603_v24, %v1602_v51 }
 0x143   : > { %3718 = vmatmul.mubr.msk.f32.vlgmr.msra.gmra.mrb[48].mxu1 %vm733_vm0, %v4549_v30  ;;  %3897 = vmatprep.subr.bf16.mxu0 %v3896_v28  ;;  %v1604_v30 = vld [vmem:[%s5194_s10 + $0x60] sm:$0xff] }
 0x144   : > { %3720 = vmatprep.mubr.msk.f32.mxu1 %vm733_vm0, %v4561_v52  ;;  %3899 = vmatpush3.bf16.msra.mxu0 %v3896_v28  ;;  %v1605_v52 = vld [vmem:[%s5194_s10 + $0x68] sm:$0xff] }
 0x147   : > { %3721 = vmatmul.mubr.msk.f32.gmra.mrb[50].mxu1 %vm733_vm0, %v4569_v55  ;;  %v3900_v55 = vpack.c.bf16 %v1605_v52, %v1604_v30 }
 0x148   : > { %3723 = vmatprep.mubr.msk.f32.mxu1 %vm733_vm0, %v4577_v61  ;;  %v1606_v61 = vld [vmem:[%s5194_s10 + $0x70] sm:$0xff] }
 0x149   : > { %3901 = vmatprep.subr.bf16.mxu0 %v3900_v55 }
 0x14a   : > { %3903 = vmatpush3.bf16.msra.mxu0 %v3900_v55 }
 0x14b   : > { %3724 = vmatmul.mubr.msk.f32.gmra.mrb[52].mxu1 %vm733_vm0, %v4583_v0  ;;  %v1607_v0 = vld [vmem:[%s5194_s10 + $0x78] sm:$0xff] }
 0x14c   : > { %3726 = vmatprep.mubr.msk.f32.mxu1 %vm733_vm0, %v4591_v7  ;;  %v3904_v7 = vpack.c.bf16 %v1607_v0, %v1606_v61 }
 0x14e   : > { %3905 = vmatprep.subr.bf16.mxu0 %v3904_v7 }
 0x14f   : > { %3727 = vmatmul.mubr.msk.f32.gmra.mrb[54].mxu1 %vm733_vm0, %v4597_v12  ;;  %3907 = vmatpush3.bf16.msra.mxu0 %v3904_v7  ;;  %v2063_v12 = vld [vmem:[%s5197_s13] sm:$0xff] }
 0x150   : > { %3729 = vmatprep.mubr.msk.f32.mxu1 %vm733_vm0, %v4605_v40  ;;  %3741 = vmatprep.subr.mxu1 %v2063_v12 }
 0x151   : > { %3742 = vmatpush3.msra.mxu1 %v2063_v12 }
 0x153   : > { %3730 = vmatmul.mubr.msk.f32.gmra.mrb[56].mxu1 %vm733_vm0, %v4611_v46 }
 0x154   : > { %3732 = vmatprep.mubr.msk.f32.mxu1 %vm733_vm0, %v4619_v59 }
 0x157   : > { %3733 = vmatmul.mubr.msk.f32.gmra.mrb[58].mxu1 %vm733_vm0, %v4625_v62 }
 0x158   : > { %3735 = vmatprep.mubr.msk.f32.mxu1 %vm733_vm0, %v1028_v10 }
 0x15b   : > { %3736 = vmatmul.mubr.msk.f32.gmra.mrb[60].mxu1 %vm733_vm0, %v1029_v18 }
 0x15c   : > { %3738 = vmatprep.mubr.msk.f32.mxu1 %vm733_vm0, %v1030_v34 }
 0x15f   : > { %3739 = vmatmul.mubr.msk.f32.gmra.mrb[62].mxu1 %vm733_vm0, %v1031_v63 }
 0x1d6   : > { %v4785_v36 = vpop.f32.mrb[16].mxu1  ;;  %v3579_v40 = vpop.f32.mrb[0].mxu0 }
 0x1d7   : > { %v4787_v42 = vpop.f32.mrb[17].mxu1  ;;  %v1302_v46 = vpop.f32.mrb[1].mxu0 }
 0x1da   : > { %v4789_v48 = vpop.f32.mrb[18].mxu1  ;;  %v3582_v54 = vpop.f32.mrb[2].mxu0 }
 0x1db   : > { %v4791_v56 = vpop.f32.mrb[19].mxu1  ;;  %v1312_v57 = vpop.f32.mrb[3].mxu0 }
 0x1de   : > { %v4793_v58 = vpop.f32.mrb[20].mxu1  ;;  %v3585_v59 = vpop.f32.mrb[4].mxu0 }
 0x1df   : > { %v4795_v60 = vpop.f32.mrb[21].mxu1  ;;  %v1322_v62 = vpop.f32.mrb[5].mxu0 }
 0x1e2   : > { %v4797_v1 = vpop.f32.mrb[22].mxu1  ;;  %v3588_v2 = vpop.f32.mrb[6].mxu0 }
 0x1e3   : > { %v4799_v3 = vpop.f32.mrb[23].mxu1  ;;  %v1332_v4 = vpop.f32.mrb[7].mxu0 }
 0x1e6   : > { %v4801_v5 = vpop.f32.mrb[24].mxu1  ;;  %v3591_v10 = vpop.f32.mrb[8].mxu0 }
 0x1e7   : > { %v4803_v16 = vpop.f32.mrb[25].mxu1  ;;  %v1342_v18 = vpop.f32.mrb[9].mxu0 }
 0x1ea   : > { %v4805_v22 = vpop.f32.mrb[26].mxu1  ;;  %v3594_v34 = vpop.f32.mrb[10].mxu0 }
 0x1eb   : > { %v4807_v63 = vpop.f32.mrb[27].mxu1  ;;  %v1352_v6 = vpop.f32.mrb[11].mxu0 }
 0x1ee   : > { %v4809_v8 = vpop.f32.mrb[28].mxu1  ;;  %v3597_v11 = vpop.f32.mrb[12].mxu0 }
 0x1ef   : > { %v4811_v15 = vpop.f32.mrb[29].mxu1  ;;  %v1362_v17 = vpop.f32.mrb[13].mxu0 }
 0x1f2   : > { %v4813_v21 = vpop.f32.mrb[30].mxu1  ;;  %v3600_v23 = vpop.f32.mrb[14].mxu0 }
 0x1f3   : > { %v4815_v27 = vpop.f32.mrb[31].mxu1  ;;  %v1372_v29 = vpop.f32.mrb[15].mxu0 }
 0x1f6   : > { %v3607_v33 = vpop.f32.mrb[32].mxu1 }
 0x1f7   : > { %v1577_v35 = vmul.f32 %v3607_v33, %v3579_v40  ;;  %v1497_v39 = vpop.f32.mrb[33].mxu1 }
 0x1f8   : > { %v1576_v41 = vmul.f32 %v1497_v39, %v1302_v46 }
 0x1fa   : > { %v3610_v45 = vpop.f32.mrb[34].mxu1  ;;  %3689 = vmatprep.mubr.f32.mxu0 %v1576_v41 }
 0x1fb   : > { %v1579_v47 = vmul.f32 %v3610_v45, %v3582_v54  ;;  %v1507_v51 = vpop.f32.mrb[35].mxu1  ;;  %3690 = vmatmul.mubr.f32.vlgmr.msra.gmra.mrb[16].mxu0 %v1577_v35 }
 0x1fc   : > { %v1578_v24 = vmul.f32 %v1507_v51, %v1312_v57 }
 0x1fe   : > { %v3613_v28 = vpop.f32.mrb[36].mxu1  ;;  %3692 = vmatprep.mubr.f32.mxu0 %v1578_v24 }
 0x1ff   : > { %v1581_v30 = vmul.f32 %v3613_v28, %v3585_v59  ;;  %v1517_v52 = vpop.f32.mrb[37].mxu1  ;;  %3693 = vmatmul.mubr.f32.gmra.mrb[18].mxu0 %v1579_v47 }
 0x200   : > { %v1580_v55 = vmul.f32 %v1517_v52, %v1322_v62 }
 0x202   : > { %v3616_v61 = vpop.f32.mrb[38].mxu1  ;;  %3695 = vmatprep.mubr.f32.mxu0 %v1580_v55 }
 0x203   : > { %v1583_v0 = vmul.f32 %v3616_v61, %v3588_v2  ;;  %v1527_v7 = vpop.f32.mrb[39].mxu1  ;;  %3696 = vmatmul.mubr.f32.gmra.mrb[20].mxu0 %v1581_v30 }
 0x204   : > { %v1582_v12 = vmul.f32 %v1527_v7, %v1332_v4 }
 0x206   : > { %v3619_v40 = vpop.f32.mrb[40].mxu1  ;;  %3698 = vmatprep.mubr.f32.mxu0 %v1582_v12 }
 0x207   : > { %v1585_v46 = vmul.f32 %v3619_v40, %v3591_v10  ;;  %v1537_v33 = vpop.f32.mrb[41].mxu1  ;;  %3699 = vmatmul.mubr.f32.gmra.mrb[22].mxu0 %v1583_v0  ;;  %v2290_v40 = vld [vmem:[%s5196_s12] sm:$0xff] }
 0x208   : > { %v1584_v54 = vmul.f32 %v1537_v33, %v1342_v18  ;;  %3767 = vmatprep.subr.mxu0 %v2290_v40  ;;  %v2275_v33 = vld [vmem:[%s5198_s14 + $0x8] sm:$0xff] }
 0x209   : > { %3768 = vmatpush3.msra.mxu0 %v2290_v40  ;;  %v2279_v40 = vld [vmem:[%s5198_s14 + $0x28] sm:$0xff] }
 0x20a   : > { %v3622_v35 = vpop.f32.mrb[42].mxu1  ;;  %3701 = vmatprep.mubr.f32.mxu0 %v1584_v54 }
 0x20b   : > { %v1587_v57 = vmul.f32 %v3622_v35, %v3594_v34  ;;  %v1547_v39 = vpop.f32.mrb[43].mxu1  ;;  %3702 = vmatmul.mubr.f32.gmra.mrb[24].mxu0 %v1585_v46  ;;  %v2274_v46 = vld [vmem:[%s5198_s14] sm:$0xff] }
 0x20c   : > { %v1586_v59 = vmul.f32 %v1547_v39, %v1352_v6  ;;  %v3912_v54 = vpack.c.bf16 %v2275_v33, %v2274_v46  ;;  %v4861_v35 = vld [vmem:[%s5190_s6] ss:$0 sm:$0xff] }
 0x20d   : > { %v1156_v39 = vadd.f32 %v4861_v35, %v4787_v42  ;;  %v1166_v42 = vadd.f32 %v4861_v35, %v4791_v56  ;;  %v1181_v56 = vadd.f32 %v4793_v58, %v4861_v35 }
 0x20e   : > { %v3625_v41 = vpop.f32.mrb[44].mxu1  ;;  %3704 = vmatprep.mubr.f32.mxu0 %v1586_v59  ;;  %3913 = vmatprep.subr.bf16.mxu0 %v3912_v54 }
 0x20f   : > { %v1589_v62 = vmul.f32 %v3625_v41, %v3597_v11  ;;  %v1557_v45 = vpop.f32.mrb[45].mxu1  ;;  %3705 = vmatmul.mubr.f32.gmra.mrb[26].mxu0 %v1587_v57  ;;  %v1161_v57 = vadd.f32 %v4785_v36, %v4861_v35  ;;  %v2276_v41 = vld [vmem:[%s5198_s14 + $0x10] sm:$0xff] }
 0x210   : > { %v1588_v2 = vmul.f32 %v1557_v45, %v1362_v17 }
 0x212   : > { %v3628_v47 = vpop.f32.mrb[46].mxu1  ;;  %3707 = vmatprep.mubr.f32.mxu0 %v1588_v2 }
 0x213   : > { %v1591_v4 = vmul.f32 %v3628_v47, %v3600_v23  ;;  %v1567_v51 = vpop.f32.mrb[47].mxu1  ;;  %3708 = vmatmul.mubr.f32.gmra.mrb[28].mxu0 %v1589_v62  ;;  %v2277_v62 = vld [vmem:[%s5198_s14 + $0x18] sm:$0xff] }
 0x214   : > { %v1590_v10 = vmul.f32 %v1567_v51, %v1372_v29  ;;  %v3916_v36 = vpack.c.bf16 %v2277_v62, %v2276_v41  ;;  %v2280_v41 = vld [vmem:[%s5198_s14 + $0x30] sm:$0xff] }
 0x216   : > { %3710 = vmatprep.mubr.f32.mxu0 %v1590_v10  ;;  %v4817_v18 = vpop.f32.mrb[48].mxu1  ;;  %v2278_v10 = vld [vmem:[%s5198_s14 + $0x20] sm:$0xff] }
 0x217   : > { %3711 = vmatmul.mubr.f32.gmra.mrb[30].mxu0 %v1591_v4  ;;  %v4819_v34 = vpop.f32.mrb[49].mxu1  ;;  %v1171_v4 = vadd.f32 %v4789_v48, %v4861_v35 }
 0x21a   : > { %v4821_v24 = vpop.f32.mrb[50].mxu1 }
 0x21b   : > { %v4823_v6 = vpop.f32.mrb[51].mxu1 }
 0x21e   : > { %v4825_v11 = vpop.f32.mrb[52].mxu1 }
 0x21f   : > { %v4827_v28 = vpop.f32.mrb[53].mxu1 }
 0x222   : > { %v4829_v17 = vpop.f32.mrb[54].mxu1 }
 0x223   : > { %v4831_v23 = vpop.f32.mrb[55].mxu1 }
 0x226   : > { %v4833_v30 = vpop.f32.mrb[56].mxu1 }
 0x227   : > { %v4835_v29 = vpop.f32.mrb[57].mxu1 }
 0x22a   : > { %v4837_v52 = vpop.f32.mrb[58].mxu1 }
 0x22b   : > { %v4839_v55 = vpop.f32.mrb[59].mxu1 }
 0x22e   : > { %v4841_v61 = vpop.f32.mrb[60].mxu1 }
 0x22f   : > { %v4843_v0 = vpop.f32.mrb[61].mxu1 }
 0x232   : > { %v4845_v7 = vpop.f32.mrb[62].mxu1 }
 0x233   : > { %v4847_v12 = vpop.f32.mrb[63].mxu1 }
 0x2ce   : > { %v3691_v59 = vpop.f32.mrb[16].mxu0 }
 0x2cf   : > { %v1901_v45 = vmul.f32 %v3691_v59, %v1161_v57  ;;  %v1821_v2 = vpop.f32.mrb[17].mxu0  ;;  %v3920_v57 = vpack.c.bf16 %v2279_v40, %v2278_v10  ;;  %v1201_v10 = vadd.f32 %v4801_v5, %v4861_v35 }
 0x2d0   : > { %v1900_v47 = vmul.f32 %v1821_v2, %v1156_v39  ;;  %v1176_v39 = vadd.f32 %v4861_v35, %v4795_v60 }
 0x2d2   : > { %v3694_v51 = vpop.f32.mrb[18].mxu0  ;;  %3743 = vmatprep.mubr.msk.f32.mxu1 %vm2064_vm2, %v1900_v47  ;;  %3769 = vmatprep.mubr.msk.f32.mxu0 %vm2064_vm2, %v1900_v47  ;;  %v1186_v47 = vadd.f32 %v4861_v35, %v4799_v3 }
 0x2d3   : > { %v1903_v46 = vmul.f32 %v3694_v51, %v1171_v4  ;;  %v1831_v33 = vpop.f32.mrb[19].mxu0  ;;  %3744 = vmatmul.mubr.msk.f32.vlgmr.msra.gmra.mrb[64].mxu1 %vm2064_vm2, %v1901_v45  ;;  %3770 = vmatmul.mubr.msk.f32.vlgmr.msra.gmra.mrb[32].mxu0 %vm2064_vm2, %v1901_v45  ;;  %v1191_v45 = vadd.f32 %v4797_v1, %v4861_v35 }
 0x2d4   : > { %v1902_v48 = vmul.f32 %v1831_v33, %v1166_v42  ;;  %3915 = vmatpush3.bf16.msra.mxu0 %v3912_v54  ;;  %v2281_v54 = vld [vmem:[%s5198_s14 + $0x38] sm:$0xff]  ;;  %v2282_v42 = vld [vmem:[%s5198_s14 + $0x40] sm:$0xff] }
 0x2d5   : > { %3917 = vmatprep.subr.bf16.mxu0 %v3916_v36  ;;  %v3924_v2 = vpack.c.bf16 %v2281_v54, %v2280_v41  ;;  %v1206_v41 = vadd.f32 %v4861_v35, %v4807_v63 }
 0x2d6   : > { %v3697_v59 = vpop.f32.mrb[20].mxu0  ;;  %3746 = vmatprep.mubr.msk.f32.mxu1 %vm2064_vm2, %v1902_v48  ;;  %3772 = vmatprep.mubr.msk.f32.mxu0 %vm2064_vm2, %v1902_v48  ;;  %v2284_v48 = vld [vmem:[%s5198_s14 + $0x50] sm:$0xff] }
 0x2d7   : > { %v1905_v62 = vmul.f32 %v3697_v59, %v1181_v56  ;;  %v1841_v58 = vpop.f32.mrb[21].mxu0  ;;  %3747 = vmatmul.mubr.msk.f32.gmra.mrb[66].mxu1 %vm2064_vm2, %v1903_v46  ;;  %3773 = vmatmul.mubr.msk.f32.gmra.mrb[34].mxu0 %vm2064_vm2, %v1903_v46  ;;  %v1196_v46 = vadd.f32 %v4861_v35, %v4803_v16  ;;  %v2285_v56 = vld [vmem:[%s5198_s14 + $0x58] sm:$0xff] }
 0x2d8   : > { %v1904_v60 = vmul.f32 %v1841_v58, %v1176_v39  ;;  %3919 = vmatpush3.bf16.msra.mxu0 %v3916_v36  ;;  %v2283_v36 = vld [vmem:[%s5198_s14 + $0x48] sm:$0xff]  ;;  %v1211_v39 = vadd.f32 %v4805_v22, %v4861_v35  ;;  %v3932_v59 = vpack.c.bf16 %v2285_v56, %v2284_v48  ;;  %v719_v48 = vmul.f32 %v4387_v14, %v4387_v14 }
 0x2d9   : > { %3921 = vmatprep.subr.bf16.mxu0 %v3920_v57  ;;  %v3928_v40 = vpack.c.bf16 %v2283_v36, %v2282_v42  ;;  %v2287_v58 = vld [vmem:[%s5198_s14 + $0x68] sm:$0xff]  ;;  %v720_v56 = vmul.f32 %v4402_v19, %v4402_v19  ;;  %v726_v19 = vmul.f32 %v4456_v37, %v4456_v37  ;;  %v727_v37 = vmul.f32 %v4461_v38, %v4461_v38 }
 0x2da   : > { %v3700_v4 = vpop.f32.mrb[22].mxu0  ;;  %3749 = vmatprep.mubr.msk.f32.mxu1 %vm2064_vm2, %v1904_v60  ;;  %3775 = vmatprep.mubr.msk.f32.mxu0 %vm2064_vm2, %v1904_v60 }
 0x2db   : > { %v1907_v51 = vmul.f32 %v3700_v4, %v1191_v45  ;;  %v1851_v1 = vpop.f32.mrb[23].mxu0  ;;  %3750 = vmatmul.mubr.msk.f32.gmra.mrb[68].mxu1 %vm2064_vm2, %v1905_v62  ;;  %3776 = vmatmul.mubr.msk.f32.gmra.mrb[36].mxu0 %vm2064_vm2, %v1905_v62  ;;  %v2286_v62 = vld [vmem:[%s5198_s14 + $0x60] sm:$0xff]  ;;  %v1221_v45 = vadd.f32 %v4809_v8, %v4861_v35  ;;  %v1231_v8 = vadd.f32 %v4813_v21, %v4861_v35  ;;  %v2288_v21 = vld [vmem:[%s5198_s14 + $0x70] sm:$0xff]  ;;  %v743_v14 = vsel %vm733_vm0, %v720_v56, 0.0 }
 0x2dc   : > { %v1906_v3 = vmul.f32 %v1851_v1, %v1186_v47  ;;  %3923 = vmatpush3.bf16.msra.mxu0 %v3920_v57  ;;  %v1216_v47 = vadd.f32 %v4861_v35, %v4811_v15  ;;  %v1226_v15 = vadd.f32 %v4861_v35, %v4815_v27  ;;  %v2289_v27 = vld [vmem:[%s5198_s14 + $0x78] sm:$0xff] }
 0x2dd   : > { %3925 = vmatprep.subr.bf16.mxu0 %v3924_v2  ;;  %v3940_v35 = vpack.c.bf16 %v2289_v27, %v2288_v21 }
 0x2de   : > { %v3703_v33 = vpop.f32.mrb[24].mxu0  ;;  %3752 = vmatprep.mubr.msk.f32.mxu1 %vm2064_vm2, %v1906_v3  ;;  %3778 = vmatprep.mubr.msk.f32.mxu0 %vm2064_vm2, %v1906_v3 }
 0x2df   : > { %v1909_v57 = vmul.f32 %v3703_v33, %v1201_v10  ;;  %v1861_v5 = vpop.f32.mrb[25].mxu0  ;;  %3753 = vmatmul.mubr.msk.f32.gmra.mrb[70].mxu1 %vm2064_vm2, %v1907_v51  ;;  %3779 = vmatmul.mubr.msk.f32.gmra.mrb[38].mxu0 %vm2064_vm2, %v1907_v51  ;;  %v718_v33 = vmul.f32 %v4384_v13, %v4384_v13  ;;  %v725_v13 = vmul.f32 %v4443_v32, %v4443_v32 }
 0x2e0   : > { %v1908_v16 = vmul.f32 %v1861_v5, %v1196_v46  ;;  %3927 = vmatpush3.bf16.msra.mxu0 %v3924_v2  ;;  %v3936_v2 = vpack.c.bf16 %v2287_v58, %v2286_v62  ;;  %v717_v46 = vmul.f32 %v4376_v9, %v4376_v9  ;;  %v740_v5 = vsel %vm733_vm0, %v719_v48, 0.0 }
 0x2e1   : > { %3929 = vmatprep.subr.bf16.mxu0 %v3928_v40  ;;  %741 = vadd.xlane.f32.xlu1 %v740_v5  ;;  %v737_v9 = vsel %vm733_vm0, %v718_v33, 0.0  ;;  %v758_v32 = vsel %vm733_vm0, %v725_v13, 0.0 }
 0x2e2   : > { %v3706_v54 = vpop.f32.mrb[26].mxu0  ;;  %3755 = vmatprep.mubr.msk.f32.mxu1 %vm2064_vm2, %v1908_v16  ;;  %3781 = vmatprep.mubr.msk.f32.mxu0 %vm2064_vm2, %v1908_v16  ;;  %v2855_v16 = vld [vmem:[%s668_s26] sm:$0xff] }
 0x2e3   : > { %v1911_v60 = vmul.f32 %v3706_v54, %v1211_v39  ;;  %v1871_v22 = vpop.f32.mrb[27].mxu0  ;;  %3756 = vmatmul.mubr.msk.f32.gmra.mrb[72].mxu1 %vm2064_vm2, %v1909_v57  ;;  %3782 = vmatmul.mubr.msk.f32.gmra.mrb[40].mxu0 %vm2064_vm2, %v1909_v57  ;;  %v734_v57 = vsel %vm733_vm0, %v717_v46, 0.0  ;;  %v2857_v39 = vld [vmem:[%s5199_s15] sm:$0xff]  ;;  %v761_v54 = vsel %vm733_vm0, %v726_v19, 0.0 }
 0x2e4   : > { %v1910_v63 = vmul.f32 %v1871_v22, %v1206_v41  ;;  %3931 = vmatpush3.bf16.msra.mxu0 %v3928_v40  ;;  %735 = vadd.xlane.f32.xlu0 %v734_v57  ;;  %v721_v41 = vmul.f32 %v4407_v20, %v4407_v20  ;;  %v764_v22 = vsel %vm733_vm0, %v727_v37, 0.0  ;;  %v728_v20 = vmul.f32 %v4474_v43, %v4474_v43 }
 0x2e5   : > { %3933 = vmatprep.subr.bf16.mxu0 %v3932_v59  ;;  %744 = vadd.xlane.f32.xlu1 %v743_v14  ;;  %v724_v43 = vmul.f32 %v4438_v31, %v4438_v31 }
 0x2e6   : > { %v3709_v4 = vpop.f32.mrb[28].mxu0  ;;  %3758 = vmatprep.mubr.msk.f32.mxu1 %vm2064_vm2, %v1910_v63  ;;  %3784 = vmatprep.mubr.msk.f32.mxu0 %vm2064_vm2, %v1910_v63  ;;  %v746_v58 = vsel %vm733_vm0, %v721_v41, 0.0  ;;  %v2856_v63 = vld [vmem:[%s668_s26 + $0x8] sm:$0xff]  ;;  %s2997_s26 = sshll.u32 %s636_s22, 4  ;;  %s5100_s26 = int_to_ptr.vmem [resolvable:$true] %s2997_s26 }
 0x2e7   : > { %v1913_v42 = vmul.f32 %v3709_v4, %v1221_v45  ;;  %v1881_v36 = vpop.f32.mrb[29].mxu0  ;;  %3759 = vmatmul.mubr.msk.f32.gmra.mrb[74].mxu1 %vm2064_vm2, %v1911_v60  ;;  %3785 = vmatmul.mubr.msk.f32.gmra.mrb[42].mxu0 %vm2064_vm2, %v1911_v60  ;;  %v722_v60 = vmul.f32 %v4420_v25, %v4420_v25  ;;  %v723_v45 = vmul.f32 %v4425_v26, %v4425_v26  ;;  %v755_v26 = vsel %vm733_vm0, %v724_v43, 0.0  ;;  %s4075_s21 = scalar_lea.vmem %s5100_s26, 256  ;;  %p4082_p1 = scmp.lt.s32.totalorder %s5100_s26, %s4080_s0 }
 0x2e8   : > { %v1912_v51 = vmul.f32 %v1881_v36, %v1216_v47  ;;  %3935 = vmatpush3.bf16.msra.mxu0 %v3932_v59  ;;  %v2858_v59 = vld [vmem:[%s5199_s15 + $0x8] sm:$0xff]  ;;  %738 = vadd.xlane.f32.xlu0 %v737_v9  ;;  %v729_v47 = vmul.f32 %v4479_v44, %v4479_v44  ;;  %v732_v36 = vmul.f32 %v4506_v53, %v4506_v53  ;;  %p4076_p12 = scmp.ne.s32.totalorder %s5100_s26, %s4075_s21  ;;  %p4083_p2 = scmp.lt.s32.totalorder %s4081_s29, %s4075_s21 }
 0x2e9   : > { %3937 = vmatprep.subr.bf16.mxu0 %v3936_v2  ;;  %v3944_v62 = vpack.c.bf16 %v2858_v59, %v2857_v39  ;;  %762 = vadd.xlane.f32.xlu1 %v761_v54  ;;  %v749_v38 = vsel %vm733_vm0, %v722_v60, 0.0  ;;  %v752_v25 = vsel %vm733_vm0, %v723_v45, 0.0 }
 0x2ea   : > { %v3712_v1 = vpop.f32.mrb[30].mxu0  ;;  %3761 = vmatprep.mubr.msk.f32.mxu1 %vm2064_vm2, %v1912_v51  ;;  %3787 = vmatprep.mubr.msk.f32.mxu0 %vm2064_vm2, %v1912_v51  ;;  %v770_v4 = vsel %vm733_vm0, %v729_v47, 0.0  ;;  %v731_v51 = vmul.f32 %v4497_v50, %v4497_v50  ;;  %v779_v31 = vsel %vm733_vm0, %v732_v36, 0.0  ;;  %p4077_p13 = pnand %p4076_p12, %p4326_p4  ;;  %p4084_p3 = por %p4083_p2, %p4082_p1 }
 0x2eb   : > { %v1915_v3 = vmul.f32 %v3712_v1, %v1231_v8  ;;  %v1891_v10 = vpop.f32.mrb[31].mxu0  ;;  %3762 = vmatmul.mubr.msk.f32.gmra.mrb[76].mxu1 %vm2064_vm2, %v1913_v42  ;;  %3788 = vmatmul.mubr.msk.f32.gmra.mrb[44].mxu0 %vm2064_vm2, %v1913_v42  ;;  %v730_v42 = vmul.f32 %v4492_v49, %v4492_v49 }
 0x2ec   : > { %v1914_v40 = vmul.f32 %v1891_v10, %v1226_v15  ;;  %3939 = vmatpush3.bf16.msra.mxu0 %v3936_v2  ;;  %3945 = vmatprep.subr.bf16.mxu1 %v3944_v62  ;;  %v767_v2 = vsel %vm733_vm0, %v728_v20, 0.0  ;;  %v776_v8 = vsel %vm733_vm0, %v731_v51, 0.0  ;;  %p4078_p0 = pneg %p4077_p13 }
 0x2ed   : > { %3941 = vmatprep.subr.bf16.mxu0 %v3940_v35  ;;  %759 = vadd.xlane.f32.xlu0 %v758_v32  ;;  %v773_v44 = vsel %vm733_vm0, %v730_v42, 0.0 }
 0x2ee   : > { %3764 = vmatprep.mubr.msk.f32.mxu1 %vm2064_vm2, %v1914_v40  ;;  %3790 = vmatprep.mubr.msk.f32.mxu0 %vm2064_vm2, %v1914_v40  ;;  %p4085_p5 = pnand %p4084_p3, %p4078_p0 }
 0x2ef   : > { %3765 = vmatmul.mubr.msk.f32.gmra.mrb[78].mxu1 %vm2064_vm2, %v1915_v3  ;;  %3791 = vmatmul.mubr.msk.f32.gmra.mrb[46].mxu0 %vm2064_vm2, %v1915_v3 }
 0x2f0   : > { %3943 = vmatpush3.bf16.msra.mxu0 %v3940_v35  ;;  %3853 = vmatprep.mubr.msk.f32.mxu1 %vm733_vm0, %v2855_v16 }
 0x2f1   : > { %3947 = vmatpush3.bf16.msra.mxu1 %v3944_v62  ;;  %747 = vadd.xlane.f32.xlu0 %v746_v58 }
 0x2f2   : > { %765 = vadd.xlane.f32.xlu1 %v764_v22 }
 0x2f4   : > { %3854 = vmatmul.mubr.msk.f32.vlgmr.msra.gmra.mrb[80].mxu1 %vm733_vm0, %v2856_v63 }
 0x2f5   : > { %750 = vadd.xlane.f32.xlu0 %v749_v38 }
 0x2f6   : > { %768 = vadd.xlane.f32.xlu1 %v767_v2 }
 0x2f9   : > { %753 = vadd.xlane.f32.xlu0 %v752_v25 }
 0x2fa   : > { %771 = vadd.xlane.f32.xlu1 %v770_v4 }
 0x2fd   : > { %756 = vadd.xlane.f32.xlu0 %v755_v26 }
 0x2fe   : > { %774 = vadd.xlane.f32.xlu1 %v773_v44 }
 0x301   : > { %777 = vadd.xlane.f32.xlu0 %v776_v8 }
 0x302   : > { %780 = vadd.xlane.f32.xlu1 %v779_v31 }
 0x371   : > { %v736_v39 = vpop.xlane.xlu0 %735 }
 0x372   : > { %v2581_v60 = vsub.f32 0.0, %v736_v39 }
 0x374   : > { %v2598_v63 = vmul.f32 0.1, %v2581_v60 }
 0x375   : > { %v739_v59 = vpop.xlane.xlu0 %738 }
 0x376   : > { %v2614_v43 = vmul.f32 1.442695, %v2598_v63 }
 0x37a   : > { %v760_v32 = vpop.xlane.xlu0 %759 }
 0x37e   : > { %v748_v54 = vpop.xlane.xlu0 %747 }
 0x37f   : > { %v2585_v4 = vsub.f32 0.0, %v748_v54 }
 0x381   : > { %v2602_v8 = vmul.f32 0.1, %v2585_v4 }
 0x382   : > { %v751_v62 = vpop.xlane.xlu0 %750 }
 0x383   : > { %v2586_v25 = vsub.f32 0.0, %v751_v62 }
 0x385   : > { %v2603_v36 = vmul.f32 0.1, %v2586_v25 }
 0x386   : > { %v754_v22 = vpop.xlane.xlu0 %753 }
 0x38a   : > { %v757_v42 = vpop.xlane.xlu0 %756 }
 0x38b   : > { %v2588_v51 = vsub.f32 0.0, %v757_v42 }
 0x3a6   : > { %v3745_v49 = vpop.f32.mrb[64].mxu1 }
 0x3a7   : > { %v2259_v15 = vmul.f32 %v3745_v49, %v4817_v18  ;;  %v2179_v1 = vpop.f32.mrb[65].mxu1  ;;  %v2587_v49 = vsub.f32 0.0, %v754_v22 }
 0x3a8   : > { %v2258_v3 = vmul.f32 %v2179_v1, %v4819_v34 }
 0x3aa   : > { %v3748_v10 = vpop.f32.mrb[66].mxu1  ;;  %3825 = vmatprep.mubr.f32.mxu0 %v2258_v3 }
 0x3ab   : > { %v2261_v53 = vmul.f32 %v3748_v10, %v4821_v24  ;;  %v2189_v40 = vpop.f32.mrb[67].mxu1  ;;  %3826 = vmatmul.mubr.f32.vlgmr.msra.gmra.mrb[32].mxu0 %v2259_v15  ;;  %v2589_v15 = vsub.f32 0.0, %v760_v32  ;;  %v2624_v10 = vmul.f32 1.442695, %v2603_v36 }
 0x3ac   : > { %v2260_v50 = vmul.f32 %v2189_v40, %v4823_v6  ;;  %v2605_v40 = vmul.f32 0.1, %v2588_v51 }
 0x3ae   : > { %v3751_v21 = vpop.f32.mrb[68].mxu1  ;;  %3828 = vmatprep.mubr.f32.mxu0 %v2260_v50  ;;  %v2622_v50 = vmul.f32 1.442695, %v2602_v8 }
 0x3af   : > { %v2263_v27 = vmul.f32 %v3751_v21, %v4825_v11  ;;  %v2199_v35 = vpop.f32.mrb[69].mxu1  ;;  %3829 = vmatmul.mubr.f32.gmra.mrb[34].mxu0 %v2261_v53  ;;  %v2604_v21 = vmul.f32 0.1, %v2587_v49 }
 0x3b0   : > { %v2262_v46 = vmul.f32 %v2199_v35, %v4827_v28  ;;  %v2606_v35 = vmul.f32 0.1, %v2589_v15 }
 0x3b2   : > { %v3754_v18 = vpop.f32.mrb[70].mxu1  ;;  %3831 = vmatprep.mubr.f32.mxu0 %v2262_v46 }
 0x3b3   : > { %v2265_v34 = vmul.f32 %v3754_v18, %v4829_v17  ;;  %v2209_v33 = vpop.f32.mrb[71].mxu1  ;;  %3832 = vmatmul.mubr.f32.gmra.mrb[36].mxu0 %v2263_v27 }
 0x3b4   : > { %v2264_v24 = vmul.f32 %v2209_v33, %v4831_v23 }
 0x3b6   : > { %v3757_v48 = vpop.f32.mrb[72].mxu1  ;;  %3834 = vmatprep.mubr.f32.mxu0 %v2264_v24  ;;  %v778_v24 = vpop.xlane.xlu0 %777 }
 0x3b7   : > { %v2267_v6 = vmul.f32 %v3757_v48, %v4833_v30  ;;  %v2219_v56 = vpop.f32.mrb[73].mxu1  ;;  %3835 = vmatmul.mubr.f32.gmra.mrb[38].mxu0 %v2265_v34 }
 0x3b8   : > { %v2266_v11 = vmul.f32 %v2219_v56, %v4835_v29  ;;  %v2626_v56 = vmul.f32 1.442695, %v2604_v21 }
 0x3ba   : > { %v3760_v57 = vpop.f32.mrb[74].mxu1  ;;  %3837 = vmatprep.mubr.f32.mxu0 %v2266_v11 }
 0x3bb   : > { %v2269_v28 = vmul.f32 %v3760_v57, %v4837_v52  ;;  %v2229_v5 = vpop.f32.mrb[75].mxu1  ;;  %3838 = vmatmul.mubr.f32.gmra.mrb[40].mxu0 %v2267_v6  ;;  %v2628_v6 = vmul.f32 1.442695, %v2605_v40 }
 0x3bc   : > { %v2268_v17 = vmul.f32 %v2229_v5, %v4839_v55  ;;  %v2630_v5 = vmul.f32 1.442695, %v2606_v35 }
 0x3be   : > { %v3763_v16 = vpop.f32.mrb[76].mxu1  ;;  %3840 = vmatprep.mubr.f32.mxu0 %v2268_v17 }
 0x3bf   : > { %v2271_v23 = vmul.f32 %v3763_v16, %v4841_v61  ;;  %v2239_v9 = vpop.f32.mrb[77].mxu1  ;;  %3841 = vmatmul.mubr.f32.gmra.mrb[42].mxu0 %v2269_v28  ;;  %v742_v61 = vpop.xlane.xlu1 %741  ;;  %v2595_v16 = vsub.f32 0.0, %v778_v24 }
 0x3c0   : > { %v2270_v30 = vmul.f32 %v2239_v9, %v4843_v0  ;;  %v2583_v45 = vsub.f32 0.0, %v742_v61 }
 0x3c2   : > { %v3766_v13 = vpop.f32.mrb[78].mxu1  ;;  %3843 = vmatprep.mubr.f32.mxu0 %v2270_v30  ;;  %v2600_v26 = vmul.f32 0.1, %v2583_v45 }
 0x3c3   : > { %v2273_v29 = vmul.f32 %v3766_v13, %v4845_v7  ;;  %v2249_v14 = vpop.f32.mrb[79].mxu1  ;;  %3844 = vmatmul.mubr.f32.gmra.mrb[44].mxu0 %v2271_v23  ;;  %v745_v41 = vpop.xlane.xlu1 %744  ;;  %v2582_v7 = vsub.f32 0.0, %v739_v59 }
 0x3c4   : > { %v2272_v52 = vmul.f32 %v2249_v14, %v4847_v12  ;;  %v2584_v20 = vsub.f32 0.0, %v745_v41  ;;  %v2618_v1 = vmul.f32 1.442695, %v2600_v26 }
 0x3c5   : > { %v2599_v12 = vmul.f32 0.1, %v2582_v7 }
 0x3c6   : > { %3846 = vmatprep.mubr.f32.mxu0 %v2272_v52  ;;  %v2601_v47 = vmul.f32 0.1, %v2584_v20 }
 0x3c7   : > { %3847 = vmatmul.mubr.f32.gmra.mrb[46].mxu0 %v2273_v29  ;;  %v5045_v19 = vpop.f32.mrb[80].mxu1  ;;  %v763_v0 = vpop.xlane.xlu1 %762  ;;  %v2616_v2 = vmul.f32 1.442695, %v2599_v12 }
 0x3c8   : > { %v5047_v55 = vpop.f32.mrb[81].mxu1  ;;  %v2620_v44 = vmul.f32 1.442695, %v2601_v47  ;;  %v2590_v3 = vsub.f32 0.0, %v763_v0  ;;  %v2612_v0 = vmul.f32 0.1, %v2595_v16 }
 0x3c9   : > { %4043 = vpow2.f32 %v2616_v2 }
 0x3ca   : > { %4045 = vpow2.f32 %v2614_v43  ;;  %v2607_v34 = vmul.f32 0.1, %v2590_v3  ;;  %v2642_v47 = vmul.f32 1.442695, %v2612_v0 }
 0x3cb   : > { %v766_v37 = vpop.xlane.xlu1 %765  ;;  %4047 = vpow2.f32 %v2620_v44 }
 0x3cc   : > { %v2591_v53 = vsub.f32 0.0, %v766_v37  ;;  %4049 = vpow2.f32 %v2618_v1  ;;  %v2632_v9 = vmul.f32 1.442695, %v2607_v34 }
 0x3cd   : > { %4051 = vpow2.f32 %v2624_v10 }
 0x3ce   : > { %v2608_v48 = vmul.f32 0.1, %v2591_v53  ;;  %4053 = vpow2.f32 %v2622_v50 }
 0x3cf   : > { %v769_v58 = vpop.xlane.xlu1 %768  ;;  %4055 = vpow2.f32 %v2628_v6 }
 0x3d0   : > { %v2592_v27 = vsub.f32 0.0, %v769_v58  ;;  %v2634_v13 = vmul.f32 1.442695, %v2608_v48  ;;  %4057 = vpow2.f32 %v2626_v56 }
 0x3d1   : > { %4059 = vpow2.f32 %v2630_v5 }
 0x3d2   : > { %v2609_v11 = vmul.f32 0.1, %v2592_v27  ;;  %4061 = vpow2.f32 %v2632_v9 }
 0x3d3   : > { %v772_v38 = vpop.xlane.xlu1 %771  ;;  %v4044_v28 = vpop.eup %4043  ;;  %4063 = vpow2.f32 %v2634_v13 }
 0x3d4   : > { %v2593_v46 = vsub.f32 0.0, %v772_v38  ;;  %v4046_v23 = vpop.eup %4045  ;;  %v2636_v14 = vmul.f32 1.442695, %v2609_v11 }
 0x3d5   : > { %v4048_v59 = vpop.eup %4047 }
 0x3d6   : > { %v2610_v17 = vmul.f32 0.1, %v2593_v46  ;;  %v4050_v60 = vpop.eup %4049  ;;  %4065 = vpow2.f32 %v2636_v14 }
 0x3d7   : > { %v775_v31 = vpop.xlane.xlu1 %774  ;;  %v4052_v38 = vpop.eup %4051 }
 0x3d8   : > { %v2594_v33 = vsub.f32 0.0, %v775_v31  ;;  %v2638_v32 = vmul.f32 1.442695, %v2610_v17  ;;  %v4054_v25 = vpop.eup %4053 }
 0x3d9   : > { %v4056_v15 = vpop.eup %4055 }
 0x3da   : > { %v2611_v30 = vmul.f32 0.1, %v2594_v33  ;;  %4067 = vpow2.f32 %v2638_v32  ;;  %v4058_v53 = vpop.eup %4057 }
 0x3db   : > { %v781_v18 = vpop.xlane.xlu1 %780  ;;  %v4060_v27 = vpop.eup %4059 }
 0x3dc   : > { %v2596_v57 = vsub.f32 0.0, %v781_v18  ;;  %v2640_v37 = vmul.f32 1.442695, %v2611_v30  ;;  %v4062_v24 = vpop.eup %4061 }
 0x3de   : > { %v2613_v61 = vmul.f32 0.1, %v2596_v57  ;;  %4069 = vpow2.f32 %v2640_v37 }
 0x3e0   : > { %v2644_v63 = vmul.f32 1.442695, %v2613_v61 }
 0x3e2   : > { %4071 = vpow2.f32 %v2644_v63 }
 0x3e3   : > { %4073 = vpow2.f32 %v2642_v47 }
 0x47e   : > { %v3827_v29 = vpop.f32.mrb[32].mxu0 }
 0x47f   : > { %v2647_v52 = vmul.f32 %v4044_v28, %v3827_v29  ;;  %v2502_v39 = vpop.f32.mrb[33].mxu0  ;;  %v4064_v28 = vpop.eup %4063 }
 0x480   : > { %v2646_v41 = vmul.f32 %v4046_v23, %v2502_v39  ;;  %v4066_v9 = vpop.eup %4065 }
 0x481   : > { %v2669_v54 = vsel %vm733_vm0, %v2647_v52, 0.0  ;;  %v4068_v52 = vpop.eup %4067 }
 0x482   : > { %v2670_v62 = vrot.slane %v2669_v54, 4  ;;  %v2662_v7 = vsel %vm733_vm0, %v2646_v41, 0.0  ;;  %v3830_v58 = vpop.f32.mrb[34].mxu0  ;;  %v4070_v0 = vpop.eup %4069 }
 0x483   : > { %v2663_v22 = vrot.slane %v2662_v7, 4  ;;  %v2649_v12 = vmul.f32 %v4048_v59, %v3830_v58  ;;  %v2512_v20 = vpop.f32.mrb[35].mxu0 }
 0x484   : > { %v2671_v45 = vadd.f32 %v2670_v62, %v2669_v54  ;;  %v2648_v2 = vmul.f32 %v4050_v60, %v2512_v20  ;;  %v5058_v20 = vpop.eup %4071 }
 0x485   : > { %v2664_v43 = vadd.f32 %v2663_v22, %v2662_v7  ;;  %v2683_v4 = vsel %vm733_vm0, %v2649_v12, 0.0  ;;  %v4074_v47 = vpop.eup %4073 }
 0x486   : > { %v2672_v42 = vrot.slane %v2671_v45, 2  ;;  %v2684_v26 = vrot.slane %v2683_v4, 4  ;;  %v2676_v44 = vsel %vm733_vm0, %v2648_v2, 0.0  ;;  %v3833_v36 = vpop.f32.mrb[36].mxu0 }
 0x487   : > { %v2665_v51 = vrot.slane %v2664_v43, 2  ;;  %v2677_v31 = vrot.slane %v2676_v44, 4  ;;  %v2651_v8 = vmul.f32 %v4052_v38, %v3833_v36  ;;  %v2522_v49 = vpop.f32.mrb[37].mxu0 }
 0x488   : > { %v2673_v1 = vadd.f32 %v2672_v42, %v2671_v45  ;;  %v2685_v3 = vadd.f32 %v2684_v26, %v2683_v4  ;;  %v2650_v10 = vmul.f32 %v4054_v25, %v2522_v49 }
 0x489   : > { %v2666_v40 = vadd.f32 %v2665_v51, %v2664_v43  ;;  %v2678_v50 = vadd.f32 %v2677_v31, %v2676_v44  ;;  %v2697_v21 = vsel %vm733_vm0, %v2651_v8, 0.0 }
 0x48a   : > { %v2674_v35 = vrot.slane %v2673_v1, 1  ;;  %v2686_v46 = vrot.slane %v2685_v3, 2  ;;  %v2698_v18 = vrot.slane %v2697_v21, 4  ;;  %v2690_v34 = vsel %vm733_vm0, %v2650_v10, 0.0  ;;  %v3836_v33 = vpop.f32.mrb[38].mxu0 }
 0x48b   : > { %v2667_v48 = vrot.slane %v2666_v40, 1  ;;  %v2679_v6 = vrot.slane %v2678_v50, 2  ;;  %v2691_v56 = vrot.slane %v2690_v34, 4  ;;  %v2653_v11 = vmul.f32 %v4056_v15, %v3836_v33  ;;  %v2532_v57 = vpop.f32.mrb[39].mxu0 }
 0x48c   : > { %v2675_v5 = vadd.f32 %v2674_v35, %v2673_v1  ;;  %v2687_v17 = vadd.f32 %v2686_v46, %v2685_v3  ;;  %v2699_v16 = vadd.f32 %v2698_v18, %v2697_v21  ;;  %v2652_v23 = vmul.f32 %v4058_v53, %v2532_v57 }
 0x48d   : > { %v2668_v30 = vadd.f32 %v2667_v48, %v2666_v40  ;;  %v2680_v13 = vadd.f32 %v2679_v6, %v2678_v50  ;;  %v2692_v29 = vadd.f32 %v2691_v56, %v2690_v34  ;;  %v2711_v14 = vsel %vm733_vm0, %v2653_v11, 0.0 }
 0x48e   : > { %v2688_v39 = vrot.slane %v2687_v17, 1  ;;  %v2700_v61 = vrot.slane %v2699_v16, 2  ;;  %v2712_v59 = vrot.slane %v2711_v14, 4  ;;  %v2704_v41 = vsel %vm733_vm0, %v2652_v23, 0.0  ;;  %v3839_v32 = vpop.f32.mrb[40].mxu0 }
 0x48f   : > { %v2792_v54 = vsel %vm2791_vm3, %v2675_v5, %v2668_v30  ;;  %v2681_v37 = vrot.slane %v2680_v13, 1  ;;  %v2693_v62 = vrot.slane %v2692_v29, 2  ;;  %v2705_v7 = vrot.slane %v2704_v41, 4  ;;  %v2542_v58 = vpop.f32.mrb[41].mxu0 }
 0x490   : > { %v2701_v60 = vadd.f32 %v2700_v61, %v2699_v16  ;;  %v2713_v22 = vadd.f32 %v2712_v59, %v2711_v14  ;;  %v2655_v12 = vmul.f32 %v4062_v24, %v3839_v32  ;;  %v2654_v2 = vmul.f32 %v4060_v27, %v2542_v58 }
 0x491   : > { %v2682_v63 = vadd.f32 %v2681_v37, %v2680_v13  ;;  %v2694_v38 = vadd.f32 %v2693_v62, %v2692_v29  ;;  %v2706_v45 = vadd.f32 %v2705_v7, %v2704_v41  ;;  %v2689_v25 = vadd.f32 %v2688_v39, %v2687_v17 }
 0x492   : > { %v2702_v43 = vrot.slane %v2701_v60, 1  ;;  %v2714_v4 = vrot.slane %v2713_v22, 2  ;;  %v2725_v42 = vsel %vm733_vm0, %v2655_v12, 0.0  ;;  %v3842_v26 = vpop.f32.mrb[42].mxu0  ;;  %v2718_v1 = vsel %vm733_vm0, %v2654_v2, 0.0 }
 0x493   : > { %v2794_v44 = vsel %vm2793_vm4, %v2682_v63, %v2792_v54  ;;  %v2695_v36 = vrot.slane %v2694_v38, 1  ;;  %v2707_v51 = vrot.slane %v2706_v45, 2  ;;  %v2726_v31 = vrot.slane %v2725_v42, 4  ;;  %v2552_v8 = vpop.f32.mrb[43].mxu0 }
 0x494   : > { %v2796_v49 = vsel %vm2795_vm5, %v2689_v25, %v2794_v44  ;;  %v2715_v15 = vadd.f32 %v2714_v4, %v2713_v22  ;;  %v2719_v40 = vrot.slane %v2718_v1, 4  ;;  %v2703_v50 = vadd.f32 %v2702_v43, %v2701_v60 }
 0x495   : > { %v2696_v3 = vadd.f32 %v2695_v36, %v2694_v38  ;;  %v2708_v10 = vadd.f32 %v2707_v51, %v2706_v45  ;;  %v2727_v53 = vadd.f32 %v2726_v31, %v2725_v42  ;;  %v2657_v27 = vmul.f32 %v4066_v9, %v3842_v26 }
 0x496   : > { %v2716_v21 = vrot.slane %v2715_v15, 1  ;;  %v2656_v35 = vmul.f32 %v4064_v28, %v2552_v8  ;;  %v3845_v46 = vpop.f32.mrb[44].mxu0  ;;  %v2720_v24 = vadd.f32 %v2719_v40, %v2718_v1 }
 0x497   : > { %v2798_v18 = vsel %vm2797_vm6, %v2696_v3, %v2796_v49  ;;  %v2709_v34 = vrot.slane %v2708_v10, 1  ;;  %v2728_v33 = vrot.slane %v2727_v53, 2  ;;  %v2562_v48 = vpop.f32.mrb[45].mxu0  ;;  %v2739_v56 = vsel %vm733_vm0, %v2657_v27, 0.0 }
 0x498   : > { %v2800_v6 = vsel %vm2799_vm7, %v2703_v50, %v2798_v18  ;;  %v2732_v11 = vsel %vm733_vm0, %v2656_v35, 0.0  ;;  %v2721_v17 = vrot.slane %v2720_v24, 2  ;;  %v2740_v16 = vrot.slane %v2739_v56, 4 }
 0x499   : > { %v2710_v57 = vadd.f32 %v2709_v34, %v2708_v10  ;;  %v2729_v5 = vadd.f32 %v2728_v33, %v2727_v53  ;;  %v2717_v23 = vadd.f32 %v2716_v21, %v2715_v15  ;;  %v2733_v28 = vrot.slane %v2732_v11, 4 }
 0x49a   : > { %v2659_v9 = vmul.f32 %v4070_v0, %v3845_v46  ;;  %v2658_v30 = vmul.f32 %v4068_v52, %v2562_v48  ;;  %v3848_v13 = vpop.f32.mrb[46].mxu0  ;;  %v2722_v39 = vadd.f32 %v2721_v17, %v2720_v24  ;;  %v2741_v61 = vadd.f32 %v2740_v16, %v2739_v56 }
 0x49b   : > { %v2802_v29 = vsel %vm2801_vm8, %v2710_v57, %v2800_v6  ;;  %v2730_v14 = vrot.slane %v2729_v5, 1  ;;  %v2572_v59 = vpop.f32.mrb[47].mxu0  ;;  %v2734_v32 = vadd.f32 %v2733_v28, %v2732_v11  ;;  %v2661_v22 = vmul.f32 %v5058_v20, %v3848_v13 }
 0x49c   : > { %v2804_v41 = vsel %vm2803_vm9, %v2717_v23, %v2802_v29  ;;  %v2753_v54 = vsel %vm733_vm0, %v2659_v9, 0.0  ;;  %v2746_v37 = vsel %vm733_vm0, %v2658_v30, 0.0  ;;  %v2723_v7 = vrot.slane %v2722_v39, 1  ;;  %v3295_v9 = vld [vmem:[%s5200_s16] ss:$0 sm:$0xff] }
 0x49d   : > { %2815 = vst.msk [vmem:[#allocation2] sm:$0xff] %vm733_vm0, %v2804_v41  ;;  %v2731_v62 = vadd.f32 %v2730_v14, %v2729_v5  ;;  %v2742_v0 = vrot.slane %v2741_v61, 2  ;;  %v2754_v52 = vrot.slane %v2753_v54, 4  ;;  %v2735_v58 = vrot.slane %v2734_v32, 2 }
 0x49e   : > { %v2747_v60 = vrot.slane %v2746_v37, 4  ;;  %v2660_v12 = vmul.f32 %v4074_v47, %v2572_v59  ;;  %v2724_v63 = vadd.f32 %v2723_v7, %v2722_v39  ;;  %v2767_v43 = vsel %vm733_vm0, %v2661_v22, 0.0 }
 0x49f   : > { %v2743_v38 = vadd.f32 %v2742_v0, %v2741_v61  ;;  %v2755_v45 = vadd.f32 %v2754_v52, %v2753_v54  ;;  %v2736_v2 = vadd.f32 %v2735_v58, %v2734_v32  ;;  %v2768_v36 = vrot.slane %v2767_v43, 4 }
 0x4a0   : > { %v2748_v25 = vadd.f32 %v2747_v60, %v2746_v37  ;;  %v2760_v4 = vsel %vm733_vm0, %v2660_v12, 0.0  ;;  %v2805_v42 = vsel %vm2791_vm3, %v2731_v62, %v2724_v63 }
 0x4a1   : > { %v2744_v26 = vrot.slane %v2743_v38, 1  ;;  %v2756_v44 = vrot.slane %v2755_v45, 2  ;;  %v2737_v51 = vrot.slane %v2736_v2, 1  ;;  %v2761_v8 = vrot.slane %v2760_v4, 4 }
 0x4a2   : > { %v2749_v31 = vrot.slane %v2748_v25, 2  ;;  %v2769_v20 = vadd.f32 %v2768_v36, %v2767_v43 }
 0x4a3   : > { %v2757_v49 = vadd.f32 %v2756_v44, %v2755_v45  ;;  %v2738_v47 = vadd.f32 %v2737_v51, %v2736_v2  ;;  %v2762_v1 = vadd.f32 %v2761_v8, %v2760_v4  ;;  %v2745_v10 = vadd.f32 %v2744_v26, %v2743_v38 }
 0x4a4   : > { %v2750_v15 = vadd.f32 %v2749_v31, %v2748_v25  ;;  %v2821_v3 = vld [vmem:[#allocation2] sm:$0xff]  ;;  %v2770_v40 = vrot.slane %v2769_v20, 2 }
 0x4a5   : > { %v2758_v53 = vrot.slane %v2757_v49, 1  ;;  %2823 = vxpose.xlu0.b32.start [1/2] (short) (narrow) %v2821_v3, 16  ;;  %v2806_v50 = vsel %vm2793_vm4, %v2738_v47, %v2805_v42  ;;  %v2763_v27 = vrot.slane %v2762_v1, 2 }
 0x4a6   : > { %v2751_v21 = vrot.slane %v2750_v15, 1  ;;  %v2807_v35 = vsel %vm2795_vm5, %v2745_v10, %v2806_v50  ;;  %v2771_v46 = vadd.f32 %v2770_v40, %v2769_v20 }
 0x4a7   : > { %v2764_v34 = vadd.f32 %v2763_v27, %v2762_v1  ;;  %v2759_v33 = vadd.f32 %v2758_v53, %v2757_v49 }
 0x4a8   : > { %v2752_v18 = vadd.f32 %v2751_v21, %v2750_v15  ;;  %v2772_v24 = vrot.slane %v2771_v46, 1 }
 0x4a9   : > { %v2765_v6 = vrot.slane %v2764_v34, 1 }
 0x4aa   : > { %v2808_v48 = vsel %vm2797_vm6, %v2752_v18, %v2807_v35  ;;  %v2773_v57 = vadd.f32 %v2772_v24, %v2771_v46 }
 0x4ab   : > { %v2809_v56 = vsel %vm2799_vm7, %v2759_v33, %v2808_v48  ;;  %v2766_v11 = vadd.f32 %v2765_v6, %v2764_v34 }
 0x4ad   : > { %v2810_v5 = vsel %vm2801_vm8, %v2766_v11, %v2809_v56 }
 0x4ae   : > { %v2811_v17 = vsel %vm2803_vm9, %v2773_v57, %v2810_v5 }
 0x4af   : > { %2816 = vst.msk [vmem:[#allocation2 + $0x8] sm:$0xff] %vm733_vm0, %v2811_v17 }
 0x4b6   : > { %v2822_v16 = vld [vmem:[#allocation2 + $0x8] sm:$0xff] }
 0x4b7   : > { %2824 = vxpose.xlu0.b32.end [2/2] (short) (narrow) %v2822_v16, 16 }
 0x533   : > { %v2839_v23 = vpop.trf.xlu0 }
 0x534   : > { %v2932_v28 = vadd.f32 %v5047_v55, %v2839_v23 }
 0x536   : > { %v2941_v30 = vmul.f32 0.11111111, %v2932_v28 }
 0x537   : > { %v2840_v13 = vpop.trf.xlu0 }
 0x538   : > { %v2950_v29 = vadd.f32 %v3295_v9, %v2941_v30  ;;  %v2937_v14 = vadd.f32 %v5045_v19, %v2840_v13 }
 0x53a   : > { %2952 = vst.msk [vmem:[%s636_s22] sm:$0xff] %vm733_vm0, %v2950_v29  ;;  %v2942_v39 = vmul.f32 0.11111111, %v2937_v14  ;;  %v2963_v55 = vmul.f32 %v2950_v29, %v2950_v29  ;;  %v2954_v19 = vsel %vm733_vm0, %v2950_v29, 0.0 }
 0x53c   : > { %v2951_v61 = vadd.f32 %v3295_v9, %v2942_v39 }
 0x53e   : > { %2953 = vst.msk [vmem:[%s636_s22 + $0x8] sm:$0xff] %vm733_vm0, %v2951_v61  ;;  %v2955_v59 = vsel %vm733_vm0, %v2951_v61, 0.0  ;;  %v2964_v41 = vmul.f32 %v2951_v61, %v2951_v61 }
 0x53f   : > { %v2956_v32 = vadd.f32 %v2955_v59, %v2954_v19 }
 0x540   : > { %4088 = shalt.err (!%p4085_p5)
}
 0x541   : > { %s4089_s22 = scalar_lea.hbm %s5098_s1, 256  ;;  %s4093_s23 = scalar_lea.hbm %s5201_s17, 512 }
 0x542   : > { %p4090_p6 = scmp.ne.s32.totalorder %s5098_s1, %s4089_s22  ;;  %p4094_p10 = scmp.lt.u32.totalorder %s5098_s1, %s5201_s17 }
 0x543   : > { %p4095_p11 = scmp.lt.u32.totalorder %s4093_s23, %s4089_s22  ;;  %p4097_p13 = scmp.lt.u32.totalorder %s4089_s22, %s5098_s1 }
 0x544   : > { %p4091_p7 = pnand %p4090_p6, %p4326_p4 }
 0x545   : > { %p4096_p12 = por %p4095_p11, %p4094_p10 }
 0x546   : > { %p4092_p9 = pneg %p4091_p7 }
 0x547   : > { %p4098_p0 = por %p4097_p13, %p4096_p12 }
 0x549   : > { %p4099_p1 = pnand %p4098_p0, %p4092_p9 }
 0x54b   : > { %4102 = shalt.err (!%p4099_p1)
}
 0x54c   : > { %s4188_s21 = smov 128   ;;  %s4189_s29 = smov 8   ;;  %v2965_v54 = vsel %vm733_vm0, %v2963_v55, 0.0  ;;  %v2966_v37 = vsel %vm733_vm0, %v2964_v41, 0.0  ;;  %v2957_v62 = vrot.slane %v2956_v32, 4  ;;  %vm2974_vm10 = vcmask 1040384  }
 0x54d   : > { %s5222_s25 = scalar_lea.sflag [#allocation4], %s5085_s20  ;;  %v2967_v7 = vadd.f32 %v2966_v37, %v2965_v54  ;;  %s3156_s27 = sshll.u32 %s5085_s20, 1  ;;  %vm2976_vm0 = vcmask 123904  }
 0x54e   : > { %3980 = dma.vmem_to_hbm [thread:$0]  (%p4326_p4), %s5100_s26, 256, %s5098_s1, %s5222_s25, %s4188_s21, %s4188_s21, %s4189_s29   ;;  %v2958_v0 = vadd.f32 %v2957_v62, %v2956_v32 }
 0x54f   : > { %v2968_v52 = vrot.slane %v2967_v7, 4  ;;  %s3300_s22 = sshll.u32 %s4177_s30, 5  ;;  %s643_s26 = scalar_lea.vmem [#allocation5], %s3156_s27 }
 0x550   : > { %v2959_v58 = vrot.slane %v2958_v0, 2  ;;  %s3013_s1 = sshll.u32 %s643_s26, 4  ;;  %s5136_s0 = scalar_lea.hbm %s5202_s18, %s3300_s22  ;;  %s5138_s1 = int_to_ptr.vmem [resolvable:$true] %s3013_s1 }
 0x551   : > { %v2969_v60 = vadd.f32 %v2968_v52, %v2967_v7  ;;  %s2984_s21 = scalar_lea.sflag [#allocation6], %s5085_s20  ;;  %s4103_s30 = scalar_lea.vmem %s5138_s1, 32 }
 0x552   : > { %v2960_v22 = vadd.f32 %v2959_v58, %v2958_v0  ;;  %p4104_p2 = scmp.ne.s32.totalorder %s5138_s1, %s4103_s30  ;;  %s4190_s29 = smov [#allocation5]  }
 0x553   : > { %v2970_v12 = vrot.slane %v2969_v60, 2  ;;  %s4107_s25 = sshll.u32 %s4190_s29, 4  ;;  %s4108_s25 = int_to_ptr.vmem [resolvable:$false] %s4107_s25 }
 0x554   : > { %v2961_v63 = vrot.slane %v2960_v22, 1  ;;  %p4105_p3 = pnand %p4104_p2, %p4326_p4  ;;  %s4109_s27 = scalar_lea.vmem %s4108_s25, 64 }
 0x555   : > { %v2971_v38 = vadd.f32 %v2970_v12, %v2969_v60  ;;  %p4110_p6 = scmp.lt.s32.totalorder %s5138_s1, %s4108_s25  ;;  %p4111_p7 = scmp.lt.s32.totalorder %s4109_s27, %s4103_s30 }
 0x556   : > { %v2962_v2 = vadd.f32 %v2961_v63, %v2960_v22  ;;  %p4106_p5 = pneg %p4105_p3 }
 0x557   : > { %v2972_v45 = vrot.slane %v2971_v38, 1  ;;  %p4112_p9 = por %p4111_p7, %p4110_p6 }
 0x559   : > { %v2973_v25 = vadd.f32 %v2972_v45, %v2971_v38  ;;  %p4113_p10 = pnand %p4112_p9, %p4106_p5 }
 0x55b   : > { %v2975_v43 = vsel %vm2974_vm10, %v2962_v2, %v2973_v25 }
 0x55c   : > { %2977 = vst.msk [vmem:[%s643_s26] sm:$0x3] %vm2976_vm0, %v2975_v43 }
 0x55d   : > { %4116 = shalt.err (!%p4113_p10)
}
 0x55e   : > { %s4117_s20 = scalar_lea.hbm %s5136_s0, 32  ;;  %s4121_s3 = scalar_lea.hbm %s5202_s18, 64 }
 0x55f   : > { %p4118_p11 = scmp.ne.s32.totalorder %s5136_s0, %s4117_s20  ;;  %p4122_p0 = scmp.lt.u32.totalorder %s5136_s0, %s5202_s18 }
 0x560   : > { %p4123_p1 = scmp.lt.u32.totalorder %s4121_s3, %s4117_s20  ;;  %p4125_p3 = scmp.lt.u32.totalorder %s4117_s20, %s5136_s0 }
 0x561   : > { %p4119_p12 = pnand %p4118_p11, %p4326_p4 }
 0x562   : > { %p4124_p2 = por %p4123_p1, %p4122_p0 }
 0x563   : > { %p4120_p13 = pneg %p4119_p12 }
 0x564   : > { %p4126_p5 = por %p4125_p3, %p4124_p2 }
 0x566   : > { %p4127_p6 = pnand %p4126_p5, %p4120_p13 }
 0x568   : > { %4130 = shalt.err (!%p4127_p6)
}
 0x569   : > { %3981 = dma.vmem_to_hbm [thread:$0]  (%p4326_p4), %s5138_s1, 32, %s5136_s0, %s2984_s21  }
 0x56a PF: > { %s5223_s30 = sld [smem:[#allocation9_spill]]  ;;  %p3991_p7 = scmp.ge.s32.totalorder %s4185_s19, 2 }
 0x56c   : > { %p3985_p9 = pnand %p3991_p7, %p4333_p8 }
 0x570   : > { %s3025_s25 = sand.u32 1, %s5223_s30  }
 0x571   : > { %s3026_s27 = scalar_lea.sflag [#allocation4], %s3025_s25 }
 0x572   : > { %4156 = dma.done.wait (!%p3985_p9), %s3026_s27, 256  }
 0x573   : > { %4158 = vsyncadd (!%p3985_p9), %s3026_s27, 4294967040  ;;  %s3035_s20 = scalar_lea.sflag [#allocation6], %s3025_s25 }
 0x574   : > { %4160 = dma.done.wait (!%p3985_p9), %s3035_s20, 32  }
 0x575   : > { %4162 = vsyncadd (!%p3985_p9), %s3035_s20, 4294967264  ;;  %s35_s19 = sadd.s32 1, %s4185_s19   ;;  %s5224_s2 = sld [smem:[#allocation10_spill]] }
 0x576   : > { %p32_p10 = scmp.ge.s32.totalorder %s35_s19, 4   ;;  %s5225_s29 = sld [smem:[#allocation13_spill]] }
 0x577   : > { %s5226_s30 = sld [smem:[#allocation11_spill]]  ;;  %s5227_s0 = sld [smem:[#allocation12_spill]] }
 0x578   : > { %s5228_s27 = smov %s4169_s28  ;;  %34 = sbr.rel (!%p32_p10) target bundleno = 11 (0xb), region = 151 }
 0x57b   : > { %s5229_s28 = smov %s5224_s2 }
 0x57f   :  { %3040 = vsyncpa [#allocation4], 1 }
 0x580   :  { %3042 = vsyncpa [#allocation4 + $0x1], 1 }
 0x581   :  { %3043 = vsyncpa [#allocation6], 1 }
 0x582   :  { %3045 = vsyncpa [#allocation6 + $0x1], 1 }

</bundles_post_ra>
